<compile_context>
chip_gen: v6e
topology: v6e:2x2x1
jax: 0.10.0
libtpu: 0.0.40
codegen_flags: <defaults>
</compile_context>

<pallas_src>
import functools

import jax
import jax.numpy as jnp
from jax.experimental import pallas as pl
from jax.experimental.pallas import tpu as pltpu

DIM = 512           # resnet18 -> self.dim = 512
BOTTLENECK = 256    # bottleneck_width
WIDTH = 1024        # width
NUM_CLASSES = 10
EPS = 1e-5


# ----------------------------------------------------------------- kernel ---
def _dann_kernel(feats_ref, onehot_ref,
                 bn_w_ref, bn_b_ref, bn_g_ref, bn_beta_ref,
                 cls1_w_ref, cls1_b_ref, cls2_w_ref, cls2_b_ref,
                 dis1_w_ref, dis1_b_ref, dis2_w_ref, dis2_b_ref,
                 dis3_w_ref, dis3_b_ref,
                 loss_ref, *, ns, nt, num_sources):
    n = ns + nt

    def dot(x, w_ref, b_ref):
        # bf16 operands on the MXU, f32 accumulation; f32 bias epilogue (VPU).
        # astype is a no-op when x is already bf16.
        return jnp.dot(x.astype(jnp.bfloat16), w_ref[...],
                       preferred_element_type=jnp.float32) + b_ref[...]

    # Row masks: combined batch is [source rows ; target rows].
    row_ids = jax.lax.broadcasted_iota(jnp.int32, (n, 1), 0)
    mask_s = (row_ids < ns).astype(jnp.float32)                  # (N, 1)
    mask_t = 1.0 - mask_s                                        # (N, 1)

    # ---- bottleneck: Linear -> per-group BatchNorm1d (batch stats) -> ReLU ---
    h = dot(feats_ref[...], bn_w_ref, bn_b_ref)                  # (N, BOTTLENECK) f32

    def group_stats(mask, count):
        mean = jnp.sum(h * mask, axis=0, keepdims=True) / count          # (1, B)
        var = jnp.sum(((h - mean) ** 2) * mask, axis=0, keepdims=True) / count
        return mean, jax.lax.rsqrt(var + EPS)

    mean_s, inv_s = group_stats(mask_s, float(ns))
    mean_t, inv_t = group_stats(mask_t, float(nt))
    mean = mask_s * mean_s + mask_t * mean_t                     # (N, BOTTLENECK)
    inv = mask_s * inv_s + mask_t * inv_t
    y = (h - mean) * inv * bn_g_ref[...] + bn_beta_ref[...]
    # Cast ONCE; this activation feeds both the classifier and discriminator.
    feats = jnp.maximum(y, 0.0).astype(jnp.bfloat16)             # (N, BOTTLENECK)
    # TODO(synk): Dropout(0.5) is identity here.

    # ---- classifier (all rows; CE restricted to source rows) ----------------
    hc = jnp.maximum(dot(feats, cls1_w_ref, cls1_b_ref), 0.0)    # (N, WIDTH)
    logits = dot(hc, cls2_w_ref, cls2_b_ref)                     # (N, NUM_CLASSES)
    m = jnp.max(logits, axis=-1, keepdims=True)
    lse = m + jnp.log(jnp.sum(jnp.exp(logits - m), axis=-1, keepdims=True))
    tgt = jnp.sum(logits * onehot_ref[...], axis=-1, keepdims=True)
    # onehot rows are all-zero for target rows; mask_s also zeroes their lse.
    cls_loss = jnp.sum(mask_s * (lse - tgt), axis=0, keepdims=True) / float(ns)

    # ---- discriminator (ReverseLayerF is identity in forward) ---------------
    hd = jnp.maximum(dot(feats, dis1_w_ref, dis1_b_ref), 0.0)    # (N, WIDTH)
    hd = jnp.maximum(dot(hd, dis2_w_ref, dis2_b_ref), 0.0)       # (N, WIDTH)
    dlogits = dot(hd, dis3_w_ref, dis3_b_ref)                    # (N, 2)
    dm = jnp.max(dlogits, axis=-1, keepdims=True)
    dlse = dm + jnp.log(jnp.sum(jnp.exp(dlogits - dm), axis=-1, keepdims=True))
    # Source rows target class 0, target rows class 1.  Weighting the target
    # rows by num_sources is identical to the reference's
    # cat([s_feats, t_feats repeated num_sources times]) mean-CE.
    dce = dlse - (mask_s * dlogits[:, 0:1] + mask_t * dlogits[:, 1:2])
    w = mask_s + float(num_sources) * mask_t
    dom_loss = (jnp.sum(w * dce, axis=0, keepdims=True)
                / float(ns + num_sources * nt))                  # (1, 1)

    loss_ref[...] = cls_loss + 0.1 * dom_loss


# --------------------------------------------------------------- wrapper ----
def dann_forward(params, s_inputs, s_outputs, t_inputs, alpha):
    del alpha  # only affects gradients via ReverseLayerF; forward is identity.
    num_sources = len(s_inputs)

    all_s = jnp.concatenate(s_inputs, axis=0)
    labels = jnp.concatenate(s_outputs, axis=0).astype(jnp.int32)

    ns = all_s.shape[0]
    nt = t_inputs.shape[0]

    # Synthetic base_network substitute, hoisted out of the kernel: global
    # average pool (streams at HBM bandwidth in XLA) + degenerate K=C<=4
    # projection to DIM.  The kernel only sees (N, DIM) bf16 features.
    pooled = jnp.concatenate(
        [jnp.mean(all_s.astype(jnp.float32), axis=(2, 3)),
         jnp.mean(t_inputs.astype(jnp.float32), axis=(2, 3))], axis=0)  # (N, C)
    feats = (jnp.dot(pooled, params["feat_w"].astype(jnp.float32))
             + params["feat_b"]).astype(jnp.bfloat16)                   # (N, DIM)

    # Host-side one-hot labels; zero rows for the target part of the batch.
    onehot = jnp.concatenate(
        [jax.nn.one_hot(labels, NUM_CLASSES, dtype=jnp.float32),
         jnp.zeros((nt, NUM_CLASSES), jnp.float32)], axis=0)            # (N, 10)

    vmem = pl.BlockSpec(memory_space=pltpu.MemorySpace.VMEM)
    loss = pl.pallas_call(
        functools.partial(_dann_kernel, ns=ns, nt=nt, num_sources=num_sources),
        out_shape=jax.ShapeDtypeStruct((1, 1), jnp.float32),
        in_specs=[vmem] * 16,
        out_specs=vmem,
        compiler_params=pltpu.CompilerParams(vmem_limit_bytes=32 * 1024 * 1024),
    )(feats, onehot,
      params["bn_fc_w"], params["bn_fc_b"], params["bn_gamma"], params["bn_beta"],
      params["cls_fc1_w"], params["cls_fc1_b"],
      params["cls_fc2_w"], params["cls_fc2_b"],
      params["dis_fc1_w"], params["dis_fc1_b"],
      params["dis_fc2_w"], params["dis_fc2_b"],
      params["dis_fc3_w"], params["dis_fc3_b"])
    return loss[0, 0]


# ------------------------------------------------------------- parameters ---
def _linear_init(key, fan_in, fan_out):
    kw, kb = jax.random.split(key)
    bound = 1.0 / (fan_in ** 0.5)
    w = jax.random.uniform(kw, (fan_in, fan_out), jnp.float32, -bound, bound)
    b = jax.random.uniform(kb, (1, fan_out), jnp.float32, -bound, bound)
    return w.astype(jnp.bfloat16), b   # bf16 weights (MXU), f32 biases


def init_params(key, in_channels):
    keys = jax.random.split(key, 7)
    p = {}
    p["feat_w"], p["feat_b"] = _linear_init(keys[0], in_channels, DIM)
    p["bn_fc_w"], p["bn_fc_b"] = _linear_init(keys[1], DIM, BOTTLENECK)
    p["bn_gamma"] = jnp.ones((1, BOTTLENECK), jnp.float32)
    p["bn_beta"] = jnp.zeros((1, BOTTLENECK), jnp.float32)
    p["cls_fc1_w"], p["cls_fc1_b"] = _linear_init(keys[2], BOTTLENECK, WIDTH)
    p["cls_fc2_w"], p["cls_fc2_b"] = _linear_init(keys[3], WIDTH, NUM_CLASSES)
    p["dis_fc1_w"], p["dis_fc1_b"] = _linear_init(keys[4], BOTTLENECK, WIDTH)
    p["dis_fc2_w"], p["dis_fc2_b"] = _linear_init(keys[5], WIDTH, WIDTH)
    p["dis_fc3_w"], p["dis_fc3_b"] = _linear_init(keys[6], WIDTH, 2)
    return p


# -------------------------------------------------------------------- main --
if __name__ == "__main__":
    key = jax.random.PRNGKey(0)
    kp, ks0, ks1, kt, ky0, ky1 = jax.random.split(key, 6)

    B, C, H, W = 2, 4, 16, 16
    params = init_params(kp, C)

    s_inputs = [
        jax.random.normal(ks0, (B, C, H, W), jnp.float32),
        jax.random.normal(ks1, (B, C, H, W), jnp.float32),
    ]
    s_outputs = [
        jax.random.randint(ky0, (B,), 0, NUM_CLASSES),
        jax.random.randint(ky1, (B,), 0, NUM_CLASSES),
    ]
    t_inputs = jax.random.normal(kt, (B, C, H, W), jnp.float32)
    alpha = 0.1

    fwd = jax.jit(functools.partial(dann_forward, params))
    loss = fwd(s_inputs, s_outputs, t_inputs, alpha)
    jax.block_until_ready(loss)
    assert loss.shape == () and jnp.isfinite(loss)
    print("KERNEL_OK")
</pallas_src>

<mosaic_0001>
module attributes {stable_mosaic.version = 11 : i64} {
  func.func @_dann_kernel(%arg0: memref<6x512xbf16, #tpu.memory_space<vmem>>, %arg1: memref<6x10xf32, #tpu.memory_space<vmem>>, %arg2: memref<512x256xbf16, #tpu.memory_space<vmem>>, %arg3: memref<1x256xf32, #tpu.memory_space<vmem>>, %arg4: memref<1x256xf32, #tpu.memory_space<vmem>>, %arg5: memref<1x256xf32, #tpu.memory_space<vmem>>, %arg6: memref<256x1024xbf16, #tpu.memory_space<vmem>>, %arg7: memref<1x1024xf32, #tpu.memory_space<vmem>>, %arg8: memref<1024x10xbf16, #tpu.memory_space<vmem>>, %arg9: memref<1x10xf32, #tpu.memory_space<vmem>>, %arg10: memref<256x1024xbf16, #tpu.memory_space<vmem>>, %arg11: memref<1x1024xf32, #tpu.memory_space<vmem>>, %arg12: memref<1024x1024xbf16, #tpu.memory_space<vmem>>, %arg13: memref<1x1024xf32, #tpu.memory_space<vmem>>, %arg14: memref<1024x2xbf16, #tpu.memory_space<vmem>>, %arg15: memref<1x2xf32, #tpu.memory_space<vmem>>, %arg16: memref<1x1xf32, #tpu.memory_space<vmem>>) attributes {dimension_semantics = [], scalar_prefetch = 0 : i64, scratch_operands = 0 : i64, tpu.core_type = #tpu.core_type<tc>} {
    %0 = tpu.iota {dimensions = array<i32: 0>} : vector<6x1xi32>
    %c4_i32 = arith.constant 4 : i32
    %1 = vector.broadcast %c4_i32 : i32 to vector<6x1xi32>
    %2 = arith.cmpi slt, %0, %1 : vector<6x1xi32>
    %3 = arith.extui %2 : vector<6x1xi1> to vector<6x1xi32>
    %4 = arith.sitofp %3 : vector<6x1xi32> to vector<6x1xf32>
    %cst = arith.constant 1.000000e+00 : f32
    %5 = vector.broadcast %cst : f32 to vector<6x1xf32>
    %6 = arith.subf %5, %4 : vector<6x1xf32>
    %c0 = arith.constant 0 : index
    %c0_0 = arith.constant 0 : index
    %7 = vector.load %arg0[%c0, %c0_0] : memref<6x512xbf16, #tpu.memory_space<vmem>>, vector<6x512xbf16>
    %c0_1 = arith.constant 0 : index
    %c0_2 = arith.constant 0 : index
    %8 = vector.load %arg2[%c0_1, %c0_2] : memref<512x256xbf16, #tpu.memory_space<vmem>>, vector<512x256xbf16>
    %cst_3 = arith.constant dense<0.000000e+00> : vector<6x256xf32>
    %9 = tpu.matmul %7, %8, %cst_3 {dimension_numbers = #tpu.dot_dimension_numbers<[1], [0], [0], [1], [0, 0, 1, 1], [], []>} : vector<6x512xbf16>, vector<512x256xbf16>, vector<6x256xf32> -> vector<6x256xf32>
    %c0_4 = arith.constant 0 : index
    %c0_5 = arith.constant 0 : index
    %10 = vector.load %arg3[%c0_4, %c0_5] : memref<1x256xf32, #tpu.memory_space<vmem>>, vector<1x256xf32>
    %11 = vector.broadcast %10 : vector<1x256xf32> to vector<6x256xf32>
    %12 = arith.addf %9, %11 : vector<6x256xf32>
    %13 = vector.broadcast %4 : vector<6x1xf32> to vector<6x256xf32>
    %14 = arith.mulf %12, %13 : vector<6x256xf32>
    %cst_6 = arith.constant dense<0.000000e+00> : vector<256xf32>
    %15 = vector.multi_reduction <add>, %14, %cst_6 [0] : vector<6x256xf32> to vector<256xf32>
    %16 = vector.shape_cast %15 : vector<256xf32> to vector<1x256xf32>
    %cst_7 = arith.constant 4.000000e+00 : f32
    %17 = vector.broadcast %cst_7 : f32 to vector<1x256xf32>
    %18 = arith.divf %16, %17 : vector<1x256xf32>
    %19 = vector.broadcast %18 : vector<1x256xf32> to vector<6x256xf32>
    %20 = arith.subf %12, %19 : vector<6x256xf32>
    %21 = arith.mulf %20, %20 : vector<6x256xf32>
    %22 = vector.broadcast %4 : vector<6x1xf32> to vector<6x256xf32>
    %23 = arith.mulf %21, %22 : vector<6x256xf32>
    %cst_8 = arith.constant dense<0.000000e+00> : vector<256xf32>
    %24 = vector.multi_reduction <add>, %23, %cst_8 [0] : vector<6x256xf32> to vector<256xf32>
    %25 = vector.shape_cast %24 : vector<256xf32> to vector<1x256xf32>
    %cst_9 = arith.constant 4.000000e+00 : f32
    %26 = vector.broadcast %cst_9 : f32 to vector<1x256xf32>
    %27 = arith.divf %25, %26 : vector<1x256xf32>
    %cst_10 = arith.constant 9.99999974E-6 : f32
    %28 = vector.broadcast %cst_10 : f32 to vector<1x256xf32>
    %29 = arith.addf %27, %28 : vector<1x256xf32>
    %30 = math.rsqrt %29 : vector<1x256xf32>
    %31 = vector.broadcast %6 : vector<6x1xf32> to vector<6x256xf32>
    %32 = arith.mulf %12, %31 : vector<6x256xf32>
    %cst_11 = arith.constant dense<0.000000e+00> : vector<256xf32>
    %33 = vector.multi_reduction <add>, %32, %cst_11 [0] : vector<6x256xf32> to vector<256xf32>
    %34 = vector.shape_cast %33 : vector<256xf32> to vector<1x256xf32>
    %cst_12 = arith.constant 2.000000e+00 : f32
    %35 = vector.broadcast %cst_12 : f32 to vector<1x256xf32>
    %36 = arith.divf %34, %35 : vector<1x256xf32>
    %37 = vector.broadcast %36 : vector<1x256xf32> to vector<6x256xf32>
    %38 = arith.subf %12, %37 : vector<6x256xf32>
    %39 = arith.mulf %38, %38 : vector<6x256xf32>
    %40 = vector.broadcast %6 : vector<6x1xf32> to vector<6x256xf32>
    %41 = arith.mulf %39, %40 : vector<6x256xf32>
    %cst_13 = arith.constant dense<0.000000e+00> : vector<256xf32>
    %42 = vector.multi_reduction <add>, %41, %cst_13 [0] : vector<6x256xf32> to vector<256xf32>
    %43 = vector.shape_cast %42 : vector<256xf32> to vector<1x256xf32>
    %cst_14 = arith.constant 2.000000e+00 : f32
    %44 = vector.broadcast %cst_14 : f32 to vector<1x256xf32>
    %45 = arith.divf %43, %44 : vector<1x256xf32>
    %cst_15 = arith.constant 9.99999974E-6 : f32
    %46 = vector.broadcast %cst_15 : f32 to vector<1x256xf32>
    %47 = arith.addf %45, %46 : vector<1x256xf32>
    %48 = math.rsqrt %47 : vector<1x256xf32>
    %49 = vector.broadcast %4 : vector<6x1xf32> to vector<6x256xf32>
    %50 = vector.broadcast %18 : vector<1x256xf32> to vector<6x256xf32>
    %51 = arith.mulf %49, %50 : vector<6x256xf32>
    %52 = vector.broadcast %6 : vector<6x1xf32> to vector<6x256xf32>
    %53 = vector.broadcast %36 : vector<1x256xf32> to vector<6x256xf32>
    %54 = arith.mulf %52, %53 : vector<6x256xf32>
    %55 = arith.addf %51, %54 : vector<6x256xf32>
    %56 = vector.broadcast %4 : vector<6x1xf32> to vector<6x256xf32>
    %57 = vector.broadcast %30 : vector<1x256xf32> to vector<6x256xf32>
    %58 = arith.mulf %56, %57 : vector<6x256xf32>
    %59 = vector.broadcast %6 : vector<6x1xf32> to vector<6x256xf32>
    %60 = vector.broadcast %48 : vector<1x256xf32> to vector<6x256xf32>
    %61 = arith.mulf %59, %60 : vector<6x256xf32>
    %62 = arith.addf %58, %61 : vector<6x256xf32>
    %63 = arith.subf %12, %55 : vector<6x256xf32>
    %64 = arith.mulf %63, %62 : vector<6x256xf32>
    %c0_16 = arith.constant 0 : index
    %c0_17 = arith.constant 0 : index
    %65 = vector.load %arg4[%c0_16, %c0_17] : memref<1x256xf32, #tpu.memory_space<vmem>>, vector<1x256xf32>
    %66 = vector.broadcast %65 : vector<1x256xf32> to vector<6x256xf32>
    %67 = arith.mulf %64, %66 : vector<6x256xf32>
    %c0_18 = arith.constant 0 : index
    %c0_19 = arith.constant 0 : index
    %68 = vector.load %arg5[%c0_18, %c0_19] : memref<1x256xf32, #tpu.memory_space<vmem>>, vector<1x256xf32>
    %69 = vector.broadcast %68 : vector<1x256xf32> to vector<6x256xf32>
    %70 = arith.addf %67, %69 : vector<6x256xf32>
    %cst_20 = arith.constant 0.000000e+00 : f32
    %71 = vector.broadcast %cst_20 : f32 to vector<6x256xf32>
    %72 = arith.maximumf %70, %71 : vector<6x256xf32>
    %73 = arith.truncf %72 : vector<6x256xf32> to vector<6x256xbf16>
    %c0_21 = arith.constant 0 : index
    %c0_22 = arith.constant 0 : index
    %74 = vector.load %arg6[%c0_21, %c0_22] : memref<256x1024xbf16, #tpu.memory_space<vmem>>, vector<256x1024xbf16>
    %cst_23 = arith.constant dense<0.000000e+00> : vector<6x1024xf32>
    %75 = tpu.matmul %73, %74, %cst_23 {dimension_numbers = #tpu.dot_dimension_numbers<[1], [0], [0], [1], [0, 0, 1, 1], [], []>} : vector<6x256xbf16>, vector<256x1024xbf16>, vector<6x1024xf32> -> vector<6x1024xf32>
    %c0_24 = arith.constant 0 : index
    %c0_25 = arith.constant 0 : index
    %76 = vector.load %arg7[%c0_24, %c0_25] : memref<1x1024xf32, #tpu.memory_space<vmem>>, vector<1x1024xf32>
    %77 = vector.broadcast %76 : vector<1x1024xf32> to vector<6x1024xf32>
    %78 = arith.addf %75, %77 : vector<6x1024xf32>
    %cst_26 = arith.constant 0.000000e+00 : f32
    %79 = vector.broadcast %cst_26 : f32 to vector<6x1024xf32>
    %80 = arith.maximumf %78, %79 : vector<6x1024xf32>
    %81 = arith.truncf %80 : vector<6x1024xf32> to vector<6x1024xbf16>
    %c0_27 = arith.constant 0 : index
    %c0_28 = arith.constant 0 : index
    %82 = vector.load %arg8[%c0_27, %c0_28] : memref<1024x10xbf16, #tpu.memory_space<vmem>>, vector<1024x10xbf16>
    %cst_29 = arith.constant dense<0.000000e+00> : vector<6x10xf32>
    %83 = tpu.matmul %81, %82, %cst_29 {dimension_numbers = #tpu.dot_dimension_numbers<[1], [0], [0], [1], [0, 0, 1, 1], [], []>} : vector<6x1024xbf16>, vector<1024x10xbf16>, vector<6x10xf32> -> vector<6x10xf32>
    %c0_30 = arith.constant 0 : index
    %c0_31 = arith.constant 0 : index
    %84 = vector.load %arg9[%c0_30, %c0_31] : memref<1x10xf32, #tpu.memory_space<vmem>>, vector<1x10xf32>
    %85 = vector.broadcast %84 : vector<1x10xf32> to vector<6x10xf32>
    %86 = arith.addf %83, %85 : vector<6x10xf32>
    %cst_32 = arith.constant dense<0xFF800000> : vector<6xf32>
    %87 = vector.multi_reduction <maximumf>, %86, %cst_32 [1] : vector<6x10xf32> to vector<6xf32>
    %88 = vector.shape_cast %87 : vector<6xf32> to vector<6x1xf32>
    %89 = vector.broadcast %88 : vector<6x1xf32> to vector<6x10xf32>
    %90 = arith.subf %86, %89 : vector<6x10xf32>
    %91 = math.exp %90 : vector<6x10xf32>
    %cst_33 = arith.constant dense<0.000000e+00> : vector<6xf32>
    %92 = vector.multi_reduction <add>, %91, %cst_33 [1] : vector<6x10xf32> to vector<6xf32>
    %93 = vector.shape_cast %92 : vector<6xf32> to vector<6x1xf32>
    %94 = math.log %93 : vector<6x1xf32>
    %95 = arith.addf %88, %94 : vector<6x1xf32>
    %c0_34 = arith.constant 0 : index
    %c0_35 = arith.constant 0 : index
    %96 = vector.load %arg1[%c0_34, %c0_35] : memref<6x10xf32, #tpu.memory_space<vmem>>, vector<6x10xf32>
    %97 = arith.mulf %86, %96 : vector<6x10xf32>
    %cst_36 = arith.constant dense<0.000000e+00> : vector<6xf32>
    %98 = vector.multi_reduction <add>, %97, %cst_36 [1] : vector<6x10xf32> to vector<6xf32>
    %99 = vector.shape_cast %98 : vector<6xf32> to vector<6x1xf32>
    %100 = arith.subf %95, %99 : vector<6x1xf32>
    %101 = arith.mulf %4, %100 : vector<6x1xf32>
    %cst_37 = arith.constant dense<0.000000e+00> : vector<1xf32>
    %102 = vector.multi_reduction <add>, %101, %cst_37 [0] : vector<6x1xf32> to vector<1xf32>
    %103 = vector.shape_cast %102 : vector<1xf32> to vector<1x1xf32>
    %cst_38 = arith.constant 4.000000e+00 : f32
    %104 = vector.broadcast %cst_38 : f32 to vector<1x1xf32>
    %105 = arith.divf %103, %104 : vector<1x1xf32>
    %c0_39 = arith.constant 0 : index
    %c0_40 = arith.constant 0 : index
    %106 = vector.load %arg10[%c0_39, %c0_40] : memref<256x1024xbf16, #tpu.memory_space<vmem>>, vector<256x1024xbf16>
    %cst_41 = arith.constant dense<0.000000e+00> : vector<6x1024xf32>
    %107 = tpu.matmul %73, %106, %cst_41 {dimension_numbers = #tpu.dot_dimension_numbers<[1], [0], [0], [1], [0, 0, 1, 1], [], []>} : vector<6x256xbf16>, vector<256x1024xbf16>, vector<6x1024xf32> -> vector<6x1024xf32>
    %c0_42 = arith.constant 0 : index
    %c0_43 = arith.constant 0 : index
    %108 = vector.load %arg11[%c0_42, %c0_43] : memref<1x1024xf32, #tpu.memory_space<vmem>>, vector<1x1024xf32>
    %109 = vector.broadcast %108 : vector<1x1024xf32> to vector<6x1024xf32>
    %110 = arith.addf %107, %109 : vector<6x1024xf32>
    %cst_44 = arith.constant 0.000000e+00 : f32
    %111 = vector.broadcast %cst_44 : f32 to vector<6x1024xf32>
    %112 = arith.maximumf %110, %111 : vector<6x1024xf32>
    %113 = arith.truncf %112 : vector<6x1024xf32> to vector<6x1024xbf16>
    %c0_45 = arith.constant 0 : index
    %c0_46 = arith.constant 0 : index
    %114 = vector.load %arg12[%c0_45, %c0_46] : memref<1024x1024xbf16, #tpu.memory_space<vmem>>, vector<1024x1024xbf16>
    %cst_47 = arith.constant dense<0.000000e+00> : vector<6x1024xf32>
    %115 = tpu.matmul %113, %114, %cst_47 {dimension_numbers = #tpu.dot_dimension_numbers<[1], [0], [0], [1], [0, 0, 1, 1], [], []>} : vector<6x1024xbf16>, vector<1024x1024xbf16>, vector<6x1024xf32> -> vector<6x1024xf32>
    %c0_48 = arith.constant 0 : index
    %c0_49 = arith.constant 0 : index
    %116 = vector.load %arg13[%c0_48, %c0_49] : memref<1x1024xf32, #tpu.memory_space<vmem>>, vector<1x1024xf32>
    %117 = vector.broadcast %116 : vector<1x1024xf32> to vector<6x1024xf32>
    %118 = arith.addf %115, %117 : vector<6x1024xf32>
    %cst_50 = arith.constant 0.000000e+00 : f32
    %119 = vector.broadcast %cst_50 : f32 to vector<6x1024xf32>
    %120 = arith.maximumf %118, %119 : vector<6x1024xf32>
    %121 = arith.truncf %120 : vector<6x1024xf32> to vector<6x1024xbf16>
    %c0_51 = arith.constant 0 : index
    %c0_52 = arith.constant 0 : index
    %122 = vector.load %arg14[%c0_51, %c0_52] : memref<1024x2xbf16, #tpu.memory_space<vmem>>, vector<1024x2xbf16>
    %cst_53 = arith.constant dense<0.000000e+00> : vector<6x2xf32>
    %123 = tpu.matmul %121, %122, %cst_53 {dimension_numbers = #tpu.dot_dimension_numbers<[1], [0], [0], [1], [0, 0, 1, 1], [], []>} : vector<6x1024xbf16>, vector<1024x2xbf16>, vector<6x2xf32> -> vector<6x2xf32>
    %c0_54 = arith.constant 0 : index
    %c0_55 = arith.constant 0 : index
    %124 = vector.load %arg15[%c0_54, %c0_55] : memref<1x2xf32, #tpu.memory_space<vmem>>, vector<1x2xf32>
    %125 = vector.broadcast %124 : vector<1x2xf32> to vector<6x2xf32>
    %126 = arith.addf %123, %125 : vector<6x2xf32>
    %cst_56 = arith.constant dense<0xFF800000> : vector<6xf32>
    %127 = vector.multi_reduction <maximumf>, %126, %cst_56 [1] : vector<6x2xf32> to vector<6xf32>
    %128 = vector.shape_cast %127 : vector<6xf32> to vector<6x1xf32>
    %129 = vector.broadcast %128 : vector<6x1xf32> to vector<6x2xf32>
    %130 = arith.subf %126, %129 : vector<6x2xf32>
    %131 = math.exp %130 : vector<6x2xf32>
    %cst_57 = arith.constant dense<0.000000e+00> : vector<6xf32>
    %132 = vector.multi_reduction <add>, %131, %cst_57 [1] : vector<6x2xf32> to vector<6xf32>
    %133 = vector.shape_cast %132 : vector<6xf32> to vector<6x1xf32>
    %134 = math.log %133 : vector<6x1xf32>
    %135 = arith.addf %128, %134 : vector<6x1xf32>
    %136 = vector.extract_strided_slice %126 {offsets = [0, 0], sizes = [6, 1], strides = [1, 1]} : vector<6x2xf32> to vector<6x1xf32>
    %137 = arith.mulf %4, %136 : vector<6x1xf32>
    %138 = vector.extract_strided_slice %126 {offsets = [0, 1], sizes = [6, 1], strides = [1, 1]} : vector<6x2xf32> to vector<6x1xf32>
    %139 = arith.mulf %6, %138 : vector<6x1xf32>
    %140 = arith.addf %137, %139 : vector<6x1xf32>
    %141 = arith.subf %135, %140 : vector<6x1xf32>
    %cst_58 = arith.constant 2.000000e+00 : f32
    %142 = vector.broadcast %cst_58 : f32 to vector<6x1xf32>
    %143 = arith.mulf %142, %6 : vector<6x1xf32>
    %144 = arith.addf %4, %143 : vector<6x1xf32>
    %145 = arith.mulf %144, %141 : vector<6x1xf32>
    %cst_59 = arith.constant dense<0.000000e+00> : vector<1xf32>
    %146 = vector.multi_reduction <add>, %145, %cst_59 [0] : vector<6x1xf32> to vector<1xf32>
    %147 = vector.shape_cast %146 : vector<1xf32> to vector<1x1xf32>
    %cst_60 = arith.constant 8.000000e+00 : f32
    %148 = vector.broadcast %cst_60 : f32 to vector<1x1xf32>
    %149 = arith.divf %147, %148 : vector<1x1xf32>
    %cst_61 = arith.constant 1.000000e-01 : f32
    %150 = vector.broadcast %cst_61 : f32 to vector<1x1xf32>
    %151 = arith.mulf %150, %149 : vector<1x1xf32>
    %152 = arith.addf %105, %151 : vector<1x1xf32>
    %c0_62 = arith.constant 0 : index
    %c0_63 = arith.constant 0 : index
    %153 = vector.load %arg16[%c0_62, %c0_63] : memref<1x1xf32, #tpu.memory_space<vmem>>, vector<1x1xf32>
    tpu.vector_store %arg16[%c0_62, %c0_63], %152 {strides = array<i32>} : memref<1x1xf32, #tpu.memory_space<vmem>>, vector<1x1xf32>,
    return
  }
}

</mosaic_0001>

<bundles_post_ra>
// kernel: dann_forward.1
= control target key start
LH: loop header
LB: loop body
LE: loop exit
PB: predicated region body
PF: predicated region fallthrough
CT: control target
= control target key end

     0   :  { %s10212_s0 = inlined_call_operand.vmem [shape: bf16[6,512], index: 0, kind: input, shape index: {}]   ;;  %s10213_s1 = inlined_call_operand.vmem [shape: f32[6,10], index: 1, kind: input, shape index: {}]   ;;  %s10214_s2 = inlined_call_operand.hbm [shape: bf16[512,256], index: 2, kind: input, shape index: {}]   ;;  %s10215_s3 = inlined_call_operand.hbm [shape: f32[1,256], index: 3, kind: input, shape index: {}]   ;;  %s10216_s4 = inlined_call_operand.vmem [shape: f32[1,256], index: 4, kind: input, shape index: {}]   ;;  %s10217_s5 = inlined_call_operand.vmem [shape: f32[1,256], index: 5, kind: input, shape index: {}]   ;;  %s10218_s6 = inlined_call_operand.hbm [shape: bf16[256,1024], index: 6, kind: input, shape index: {}]   ;;  %s10219_s7 = inlined_call_operand.hbm [shape: f32[1,1024], index: 7, kind: input, shape index: {}]   ;;  %s10220_s8 = inlined_call_operand.hbm [shape: bf16[1024,10], index: 8, kind: input, shape index: {}]   ;;  %s10221_s9 = inlined_call_operand.hbm [shape: f32[1,10], index: 9, kind: input, shape index: {}]   ;;  %s10222_s10 = inlined_call_operand.hbm [shape: bf16[256,1024], index: 10, kind: input, shape index: {}]   ;;  %s10223_s11 = inlined_call_operand.hbm [shape: f32[1,1024], index: 11, kind: input, shape index: {}]   ;;  %s10224_s12 = inlined_call_operand.hbm [shape: bf16[1024,1024], index: 12, kind: input, shape index: {}]   ;;  %s10225_s13 = inlined_call_operand.hbm [shape: f32[1,1024], index: 13, kind: input, shape index: {}]   ;;  %s10226_s14 = inlined_call_operand.hbm [shape: bf16[1024,2], index: 14, kind: input, shape index: {}]   ;;  %s10227_s15 = inlined_call_operand.hbm [shape: f32[1,2], index: 15, kind: input, shape index: {}]   ;;  %s10228_s16 = inlined_call_operand.hbm [shape: f32[1,1], index: 16, kind: output, shape index: {}]  }
   0x1   :  { %10230 = sst [smem:[#allocation31_spill]] %s10212_s0 }
   0x2   :  { %21 = vsyncpa [#allocation3], 0 }
   0x3   :  { %22 = vsyncpa [#allocation6], 0 }
   0x4   :  { %23 = vsyncpa [#allocation9], 0 }
   0x5   :  { %24 = vsyncpa [#allocation12], 0 }
   0x6   :  { %25 = vsyncpa [#allocation15], 0 }
   0x7   :  { %26 = vsyncpa [#allocation18], 0 }
   0x8   :  { %27 = vsyncpa [#allocation21], 0 }
   0x9   :  { %28 = vsyncpa [#allocation4], 0  ;;  %s9741_s21 = smov [#allocation5]   ;;  %s9742_s23 = smov [#allocation8]  }
   0xa   :  { %s51_s22 = sshll.u32 %s9741_s21, 4  ;;  %s77_s24 = sshll.u32 %s9742_s23, 4  ;;  %s52_s22 = int_to_ptr.vmem [resolvable:$true] %s51_s22  ;;  %s78_s24 = int_to_ptr.vmem [resolvable:$true] %s77_s24 }
   0xb   :  { %s9473_s25 = scalar_lea.vmem %s52_s22, 32  ;;  %p9478_p1 = scmp.lt.s32.totalorder %s52_s22, %s52_s22 }
   0xc   :  { %p9474_p0 = scmp.ne.s32.totalorder %s52_s22, %s9473_s25  ;;  %p9479_p2 = scmp.lt.s32.totalorder %s9473_s25, %s9473_s25 }
   0xe   :  { %p9480_p3 = por %p9479_p2, %p9478_p1 }
  0x10   :  { %p9481_p4 = pnand %p9480_p3, %p9474_p0 }
  0x12   :  { %9484 = shalt.err (!%p9481_p4)
}
  0x13   :  { %54 = dma.hbm_to_vmem [thread:$0]  %s10215_s3, 32, %s52_s22, [#allocation6]  }
  0x14   :  { %s9493_s28 = scalar_lea.vmem %s78_s24, 128  ;;  %p9498_p6 = scmp.lt.s32.totalorder %s78_s24, %s78_s24 }
  0x15   :  { %p9494_p5 = scmp.ne.s32.totalorder %s78_s24, %s9493_s28  ;;  %p9499_p7 = scmp.lt.s32.totalorder %s9493_s28, %s9493_s28 }
  0x17   :  { %p9500_p8 = por %p9499_p7, %p9498_p6 }
  0x19   :  { %p9501_p9 = pnand %p9500_p8, %p9494_p5 }
  0x1b   :  { %9504 = shalt.err (!%p9501_p9)
}
  0x1c   :  { %80 = dma.hbm_to_vmem [thread:$0]  %s10219_s7, 128, %s78_s24, [#allocation9]  }
  0x1d   :  { %s9743_s0 = smov [#allocation11]   ;;  %s9744_s18 = smov [#allocation14]  }
  0x1e   :  { %s99_s17 = sshll.u32 %s9743_s0, 4  ;;  %s121_s19 = sshll.u32 %s9744_s18, 4  ;;  %s100_s17 = int_to_ptr.vmem [resolvable:$true] %s99_s17  ;;  %s122_s19 = int_to_ptr.vmem [resolvable:$true] %s121_s19 }
  0x1f   :  { %s9513_s20 = scalar_lea.vmem %s100_s17, 16  ;;  %s9517_s3 = scalar_lea.vmem %s100_s17, 32 }
  0x20   :  { %p9514_p10 = scmp.ne.s32.totalorder %s100_s17, %s9513_s20  ;;  %p9518_p11 = scmp.lt.s32.totalorder %s100_s17, %s100_s17 }
  0x21   :  { %p9519_p12 = scmp.lt.s32.totalorder %s9517_s3, %s9513_s20 }
  0x23   :  { %p9520_p13 = por %p9519_p12, %p9518_p11 }
  0x25   :  { %p9521_p0 = pnand %p9520_p13, %p9514_p10 }
  0x27   :  { %9524 = shalt.err (!%p9521_p0)
}
  0x28   :  { %102 = dma.hbm_to_vmem [thread:$0]  %s10221_s9, 16, %s100_s17, [#allocation12]  }
  0x29   :  { %s9533_s23 = scalar_lea.vmem %s122_s19, 128  ;;  %p9538_p2 = scmp.lt.s32.totalorder %s122_s19, %s122_s19 }
  0x2a   :  { %p9534_p1 = scmp.ne.s32.totalorder %s122_s19, %s9533_s23  ;;  %p9539_p3 = scmp.lt.s32.totalorder %s9533_s23, %s9533_s23 }
  0x2c   :  { %p9540_p4 = por %p9539_p3, %p9538_p2 }
  0x2e   :  { %p9541_p5 = pnand %p9540_p4, %p9534_p1 }
  0x30   :  { %9544 = shalt.err (!%p9541_p5)
}
  0x31   :  { %124 = dma.hbm_to_vmem [thread:$0]  %s10223_s11, 128, %s122_s19, [#allocation15]  }
  0x32   :  { %s9745_s25 = smov [#allocation17]   ;;  %s9746_s27 = smov [#allocation2]  }
  0x33   :  { %s143_s26 = sshll.u32 %s9745_s25, 4  ;;  %s38_s28 = sshll.u32 %s9746_s27, 4  ;;  %s144_s26 = int_to_ptr.vmem [resolvable:$true] %s143_s26  ;;  %s39_s28 = int_to_ptr.vmem [resolvable:$true] %s38_s28 }
  0x34   :  { %s9553_s29 = scalar_lea.vmem %s144_s26, 128  ;;  %p9558_p7 = scmp.lt.s32.totalorder %s144_s26, %s144_s26 }
  0x35   :  { %p9554_p6 = scmp.ne.s32.totalorder %s144_s26, %s9553_s29  ;;  %p9559_p8 = scmp.lt.s32.totalorder %s9553_s29, %s9553_s29 }
  0x37   :  { %p9560_p9 = por %p9559_p8, %p9558_p7 }
  0x39   :  { %p9561_p10 = pnand %p9560_p9, %p9554_p6 }
  0x3b   :  { %9564 = shalt.err (!%p9561_p10)
}
  0x3c   :  { %146 = dma.hbm_to_vmem [thread:$0]  %s10225_s13, 128, %s144_s26, [#allocation18]  }
  0x3d   :  { %s9573_s0 = scalar_lea.vmem %s39_s28, 8192  ;;  %p9578_p12 = scmp.lt.s32.totalorder %s39_s28, %s39_s28 }
  0x3e   :  { %p9574_p11 = scmp.ne.s32.totalorder %s39_s28, %s9573_s0  ;;  %p9579_p13 = scmp.lt.s32.totalorder %s9573_s0, %s9573_s0 }
  0x40   :  { %p9580_p0 = por %p9579_p13, %p9578_p12 }
  0x42   :  { %p9581_p1 = pnand %p9580_p0, %p9574_p11 }
  0x44   :  { %9584 = shalt.err (!%p9581_p1)
}
  0x45   :  { %s9747_s11 = smov 128   ;;  %s9748_s17 = smov 8  }
  0x46   :  { %44 = dma.hbm_to_vmem [thread:$0]  %s10214_s2, 8192, %s39_s28, [#allocation3], %s9747_s11, %s9747_s11, %s9748_s17  }
  0x47   :  { %s9749_s20 = smov [#allocation7]  }
  0x48   :  { %s64_s3 = sshll.u32 %s9749_s20, 4  ;;  %s65_s3 = int_to_ptr.vmem [resolvable:$true] %s64_s3 }
  0x49   :  { %s9593_s21 = scalar_lea.vmem %s65_s3, 16384  ;;  %p9598_p3 = scmp.lt.s32.totalorder %s65_s3, %s65_s3 }
  0x4a   :  { %p9594_p2 = scmp.ne.s32.totalorder %s65_s3, %s9593_s21  ;;  %p9599_p4 = scmp.lt.s32.totalorder %s9593_s21, %s9593_s21 }
  0x4c   :  { %p9600_p5 = por %p9599_p4, %p9598_p3 }
  0x4e   :  { %p9601_p6 = pnand %p9600_p5, %p9594_p2 }
  0x50   :  { %9604 = shalt.err (!%p9601_p6)
}
  0x51   :  { %s9750_s13 = smov 512   ;;  %s9751_s22 = smov 32  }
  0x52   :  { %70 = dma.hbm_to_vmem [thread:$0]  %s10218_s6, 16384, %s65_s3, [#allocation6], %s9750_s13, %s9750_s13, %s9751_s22  }
  0x53   :  { %s9752_s2 = smov [#allocation10]  }
  0x54   :  { %s86_s24 = sshll.u32 %s9752_s2, 4  ;;  %s87_s24 = int_to_ptr.vmem [resolvable:$true] %s86_s24 }
  0x55   :  { %s9613_s25 = scalar_lea.vmem %s87_s24, 8192  ;;  %p9618_p8 = scmp.lt.s32.totalorder %s87_s24, %s87_s24 }
  0x56   :  { %p9614_p7 = scmp.ne.s32.totalorder %s87_s24, %s9613_s25  ;;  %p9619_p9 = scmp.lt.s32.totalorder %s9613_s25, %s9613_s25 }
  0x58   :  { %p9620_p10 = por %p9619_p9, %p9618_p8 }
  0x5a   :  { %p9621_p11 = pnand %p9620_p10, %p9614_p7 }
  0x5c   :  { %9624 = shalt.err (!%p9621_p11)
}
  0x5d   :  { %s9753_s26 = smov 64   ;;  %s9754_s27 = smov 4  }
  0x5e   :  { %92 = dma.hbm_to_vmem [thread:$0]  %s10220_s8, 8192, %s87_s24, [#allocation9], %s9753_s26, %s9753_s26, %s9754_s27  }
  0x5f   :  { %s9755_s6 = smov [#allocation13]   ;;  %s9756_s30 = smov [#allocation16]  }
  0x60   :  { %s108_s9 = sshll.u32 %s9755_s6, 4  ;;  %s130_s0 = sshll.u32 %s9756_s30, 4  ;;  %s109_s9 = int_to_ptr.vmem [resolvable:$true] %s108_s9  ;;  %s131_s0 = int_to_ptr.vmem [resolvable:$true] %s130_s0 }
  0x61   :  { %s9633_s11 = scalar_lea.vmem %s109_s9, 16384  ;;  %p9638_p13 = scmp.lt.s32.totalorder %s109_s9, %s109_s9 }
  0x62   :  { %p9634_p12 = scmp.ne.s32.totalorder %s109_s9, %s9633_s11  ;;  %p9639_p0 = scmp.lt.s32.totalorder %s9633_s11, %s9633_s11 }
  0x64   :  { %p9640_p1 = por %p9639_p0, %p9638_p13 }
  0x66   :  { %p9641_p2 = pnand %p9640_p1, %p9634_p12 }
  0x68   :  { %9644 = shalt.err (!%p9641_p2)
}
  0x69   :  { %114 = dma.hbm_to_vmem [thread:$0]  %s10222_s10, 16384, %s109_s9, [#allocation12], %s9750_s13, %s9750_s13, %s9751_s22  }
  0x6a   :  { %s9653_s8 = scalar_lea.vmem %s131_s0, 65536  ;;  %p9658_p4 = scmp.lt.s32.totalorder %s131_s0, %s131_s0 }
  0x6b   :  { %p9654_p3 = scmp.ne.s32.totalorder %s131_s0, %s9653_s8  ;;  %p9659_p5 = scmp.lt.s32.totalorder %s9653_s8, %s9653_s8 }
  0x6d   :  { %p9660_p6 = por %p9659_p5, %p9658_p4 }
  0x6f   :  { %p9661_p7 = pnand %p9660_p6, %p9654_p3 }
  0x71   :  { %9664 = shalt.err (!%p9661_p7)
}
  0x72   :  { %136 = dma.hbm_to_vmem [thread:$0]  %s10224_s12, 65536, %s131_s0, [#allocation15], %s9750_s13, %s9750_s13, %s9751_s22  }
  0x73   :  { %s9757_s3 = smov [#allocation19]   ;;  %s9758_s23 = smov [#allocation20]  }
  0x74   :  { %s152_s21 = sshll.u32 %s9757_s3, 4  ;;  %s165_s7 = sshll.u32 %s9758_s23, 4  ;;  %s153_s21 = int_to_ptr.vmem [resolvable:$true] %s152_s21  ;;  %s166_s7 = int_to_ptr.vmem [resolvable:$true] %s165_s7 }
  0x75   :  { %s9673_s10 = scalar_lea.vmem %s153_s21, 8192  ;;  %p9678_p9 = scmp.lt.s32.totalorder %s153_s21, %s153_s21 }
  0x76   :  { %p9674_p8 = scmp.ne.s32.totalorder %s153_s21, %s9673_s10  ;;  %p9679_p10 = scmp.lt.s32.totalorder %s9673_s10, %s9673_s10 }
  0x78   :  { %p9680_p11 = por %p9679_p10, %p9678_p9 }
  0x7a   :  { %p9681_p12 = pnand %p9680_p11, %p9674_p8 }
  0x7c   :  { %9684 = shalt.err (!%p9681_p12)
}
  0x7d   :  { %158 = dma.hbm_to_vmem [thread:$0]  %s10226_s14, 8192, %s153_s21, [#allocation18], %s9753_s26, %s9753_s26, %s9754_s27  }
  0x7e   :  { %s9693_s12 = scalar_lea.vmem %s166_s7, 16  ;;  %s9697_s13 = scalar_lea.vmem %s166_s7, 32 }
  0x7f   :  { %p9694_p13 = scmp.ne.s32.totalorder %s166_s7, %s9693_s12  ;;  %p9698_p0 = scmp.lt.s32.totalorder %s166_s7, %s166_s7 }
  0x80   :  { %p9699_p1 = scmp.lt.s32.totalorder %s9697_s13, %s9693_s12 }
  0x82   :  { %p9700_p2 = por %p9699_p1, %p9698_p0 }
  0x84   :  { %p9701_p3 = pnand %p9700_p2, %p9694_p13 }
  0x86   :  { %9704 = shalt.err (!%p9701_p3)
}
  0x87   :  { %168 = dma.hbm_to_vmem [thread:$0]  %s10227_s15, 16, %s166_s7, [#allocation21]  }
  0x88   :  { %9725 = dma.done.wait [#allocation3], 8192  }
  0x89   :  { %9726 = vsyncadd [#allocation3], 4294959104 }
  0x8a   :  { %9727 = dma.done.wait [#allocation6], 16416  }
  0x8b   :  { %9728 = vsyncadd [#allocation6], 4294950880 }
  0x8c   :  { %9729 = dma.done.wait [#allocation9], 8320  }
  0x8d   :  { %9730 = vsyncadd [#allocation9], 4294958976 }
  0x8e   :  { %9731 = dma.done.wait [#allocation12], 16400  }
  0x8f   :  { %9732 = vsyncadd [#allocation12], 4294950896 }
  0x90   :  { %9733 = dma.done.wait [#allocation15], 65664  }
  0x91   :  { %9734 = vsyncadd [#allocation15], 4294901632 }
  0x92   :  { %9735 = dma.done.wait [#allocation18], 8320  }
  0x93   :  { %9736 = vsyncadd [#allocation18], 4294958976 }
  0x94   :  { %9737 = dma.done.wait [#allocation21], 16  }
  0x95   :  { %9738 = vsyncadd [#allocation21], 4294967280  ;;  %v9220_v0 = vld [vmem:[#allocation2 + $0x74] ss:$8 sps:$4 sm:$0xff]   ;;  %v9224_v2 = vld [vmem:[#allocation2 + $0x70] ss:$8 sps:$4 sm:$0xff]  }
  0x96   :  { %v9222_v1 = vld [vmem:[#allocation2 + $0x174] ss:$8 sps:$4 sm:$0xff]   ;;  %624 = vmatprep.subr.bf16.mxu0 %v9220_v0  ;;  %v9225_v3 = vld [vmem:[#allocation2 + $0x170] ss:$8 sps:$4 sm:$0xff]   ;;  %v9226_v4 = vld [vmem:[#allocation2 + $0x64] ss:$8 sps:$4 sm:$0xff]  }
  0x97   :  { %665 = vmatprep.subr.bf16.mxu1 %v9222_v1  ;;  %625 = vmatpush1.bf16.msra.mxu0 %v9224_v2  ;;  %v9228_v5 = vld [vmem:[#allocation2 + $0x164] ss:$8 sps:$4 sm:$0xff]   ;;  %v9230_v6 = vld [vmem:[#allocation2 + $0x60] ss:$8 sps:$4 sm:$0xff]   ;;  %v9232_v8 = vld [vmem:[#allocation2 + $0x54] ss:$8 sps:$4 sm:$0xff]  }
  0x98   :  { %666 = vmatpush1.bf16.msra.mxu1 %v9225_v3  ;;  %626 = vmatprep.subr.bf16.mxu0 %v9226_v4  ;;  %v9231_v7 = vld [vmem:[#allocation2 + $0x160] ss:$8 sps:$4 sm:$0xff]   ;;  %v9234_v9 = vld [vmem:[#allocation2 + $0x154] ss:$8 sps:$4 sm:$0xff]   ;;  %v9236_v10 = vld [vmem:[#allocation2 + $0x50] ss:$8 sps:$4 sm:$0xff]  }
  0x99   :  { %667 = vmatprep.subr.bf16.mxu1 %v9228_v5  ;;  %v9237_v11 = vld [vmem:[#allocation2 + $0x150] ss:$8 sps:$4 sm:$0xff]   ;;  %v9238_v12 = vld [vmem:[#allocation2 + $0x44] ss:$8 sps:$4 sm:$0xff]   ;;  %v9242_v14 = vld [vmem:[#allocation2 + $0x40] ss:$8 sps:$4 sm:$0xff]  }
  0x9a   :  { %v9240_v13 = vld [vmem:[#allocation2 + $0x144] ss:$8 sps:$4 sm:$0xff]   ;;  %v9243_v15 = vld [vmem:[#allocation2 + $0x140] ss:$8 sps:$4 sm:$0xff]   ;;  %v9244_v16 = vld [vmem:[#allocation2 + $0x34] ss:$8 sps:$4 sm:$0xff]  }
  0x9b   :  { %627 = vmatpush1.bf16.msra.mxu0 %v9230_v6  ;;  %v9246_v17 = vld [vmem:[#allocation2 + $0x134] ss:$8 sps:$4 sm:$0xff]   ;;  %v9248_v18 = vld [vmem:[#allocation2 + $0x30] ss:$8 sps:$4 sm:$0xff]   ;;  %v9250_v20 = vld [vmem:[#allocation2 + $0x24] ss:$8 sps:$4 sm:$0xff]  }
  0x9c   :  { %668 = vmatpush1.bf16.msra.mxu1 %v9231_v7  ;;  %628 = vmatprep.subr.bf16.mxu0 %v9232_v8  ;;  %v9249_v19 = vld [vmem:[#allocation2 + $0x130] ss:$8 sps:$4 sm:$0xff]   ;;  %v9252_v21 = vld [vmem:[#allocation2 + $0x124] ss:$8 sps:$4 sm:$0xff]   ;;  %v9254_v22 = vld [vmem:[#allocation2 + $0x20] ss:$8 sps:$4 sm:$0xff]  }
  0x9d   :  { %669 = vmatprep.subr.bf16.mxu1 %v9234_v9  ;;  %v9255_v23 = vld [vmem:[#allocation2 + $0x120] ss:$8 sps:$4 sm:$0xff]   ;;  %v9256_v24 = vld [vmem:[#allocation2 + $0x14] ss:$8 sps:$4 sm:$0xff]   ;;  %v9260_v26 = vld [vmem:[#allocation2 + $0x10] ss:$8 sps:$4 sm:$0xff]  }
  0x9e   :  { %v9258_v25 = vld [vmem:[#allocation2 + $0x114] ss:$8 sps:$4 sm:$0xff]   ;;  %v9261_v27 = vld [vmem:[#allocation2 + $0x110] ss:$8 sps:$4 sm:$0xff]   ;;  %v9262_v28 = vld [vmem:[#allocation2 + $0x4] ss:$8 sps:$4 sm:$0xff]  }
  0x9f   :  { %629 = vmatpush1.bf16.msra.mxu0 %v9236_v10  ;;  %v9264_v29 = vld [vmem:[#allocation2 + $0x104] ss:$8 sps:$4 sm:$0xff]   ;;  %v9266_v30 = vld [vmem:[#allocation2] ss:$8 sps:$4 sm:$0xff]   ;;  %v9268_v32 = vld [vmem:[#allocation2 + $0xf4] ss:$8 sps:$4 sm:$0xff]  }
  0xa0   :  { %670 = vmatpush1.bf16.msra.mxu1 %v9237_v11  ;;  %630 = vmatprep.subr.bf16.mxu0 %v9238_v12  ;;  %v9267_v31 = vld [vmem:[#allocation2 + $0x100] ss:$8 sps:$4 sm:$0xff]   ;;  %v9270_v33 = vld [vmem:[#allocation2 + $0x1f4] ss:$8 sps:$4 sm:$0xff]   ;;  %v9272_v34 = vld [vmem:[#allocation2 + $0xf0] ss:$8 sps:$4 sm:$0xff]  }
  0xa1   :  { %671 = vmatprep.subr.bf16.mxu1 %v9240_v13  ;;  %v9273_v35 = vld [vmem:[#allocation2 + $0x1f0] ss:$8 sps:$4 sm:$0xff]   ;;  %v9274_v36 = vld [vmem:[#allocation2 + $0xe4] ss:$8 sps:$4 sm:$0xff]   ;;  %v9278_v38 = vld [vmem:[#allocation2 + $0xe0] ss:$8 sps:$4 sm:$0xff]  }
  0xa2   :  { %v9276_v37 = vld [vmem:[#allocation2 + $0x1e4] ss:$8 sps:$4 sm:$0xff]   ;;  %v9279_v39 = vld [vmem:[#allocation2 + $0x1e0] ss:$8 sps:$4 sm:$0xff]   ;;  %v9280_v40 = vld [vmem:[#allocation2 + $0xd4] ss:$8 sps:$4 sm:$0xff]  }
  0xa3   :  { %631 = vmatpush1.bf16.msra.mxu0 %v9242_v14  ;;  %v9282_v41 = vld [vmem:[#allocation2 + $0x1d4] ss:$8 sps:$4 sm:$0xff]   ;;  %v9284_v42 = vld [vmem:[#allocation2 + $0xd0] ss:$8 sps:$4 sm:$0xff]   ;;  %v9286_v44 = vld [vmem:[#allocation2 + $0xc4] ss:$8 sps:$4 sm:$0xff]  }
  0xa4   :  { %672 = vmatpush1.bf16.msra.mxu1 %v9243_v15  ;;  %632 = vmatprep.subr.bf16.mxu0 %v9244_v16  ;;  %v9285_v43 = vld [vmem:[#allocation2 + $0x1d0] ss:$8 sps:$4 sm:$0xff]   ;;  %v9288_v45 = vld [vmem:[#allocation2 + $0x1c4] ss:$8 sps:$4 sm:$0xff]   ;;  %v9290_v46 = vld [vmem:[#allocation2 + $0xc0] ss:$8 sps:$4 sm:$0xff]  }
  0xa5   :  { %673 = vmatprep.subr.bf16.mxu1 %v9246_v17  ;;  %v9291_v47 = vld [vmem:[#allocation2 + $0x1c0] ss:$8 sps:$4 sm:$0xff]   ;;  %s10231_s26 = sld [smem:[#allocation31_spill]]  ;;  %v9292_v49 = vld [vmem:[#allocation2 + $0xb4] ss:$8 sps:$4 sm:$0xff]   ;;  %vm708_vm1 = vcmask 1045504  }
  0xa6   :  { %v9294_v50 = vld [vmem:[#allocation2 + $0x1b4] ss:$8 sps:$4 sm:$0xff]   ;;  %v9296_v54 = vld [vmem:[#allocation2 + $0xb0] ss:$8 sps:$4 sm:$0xff]   ;;  %v9298_v56 = vld [vmem:[#allocation2 + $0xa4] ss:$8 sps:$4 sm:$0xff]  }
  0xa7   :  { %633 = vmatpush1.bf16.msra.mxu0 %v9248_v18  ;;  %v9297_v55 = vld [vmem:[#allocation2 + $0x1b0] ss:$8 sps:$4 sm:$0xff]   ;;  %v9300_v57 = vld [vmem:[#allocation2 + $0x1a4] ss:$8 sps:$4 sm:$0xff]   ;;  %v9302_v58 = vld [vmem:[#allocation2 + $0xa0] ss:$8 sps:$4 sm:$0xff]  }
  0xa8   :  { %674 = vmatpush1.bf16.msra.mxu1 %v9249_v19  ;;  %634 = vmatprep.subr.bf16.mxu0 %v9250_v20  ;;  %v9303_v59 = vld [vmem:[#allocation2 + $0x1a0] ss:$8 sps:$4 sm:$0xff]   ;;  %v9304_v60 = vld [vmem:[#allocation2 + $0x94] ss:$8 sps:$4 sm:$0xff]   ;;  %v9308_v62 = vld [vmem:[#allocation2 + $0x90] ss:$8 sps:$4 sm:$0xff]  }
  0xa9   :  { %675 = vmatprep.subr.bf16.mxu1 %v9252_v21  ;;  %v9306_v61 = vld [vmem:[#allocation2 + $0x194] ss:$8 sps:$4 sm:$0xff]   ;;  %v9309_v63 = vld [vmem:[#allocation2 + $0x190] ss:$8 sps:$4 sm:$0xff]   ;;  %v9310_v0 = vld [vmem:[#allocation2 + $0x84] ss:$8 sps:$4 sm:$0xff]  }
  0xaa   :  { %v9312_v1 = vld [vmem:[#allocation2 + $0x184] ss:$8 sps:$4 sm:$0xff]   ;;  %v9314_v2 = vld [vmem:[#allocation2 + $0x80] ss:$8 sps:$4 sm:$0xff]   ;;  %vm7997_vm2 = vcmask 13312   ;;  %vm2514_vm3 = vcmask 78848  }
  0xab   :  { %635 = vmatpush1.bf16.msra.mxu0 %v9254_v22  ;;  %v212_v48 = vld [vmem:[%s10231_s26] sm:$0x77]  ;;  %v213_v52 = vld [vmem:[%s10231_s26 + $0x8] sm:$0x77]  ;;  %vm8021_vm4 = vcmask 5120   ;;  %s9761_s0 = smov [#allocation22]  }
  0xac   :  { %676 = vmatpush1.bf16.msra.mxu1 %v9255_v23  ;;  %636 = vmatprep.subr.bf16.mxu0 %v9256_v24  ;;  %v8058_v51 = vcombine.high %v212_v48, %v212_v48  ;;  %v8060_v53 = vcombine.high %v213_v52, %v213_v52  ;;  %v9315_v3 = vld [vmem:[#allocation2 + $0x180] ss:$8 sps:$4 sm:$0xff]   ;;  %v8057_v4 = vcombine.low %v212_v48, %v212_v48  ;;  %s8041_s11 = sshll.u32 %s9761_s0, 4  ;;  %vm8033_vm5 = vcmask 0   ;;  %s8042_s11 = int_to_ptr.vmem [resolvable:$true] %s8041_s11 }
  0xad   :  { %677 = vmatprep.subr.bf16.mxu1 %v9258_v25  ;;  %v8059_v5 = vcombine.low %v213_v52, %v213_v52  ;;  %v901_v6 = vld [vmem:[#allocation7 + $0x1c0] sm:$0xff]  ;;  %v902_v8 = vld [vmem:[#allocation7 + $0x1c8] sm:$0xff]  ;;  %s9705_s17 = scalar_lea.vmem %s8042_s11, 16  ;;  %s9709_s18 = scalar_lea.vmem %s8042_s11, 32 }
  0xae   :  { %656 = vmatprep.mubr.bf16.mxu0 %v8058_v51  ;;  %697 = vmatprep.mubr.bf16.mxu1 %v8060_v53  ;;  %v905_v7 = vld [vmem:[#allocation7 + $0x1e0] sm:$0xff]  ;;  %v906_v10 = vld [vmem:[#allocation7 + $0x1e8] sm:$0xff]  ;;  %p9706_p4 = scmp.ne.s32.totalorder %s8042_s11, %s9705_s17  ;;  %p9710_p5 = scmp.lt.s32.totalorder %s8042_s11, %s8042_s11 }
  0xaf   :  { %637 = vmatpush1.bf16.msra.mxu0 %v9260_v26  ;;  %v8182_v9 = vcombine.high %v901_v6, %v905_v7  ;;  %v8181_v11 = vcombine.low %v901_v6, %v905_v7  ;;  %v8183_v12 = vcombine.low %v902_v8, %v906_v10  ;;  %v8184_v13 = vcombine.high %v902_v8, %v906_v10  ;;  %v893_v14 = vld [vmem:[#allocation7 + $0x180] sm:$0xff]  ;;  %v894_v16 = vld [vmem:[#allocation7 + $0x188] sm:$0xff]  ;;  %p9711_p6 = scmp.lt.s32.totalorder %s9709_s18, %s9705_s17 }
  0xb0   :  { %678 = vmatpush1.bf16.msra.mxu1 %v9261_v27  ;;  %638 = vmatprep.subr.bf16.mxu0 %v9262_v28  ;;  %v897_v15 = vld [vmem:[#allocation7 + $0x1a0] sm:$0xff]  ;;  %v898_v18 = vld [vmem:[#allocation7 + $0x1a8] sm:$0xff] }
  0xb1   :  { %679 = vmatprep.subr.bf16.mxu1 %v9264_v29  ;;  %v8174_v17 = vcombine.high %v893_v14, %v897_v15  ;;  %v8173_v19 = vcombine.low %v893_v14, %v897_v15  ;;  %v8175_v20 = vcombine.low %v894_v16, %v898_v18  ;;  %v8176_v21 = vcombine.high %v894_v16, %v898_v18  ;;  %v885_v22 = vld [vmem:[#allocation7 + $0x140] sm:$0xff]  ;;  %v886_v24 = vld [vmem:[#allocation7 + $0x148] sm:$0xff]  ;;  %p9712_p7 = por %p9711_p6, %p9710_p5 }
  0xb2   :  { %v889_v23 = vld [vmem:[#allocation7 + $0x160] sm:$0xff]  ;;  %v890_v26 = vld [vmem:[#allocation7 + $0x168] sm:$0xff] }
  0xb3   :  { %639 = vmatpush1.bf16.msra.mxu0 %v9266_v30  ;;  %v8166_v25 = vcombine.high %v885_v22, %v889_v23  ;;  %v8165_v27 = vcombine.low %v885_v22, %v889_v23  ;;  %v8167_v28 = vcombine.low %v886_v24, %v890_v26  ;;  %v8168_v29 = vcombine.high %v886_v24, %v890_v26  ;;  %v877_v30 = vld [vmem:[#allocation7 + $0x100] sm:$0xff]  ;;  %v862_v48 = vld [vmem:[#allocation7 + $0x88] sm:$0xff]  ;;  %p9713_p8 = pnand %p9712_p7, %p9706_p4 }
  0xb4   :  { %680 = vmatpush1.bf16.msra.mxu1 %v9267_v31  ;;  %640 = vmatprep.subr.bf16.mxu0 %v9268_v32  ;;  %v881_v31 = vld [vmem:[#allocation7 + $0x120] sm:$0xff]  ;;  %v878_v32 = vld [vmem:[#allocation7 + $0x108] sm:$0xff] }
  0xb5   :  { %681 = vmatprep.subr.bf16.mxu1 %v9270_v33  ;;  %v8158_v33 = vcombine.high %v877_v30, %v881_v31  ;;  %v965_v6 = vld [vmem:[#allocation7 + $0x3c0] sm:$0xff]  ;;  %v966_v8 = vld [vmem:[#allocation7 + $0x3c8] sm:$0xff] }
  0xb6   :  { %v969_v7 = vld [vmem:[#allocation7 + $0x3e0] sm:$0xff]  ;;  %v970_v10 = vld [vmem:[#allocation7 + $0x3e8] sm:$0xff] }
  0xb7   :  { %641 = vmatpush2.bf16.msra.mxu0 %v9272_v34  ;;  %v882_v34 = vld [vmem:[#allocation7 + $0x128] sm:$0xff]  ;;  %v957_v14 = vld [vmem:[#allocation7 + $0x380] sm:$0xff] }
  0xb8   :  { %682 = vmatpush2.bf16.msra.mxu1 %v9273_v35  ;;  %642 = vmatprep.subr.bf16.mxu0 %v9274_v36  ;;  %v8157_v35 = vcombine.low %v877_v30, %v881_v31  ;;  %v8159_v36 = vcombine.low %v878_v32, %v882_v34  ;;  %v961_v15 = vld [vmem:[#allocation7 + $0x3a0] sm:$0xff]  ;;  %v958_v16 = vld [vmem:[#allocation7 + $0x388] sm:$0xff] }
  0xb9   :  { %683 = vmatprep.subr.bf16.mxu1 %v9276_v37  ;;  %v8160_v37 = vcombine.high %v878_v32, %v882_v34  ;;  %v962_v18 = vld [vmem:[#allocation7 + $0x3a8] sm:$0xff]  ;;  %v949_v22 = vld [vmem:[#allocation7 + $0x340] sm:$0xff] }
  0xba   :  { %v953_v23 = vld [vmem:[#allocation7 + $0x360] sm:$0xff]  ;;  %v950_v24 = vld [vmem:[#allocation7 + $0x348] sm:$0xff] }
  0xbb   :  { %643 = vmatpush2.bf16.msra.mxu0 %v9278_v38  ;;  %v869_v38 = vld [vmem:[#allocation7 + $0xc0] sm:$0xff]  ;;  %v954_v26 = vld [vmem:[#allocation7 + $0x368] sm:$0xff] }
  0xbc   :  { %684 = vmatpush2.bf16.msra.mxu1 %v9279_v39  ;;  %644 = vmatprep.subr.bf16.mxu0 %v9280_v40  ;;  %v873_v39 = vld [vmem:[#allocation7 + $0xe0] sm:$0xff]  ;;  %v870_v40 = vld [vmem:[#allocation7 + $0xc8] sm:$0xff] }
  0xbd   :  { %685 = vmatprep.subr.bf16.mxu1 %v9282_v41  ;;  %v8150_v41 = vcombine.high %v869_v38, %v873_v39  ;;  %v941_v30 = vld [vmem:[#allocation7 + $0x300] sm:$0xff]  ;;  %v942_v32 = vld [vmem:[#allocation7 + $0x308] sm:$0xff] }
  0xbe   :  { %v945_v31 = vld [vmem:[#allocation7 + $0x320] sm:$0xff]  ;;  %v946_v34 = vld [vmem:[#allocation7 + $0x328] sm:$0xff] }
  0xbf   :  { %645 = vmatpush2.bf16.msra.mxu0 %v9284_v42  ;;  %v874_v42 = vld [vmem:[#allocation7 + $0xe8] sm:$0xff] }
  0xc0   :  { %686 = vmatpush2.bf16.msra.mxu1 %v9285_v43  ;;  %646 = vmatprep.subr.bf16.mxu0 %v9286_v44  ;;  %v8149_v43 = vcombine.low %v869_v38, %v873_v39  ;;  %v8151_v44 = vcombine.low %v870_v40, %v874_v42  ;;  %v933_v38 = vld [vmem:[#allocation7 + $0x2c0] sm:$0xff] }
  0xc1   :  { %687 = vmatprep.subr.bf16.mxu1 %v9288_v45  ;;  %v8152_v45 = vcombine.high %v870_v40, %v874_v42  ;;  %v937_v39 = vld [vmem:[#allocation7 + $0x2e0] sm:$0xff]  ;;  %v934_v40 = vld [vmem:[#allocation7 + $0x2c8] sm:$0xff] }
  0xc2   :  { %v938_v42 = vld [vmem:[#allocation7 + $0x2e8] sm:$0xff] }
  0xc3   :  { %647 = vmatpush2.bf16.msra.mxu0 %v9290_v46  ;;  %v861_v46 = vld [vmem:[#allocation7 + $0x80] sm:$0xff] }
  0xc4   :  { %688 = vmatpush2.bf16.msra.mxu1 %v9291_v47  ;;  %648 = vmatprep.subr.bf16.mxu0 %v9292_v49  ;;  %v865_v47 = vld [vmem:[#allocation7 + $0xa0] sm:$0xff] }
  0xc5   :  { %689 = vmatprep.subr.bf16.mxu1 %v9294_v50  ;;  %v8142_v49 = vcombine.high %v861_v46, %v865_v47  ;;  %v866_v50 = vld [vmem:[#allocation7 + $0xa8] sm:$0xff]  ;;  %v8141_v51 = vcombine.low %v861_v46, %v865_v47  ;;  %v925_v46 = vld [vmem:[#allocation7 + $0x280] sm:$0xff] }
  0xc6   :  { %v8143_v52 = vcombine.low %v862_v48, %v866_v50  ;;  %v8144_v53 = vcombine.high %v862_v48, %v866_v50  ;;  %v929_v47 = vld [vmem:[#allocation7 + $0x2a0] sm:$0xff]  ;;  %v926_v48 = vld [vmem:[#allocation7 + $0x288] sm:$0xff] }
  0xc7   :  { %649 = vmatpush2.bf16.msra.mxu0 %v9296_v54  ;;  %v853_v54 = vld [vmem:[#allocation7 + $0x40] sm:$0xff]  ;;  %v930_v50 = vld [vmem:[#allocation7 + $0x2a8] sm:$0xff] }
  0xc8   :  { %690 = vmatpush2.bf16.msra.mxu1 %v9297_v55  ;;  %650 = vmatprep.subr.bf16.mxu0 %v9298_v56  ;;  %v857_v55 = vld [vmem:[#allocation7 + $0x60] sm:$0xff]  ;;  %v854_v56 = vld [vmem:[#allocation7 + $0x48] sm:$0xff] }
  0xc9   :  { %691 = vmatprep.subr.bf16.mxu1 %v9300_v57  ;;  %v8134_v57 = vcombine.high %v853_v54, %v857_v55 }
  0xcb   :  { %651 = vmatpush2.bf16.msra.mxu0 %v9302_v58  ;;  %v858_v58 = vld [vmem:[#allocation7 + $0x68] sm:$0xff] }
  0xcc   :  { %692 = vmatpush2.bf16.msra.mxu1 %v9303_v59  ;;  %652 = vmatprep.subr.bf16.mxu0 %v9304_v60  ;;  %v8133_v59 = vcombine.low %v853_v54, %v857_v55  ;;  %v8135_v60 = vcombine.low %v854_v56, %v858_v58  ;;  %v917_v54 = vld [vmem:[#allocation7 + $0x240] sm:$0xff] }
  0xcd   :  { %693 = vmatprep.subr.bf16.mxu1 %v9306_v61  ;;  %v8136_v61 = vcombine.high %v854_v56, %v858_v58  ;;  %v921_v55 = vld [vmem:[#allocation7 + $0x260] sm:$0xff]  ;;  %v918_v56 = vld [vmem:[#allocation7 + $0x248] sm:$0xff] }
  0xce   :  { %v922_v58 = vld [vmem:[#allocation7 + $0x268] sm:$0xff] }
  0xcf   :  { %653 = vmatpush2.bf16.msra.mxu0 %v9308_v62  ;;  %v845_v62 = vld [vmem:[#allocation7] sm:$0xff] }
  0xd0   :  { %694 = vmatpush2.bf16.msra.mxu1 %v9309_v63  ;;  %654 = vmatprep.subr.bf16.mxu0 %v9310_v0  ;;  %v849_v63 = vld [vmem:[#allocation7 + $0x20] sm:$0xff]  ;;  %v846_v0 = vld [vmem:[#allocation7 + $0x8] sm:$0xff] }
  0xd1   :  { %695 = vmatprep.subr.bf16.mxu1 %v9312_v1  ;;  %v8126_v1 = vcombine.high %v845_v62, %v849_v63 }
  0xd3   :  { %655 = vmatpush2.bf16.msra.mxu0 %v9314_v2  ;;  %v850_v2 = vld [vmem:[#allocation7 + $0x28] sm:$0xff] }
  0xd4   :  { %696 = vmatpush2.bf16.msra.mxu1 %v9315_v3  ;;  %1655 = vmatprep.subr.bf16.mxu0 %v8182_v9  ;;  %v8125_v3 = vcombine.low %v845_v62, %v849_v63  ;;  %v8246_v9 = vcombine.high %v965_v6, %v969_v7  ;;  %v909_v62 = vld [vmem:[#allocation7 + $0x200] sm:$0xff] }
  0xd5   :  { %1696 = vmatprep.subr.bf16.mxu1 %v8184_v13  ;;  %v8248_v13 = vcombine.high %v966_v8, %v970_v10  ;;  %v913_v63 = vld [vmem:[#allocation7 + $0x220] sm:$0xff] }
  0xd6   :  { %657 = vmatmul.mubr.bf16.vlgmr.msra.gmra.mxu0 %v8057_v4  ;;  %v8127_v4 = vcombine.low %v846_v0, %v850_v2 }
  0xd7   :  { %698 = vmatmul.mubr.bf16.vlgmr.msra.gmra.mxu1 %v8059_v5  ;;  %1656 = vmatpush1.bf16.msra.mxu0 %v8181_v11  ;;  %v8128_v5 = vcombine.high %v846_v0, %v850_v2  ;;  %v8245_v11 = vcombine.low %v965_v6, %v969_v7  ;;  %v910_v0 = vld [vmem:[#allocation7 + $0x208] sm:$0xff]  ;;  %v9904_v6 = vld [vmem:[#allocation7 + $0x1d0] sm:$0xff] }
  0xd8   :  { %1697 = vmatpush1.bf16.msra.mxu1 %v8183_v12  ;;  %1657 = vmatprep.subr.bf16.mxu0 %v8174_v17  ;;  %v8247_v12 = vcombine.low %v966_v8, %v970_v10  ;;  %v8238_v17 = vcombine.high %v957_v14, %v961_v15  ;;  %v914_v2 = vld [vmem:[#allocation7 + $0x228] sm:$0xff]  ;;  %v9906_v7 = vld [vmem:[#allocation7 + $0x1f0] sm:$0xff]  ;;  %v9908_v8 = vld [vmem:[#allocation7 + $0x1d8] sm:$0xff] }
  0xd9   :  { %1698 = vmatprep.subr.bf16.mxu1 %v8176_v21  ;;  %v8240_v21 = vcombine.high %v958_v16, %v962_v18  ;;  %v9912_v10 = vld [vmem:[#allocation7 + $0x1f8] sm:$0xff] }
  0xdb   :  { %1658 = vmatpush1.bf16.msra.mxu0 %v8173_v19  ;;  %v8237_v19 = vcombine.low %v957_v14, %v961_v15  ;;  %v206_v14 = vlaneseq }
  0xdc   :  { %1699 = vmatpush1.bf16.msra.mxu1 %v8175_v20  ;;  %1659 = vmatprep.subr.bf16.mxu0 %v8166_v25  ;;  %v8239_v20 = vcombine.low %v958_v16, %v962_v18  ;;  %v8230_v25 = vcombine.high %v949_v22, %v953_v23 }
  0xdd   :  { %1700 = vmatprep.subr.bf16.mxu1 %v8168_v29  ;;  %v8232_v29 = vcombine.high %v950_v24, %v954_v26  ;;  %v9920_v15 = vshrl.u32 %v206_v14, 7 }
  0xdf   :  { %1660 = vmatpush1.bf16.msra.mxu0 %v8165_v27  ;;  %v8229_v27 = vcombine.low %v949_v22, %v953_v23  ;;  %v9923_v16 = vsub.s32 0, %v9920_v15  ;;  %vm208_vm0 = vcmp.lt.s32.totalorder %v9920_v15, 4  ;;  %v9927_v18 = vsub.s32 1, %v9920_v15 }
  0xe0   :  { %1701 = vmatpush1.bf16.msra.mxu1 %v8167_v28  ;;  %1661 = vmatprep.subr.bf16.mxu0 %v8158_v33  ;;  %v8231_v28 = vcombine.low %v950_v24, %v954_v26  ;;  %v8222_v33 = vcombine.high %v941_v30, %v945_v31 }
  0xe1   :  { %1702 = vmatprep.subr.bf16.mxu1 %v8160_v37  ;;  %v8224_v37 = vcombine.high %v942_v32, %v946_v34 }
  0xe3   :  { %1662 = vmatpush1.bf16.msra.mxu0 %v8157_v35  ;;  %v8221_v35 = vcombine.low %v941_v30, %v945_v31 }
  0xe4   :  { %1703 = vmatpush1.bf16.msra.mxu1 %v8159_v36  ;;  %1663 = vmatprep.subr.bf16.mxu0 %v8150_v41  ;;  %v8223_v36 = vcombine.low %v942_v32, %v946_v34  ;;  %v8214_v41 = vcombine.high %v933_v38, %v937_v39 }
  0xe5   :  { %1704 = vmatprep.subr.bf16.mxu1 %v8152_v45  ;;  %v8216_v45 = vcombine.high %v934_v40, %v938_v42 }
  0xe7   :  { %1664 = vmatpush1.bf16.msra.mxu0 %v8149_v43  ;;  %v8213_v43 = vcombine.low %v933_v38, %v937_v39 }
  0xe8   :  { %1705 = vmatpush1.bf16.msra.mxu1 %v8151_v44  ;;  %1665 = vmatprep.subr.bf16.mxu0 %v8142_v49  ;;  %v8215_v44 = vcombine.low %v934_v40, %v938_v42  ;;  %v8206_v49 = vcombine.high %v925_v46, %v929_v47 }
  0xe9   :  { %1706 = vmatprep.subr.bf16.mxu1 %v8144_v53  ;;  %v8208_v53 = vcombine.high %v926_v48, %v930_v50 }
  0xeb   :  { %1666 = vmatpush1.bf16.msra.mxu0 %v8141_v51  ;;  %v8205_v51 = vcombine.low %v925_v46, %v929_v47 }
  0xec   :  { %1707 = vmatpush1.bf16.msra.mxu1 %v8143_v52  ;;  %1667 = vmatprep.subr.bf16.mxu0 %v8134_v57  ;;  %v8207_v52 = vcombine.low %v926_v48, %v930_v50  ;;  %v8198_v57 = vcombine.high %v917_v54, %v921_v55 }
  0xed   :  { %1708 = vmatprep.subr.bf16.mxu1 %v8136_v61  ;;  %v8200_v61 = vcombine.high %v918_v56, %v922_v58 }
  0xef   :  { %1668 = vmatpush1.bf16.msra.mxu0 %v8133_v59  ;;  %v8197_v59 = vcombine.low %v917_v54, %v921_v55 }
  0xf0   :  { %1709 = vmatpush1.bf16.msra.mxu1 %v8135_v60  ;;  %1669 = vmatprep.subr.bf16.mxu0 %v8126_v1  ;;  %v8199_v60 = vcombine.low %v918_v56, %v922_v58  ;;  %v8190_v1 = vcombine.high %v909_v62, %v913_v63 }
  0xf1   :  { %1710 = vmatprep.subr.bf16.mxu1 %v8128_v5  ;;  %v8192_v5 = vcombine.high %v910_v0, %v914_v2 }
  0xf3   :  { %1670 = vmatpush1.bf16.msra.mxu0 %v8125_v3  ;;  %v8189_v3 = vcombine.low %v909_v62, %v913_v63 }
  0xf4   :  { %1711 = vmatpush1.bf16.msra.mxu1 %v8127_v4  ;;  %1671 = vmatprep.subr.bf16.mxu0 %v8246_v9  ;;  %v8191_v4 = vcombine.low %v910_v0, %v914_v2  ;;  %v8186_v9 = vcombine.high %v9904_v6, %v9906_v7 }
  0xf5   :  { %1712 = vmatprep.subr.bf16.mxu1 %v8248_v13  ;;  %v8188_v13 = vcombine.high %v9908_v8, %v9912_v10 }
  0xf7   :  { %1672 = vmatpush2.bf16.msra.mxu0 %v8245_v11  ;;  %v8185_v11 = vcombine.low %v9904_v6, %v9906_v7 }
  0xf8   :  { %1713 = vmatpush2.bf16.msra.mxu1 %v8247_v12  ;;  %1673 = vmatprep.subr.bf16.mxu0 %v8238_v17  ;;  %v8187_v12 = vcombine.low %v9908_v8, %v9912_v10  ;;  %v278_v17 = vld [vmem:[#allocation5] sm:$0x3] }
  0xf9   :  { %1714 = vmatprep.subr.bf16.mxu1 %v8240_v21  ;;  %v287_v22 = vrot.slane %v278_v17, %v9927_v18 }
  0xfb   :  { %1674 = vmatpush2.bf16.msra.mxu0 %v8237_v19  ;;  %v283_v19 = vrot.slane %v278_v17, %v9923_v16 }
  0xfc   :  { %1715 = vmatpush2.bf16.msra.mxu1 %v8239_v20  ;;  %1675 = vmatprep.subr.bf16.mxu0 %v8230_v25  ;;  %v9759_v20 = vmov 0.0  }
  0xfd   :  { %1716 = vmatprep.subr.bf16.mxu1 %v8232_v29  ;;  %v9930_v21 = vsel %vm208_vm0, 1.0, %v9759_v20 }
  0xfe   :  { %v9934_v26 = vsub.f32 1.0, %v9930_v21 }
  0xff   :  { %1676 = vmatpush2.bf16.msra.mxu0 %v8229_v27 }
 0x100   :  { %1717 = vmatpush2.bf16.msra.mxu1 %v8231_v28  ;;  %1677 = vmatprep.subr.bf16.mxu0 %v8222_v33 }
 0x101   :  { %1718 = vmatprep.subr.bf16.mxu1 %v8224_v37 }
 0x103   :  { %1678 = vmatpush2.bf16.msra.mxu0 %v8221_v35 }
 0x104   :  { %1719 = vmatpush2.bf16.msra.mxu1 %v8223_v36  ;;  %1679 = vmatprep.subr.bf16.mxu0 %v8214_v41 }
 0x105   :  { %1720 = vmatprep.subr.bf16.mxu1 %v8216_v45 }
 0x107   :  { %1680 = vmatpush2.bf16.msra.mxu0 %v8213_v43 }
 0x108   :  { %1721 = vmatpush2.bf16.msra.mxu1 %v8215_v44  ;;  %1681 = vmatprep.subr.bf16.mxu0 %v8206_v49 }
 0x109   :  { %1722 = vmatprep.subr.bf16.mxu1 %v8208_v53 }
 0x10b   :  { %1682 = vmatpush2.bf16.msra.mxu0 %v8205_v51 }
 0x10c   :  { %1723 = vmatpush2.bf16.msra.mxu1 %v8207_v52  ;;  %1683 = vmatprep.subr.bf16.mxu0 %v8198_v57 }
 0x10d   :  { %1724 = vmatprep.subr.bf16.mxu1 %v8200_v61 }
 0x10f   :  { %1684 = vmatpush2.bf16.msra.mxu0 %v8197_v59 }
 0x110   :  { %1725 = vmatpush2.bf16.msra.mxu1 %v8199_v60  ;;  %1685 = vmatprep.subr.bf16.mxu0 %v8190_v1 }
 0x111   :  { %1726 = vmatprep.subr.bf16.mxu1 %v8192_v5 }
 0x113   :  { %1686 = vmatpush2.bf16.msra.mxu0 %v8189_v3 }
 0x114   :  { %1727 = vmatpush2.bf16.msra.mxu1 %v8191_v4  ;;  %1737 = vmatprep.subr.bf16.mxu0 %v8186_v9 }
 0x115   :  { %1778 = vmatprep.subr.bf16.mxu1 %v8188_v13 }
 0x196   :  { %v658_v23 = vpop.f32.mrf.mxu0 }
 0x197   :  { %v699_v24 = vpop.f32.mrf.mxu1  ;;  %v659_v25 = vadd.f32 %v658_v23, %v283_v19 }
 0x198   :  { %v660_v27 = vpop.f32.mrf.mxu0 }
 0x199   :  { %v701_v28 = vpop.f32.mrf.mxu1  ;;  %v9936_v29 = vadd.f32 %v699_v24, %v659_v25  ;;  %v661_v30 = vadd.f32 %v660_v27, %v287_v22 }
 0x19a   :  { %v662_v31 = vpop.f32.mrf.mxu0 }
 0x19b   :  { %v703_v32 = vpop.f32.mrf.mxu1  ;;  %v706_v33 = vmul.f32 %v9930_v21, %v9936_v29  ;;  %v752_v34 = vmul.f32 %v9936_v29, %v9934_v26  ;;  %v9942_v35 = vadd.f32 %v701_v28, %v661_v30 }
 0x19c   :  { %v663_v36 = vpop.f32.mrf.mxu0 }
 0x19d   :  { %v704_v37 = vpop.f32.mrf.mxu1  ;;  %v709_v38 = vsel %vm708_vm1, %v706_v33, 0.0  ;;  %v754_v39 = vsel %vm708_vm1, %v752_v34, 0.0  ;;  %v707_v40 = vmul.f32 %v9930_v21, %v9942_v35  ;;  %v753_v41 = vmul.f32 %v9942_v35, %v9934_v26 }
 0x19e   :  { %v710_v42 = vrot.slane %v709_v38, 4  ;;  %v755_v43 = vrot.slane %v754_v39, 4 }
 0x19f   :  { %v716_v44 = vsel %vm708_vm1, %v707_v40, 0.0  ;;  %v761_v45 = vsel %vm708_vm1, %v753_v41, 0.0 }
 0x1a0   :  { %v711_v46 = vadd.f32 %v710_v42, %v709_v38  ;;  %v756_v47 = vadd.f32 %v755_v43, %v754_v39  ;;  %v717_v48 = vrot.slane %v716_v44, 4  ;;  %v762_v49 = vrot.slane %v761_v45, 4 }
 0x1a2   :  { %v712_v50 = vrot.slane %v711_v46, 2  ;;  %v757_v51 = vrot.slane %v756_v47, 2  ;;  %v718_v52 = vadd.f32 %v717_v48, %v716_v44  ;;  %v763_v53 = vadd.f32 %v762_v49, %v761_v45 }
 0x1a4   :  { %v713_v54 = vadd.f32 %v712_v50, %v711_v46  ;;  %v758_v55 = vadd.f32 %v757_v51, %v756_v47  ;;  %v719_v56 = vrot.slane %v718_v52, 2  ;;  %v764_v57 = vrot.slane %v763_v53, 2 }
 0x1a6   :  { %v714_v58 = vrot.slane %v713_v54, 1  ;;  %v759_v59 = vrot.slane %v758_v55, 1  ;;  %v720_v60 = vadd.f32 %v719_v56, %v718_v52  ;;  %v765_v61 = vadd.f32 %v764_v57, %v763_v53 }
 0x1a8   :  { %v715_v62 = vadd.f32 %v714_v58, %v713_v54  ;;  %v760_v63 = vadd.f32 %v759_v59, %v758_v55  ;;  %v721_v0 = vrot.slane %v720_v60, 1  ;;  %v766_v1 = vrot.slane %v765_v61, 1 }
 0x1aa   :  { %v724_v2 = vmul.f32 0.25, %v715_v62  ;;  %v769_v3 = vmul.f32 0.5, %v760_v63  ;;  %v722_v4 = vadd.f32 %v721_v0, %v720_v60  ;;  %v767_v5 = vadd.f32 %v766_v1, %v765_v61 }
 0x1ac   :  { %v726_v9 = vsub.f32 %v9936_v29, %v724_v2  ;;  %v771_v13 = vsub.f32 %v9936_v29, %v769_v3  ;;  %v725_v14 = vmul.f32 0.25, %v722_v4  ;;  %v770_v17 = vmul.f32 0.5, %v767_v5 }
 0x1ae   :  { %v728_v19 = vmul.f32 %v726_v9, %v726_v9  ;;  %v773_v20 = vmul.f32 %v771_v13, %v771_v13  ;;  %v727_v22 = vsub.f32 %v9942_v35, %v725_v14  ;;  %v772_v23 = vsub.f32 %v9942_v35, %v770_v17 }
 0x1af   :  { %v797_v13 = vmul.f32 %v9930_v21, %v724_v2  ;;  %v827_v2 = vld [vmem:[%s10217_s5] sm:$0x3] }
 0x1b0   :  { %v730_v24 = vmul.f32 %v9930_v21, %v728_v19  ;;  %v775_v25 = vmul.f32 %v773_v20, %v9934_v26  ;;  %v729_v27 = vmul.f32 %v727_v22, %v727_v22  ;;  %v774_v28 = vmul.f32 %v772_v23, %v772_v23 }
 0x1b1   :  { %v799_v19 = vmul.f32 %v769_v3, %v9934_v26  ;;  %v798_v20 = vmul.f32 %v9930_v21, %v725_v14  ;;  %v800_v22 = vmul.f32 %v770_v17, %v9934_v26 }
 0x1b2   :  { %v732_v30 = vsel %vm708_vm1, %v730_v24, 0.0  ;;  %v777_v31 = vsel %vm708_vm1, %v775_v25, 0.0  ;;  %v731_v34 = vmul.f32 %v9930_v21, %v729_v27  ;;  %v776_v36 = vmul.f32 %v774_v28, %v9934_v26  ;;  %v813_v28 = vld [vmem:[%s10216_s4] sm:$0x3] }
 0x1b3   :  { %v733_v32 = vrot.slane %v732_v30, 4  ;;  %v778_v33 = vrot.slane %v777_v31, 4  ;;  %v801_v24 = vadd.f32 %v799_v19, %v797_v13  ;;  %v802_v3 = vadd.f32 %v800_v22, %v798_v20  ;;  %v876_v13 = vld [vmem:[#allocation7 + $0xf8] sm:$0xff] }
 0x1b4   :  { %v739_v39 = vsel %vm708_vm1, %v731_v34, 0.0  ;;  %v784_v40 = vsel %vm708_vm1, %v776_v36, 0.0 }
 0x1b5   :  { %v734_v37 = vadd.f32 %v733_v32, %v732_v30  ;;  %v779_v38 = vadd.f32 %v778_v33, %v777_v31  ;;  %v740_v41 = vrot.slane %v739_v39, 4  ;;  %v785_v42 = vrot.slane %v784_v40, 4 }
 0x1b6   :  { %v809_v17 = vsub.f32 %v9936_v29, %v801_v24  ;;  %v818_v33 = vrot.slane %v813_v28, %v9923_v16  ;;  %v863_v24 = vld [vmem:[#allocation7 + $0x90] sm:$0xff] }
 0x1b7   :  { %v735_v43 = vrot.slane %v734_v37, 2  ;;  %v780_v44 = vrot.slane %v779_v38, 2  ;;  %v741_v45 = vadd.f32 %v740_v41, %v739_v39  ;;  %v786_v46 = vadd.f32 %v785_v42, %v784_v40 }
 0x1b8   :  { %v810_v40 = vsub.f32 %v9942_v35, %v802_v3  ;;  %v822_v41 = vrot.slane %v813_v28, %v9927_v18  ;;  %v887_v35 = vld [vmem:[#allocation7 + $0x150] sm:$0xff]  ;;  %v868_v28 = vld [vmem:[#allocation7 + $0xb8] sm:$0xff] }
 0x1b9   :  { %v736_v47 = vadd.f32 %v735_v43, %v734_v37  ;;  %v781_v48 = vadd.f32 %v780_v44, %v779_v38  ;;  %v742_v49 = vrot.slane %v741_v45, 2  ;;  %v787_v50 = vrot.slane %v786_v46, 2 }
 0x1ba   :  { %v832_v38 = vrot.slane %v827_v2, %v9923_v16  ;;  %v836_v44 = vrot.slane %v827_v2, %v9927_v18 }
 0x1bb   :  { %v737_v51 = vrot.slane %v736_v47, 1  ;;  %v782_v52 = vrot.slane %v781_v48, 1  ;;  %v743_v53 = vadd.f32 %v742_v49, %v741_v45  ;;  %v788_v54 = vadd.f32 %v787_v50, %v786_v46  ;;  %v895_v49 = vld [vmem:[#allocation7 + $0x190] sm:$0xff] }
 0x1bc   :  { %v899_v50 = vld [vmem:[#allocation7 + $0x1b0] sm:$0xff] }
 0x1bd   :  { %v738_v55 = vadd.f32 %v737_v51, %v736_v47  ;;  %v783_v56 = vadd.f32 %v782_v52, %v781_v48  ;;  %v744_v57 = vrot.slane %v743_v53, 1  ;;  %v789_v58 = vrot.slane %v788_v54, 1  ;;  %v896_v51 = vld [vmem:[#allocation7 + $0x198] sm:$0xff] }
 0x1be   :  { %v900_v52 = vld [vmem:[#allocation7 + $0x1b8] sm:$0xff] }
 0x1bf   :  { %v746_v59 = vmul.f32 0.25, %v738_v55  ;;  %v791_v60 = vmul.f32 0.5, %v783_v56  ;;  %v745_v61 = vadd.f32 %v744_v57, %v743_v53  ;;  %v790_v62 = vadd.f32 %v789_v58, %v788_v54  ;;  %v891_v57 = vld [vmem:[#allocation7 + $0x170] sm:$0xff]  ;;  %v888_v58 = vld [vmem:[#allocation7 + $0x158] sm:$0xff] }
 0x1c0   :  { %v8178_v55 = vcombine.high %v895_v49, %v899_v50  ;;  %v8180_v56 = vcombine.high %v896_v51, %v900_v52  ;;  %v8169_v6 = vcombine.low %v887_v35, %v891_v57 }
 0x1c1   :  { %v748_v63 = vadd.f32 1e-05, %v746_v59  ;;  %v793_v0 = vadd.f32 1e-05, %v791_v60  ;;  %v747_v1 = vmul.f32 0.25, %v745_v61  ;;  %v792_v4 = vmul.f32 0.5, %v790_v62 }
 0x1c2   :  { %v892_v59 = vld [vmem:[#allocation7 + $0x178] sm:$0xff]  ;;  %v8177_v60 = vcombine.low %v895_v49, %v899_v50  ;;  %v8179_v61 = vcombine.low %v896_v51, %v900_v52  ;;  %v8170_v62 = vcombine.high %v887_v35, %v891_v57 }
 0x1c3   :  { %9448 = vrsqrt.f32 %v748_v63  ;;  %v749_v5 = vadd.f32 1e-05, %v747_v1  ;;  %v794_v9 = vadd.f32 1e-05, %v792_v4  ;;  %v8172_v63 = vcombine.high %v888_v58, %v892_v59  ;;  %v883_v1 = vld [vmem:[#allocation7 + $0x130] sm:$0xff]  ;;  %v880_v4 = vld [vmem:[#allocation7 + $0x118] sm:$0xff] }
 0x1c4   :  { %9450 = vrsqrt.f32 %v793_v0  ;;  %v879_v0 = vld [vmem:[#allocation7 + $0x110] sm:$0xff]  ;;  %v8171_v7 = vcombine.low %v888_v58, %v892_v59  ;;  %v972_v49 = vld [vmem:[#allocation7 + $0x3f8] sm:$0xff] }
 0x1c5   :  { %9452 = vrsqrt.f32 %v749_v5  ;;  %v884_v5 = vld [vmem:[#allocation7 + $0x138] sm:$0xff]  ;;  %v8162_v8 = vcombine.high %v879_v0, %v883_v1  ;;  %v8161_v19 = vcombine.low %v879_v0, %v883_v1  ;;  %v955_v0 = vld [vmem:[#allocation7 + $0x370] sm:$0xff] }
 0x1c6   :  { %9454 = vrsqrt.f32 %v794_v9  ;;  %v8164_v10 = vcombine.high %v880_v4, %v884_v5  ;;  %v872_v9 = vld [vmem:[#allocation7 + $0xd8] sm:$0xff]  ;;  %v8163_v20 = vcombine.low %v880_v4, %v884_v5 }
 0x1c7   :  { %v960_v57 = vld [vmem:[#allocation7 + $0x398] sm:$0xff] }
 0x1c8   :  { %v964_v58 = vld [vmem:[#allocation7 + $0x3b8] sm:$0xff] }
 0x1c9   :  { %v952_v1 = vld [vmem:[#allocation7 + $0x358] sm:$0xff] }
 0x1ca   :  { %v956_v4 = vld [vmem:[#allocation7 + $0x378] sm:$0xff] }
 0x1d0   :  { %v9449_v23 = vpop.eup %9448 }
 0x1d1   :  { %v9451_v25 = vpop.eup %9450  ;;  %v803_v27 = vmul.f32 %v9449_v23, %v9930_v21  ;;  %v8156_v23 = vcombine.high %v872_v9, %v876_v13 }
 0x1d2   :  { %v805_v30 = vmul.f32 %v9451_v25, %v9934_v26  ;;  %v9453_v31 = vpop.eup %9452  ;;  %v867_v25 = vld [vmem:[#allocation7 + $0xb0] sm:$0xff] }
 0x1d3   :  { %v9455_v14 = vpop.eup %9454  ;;  %v804_v34 = vmul.f32 %v9453_v31, %v9930_v21  ;;  %v8155_v31 = vcombine.low %v872_v9, %v876_v13  ;;  %v8146_v2 = vcombine.high %v863_v24, %v867_v25  ;;  %v948_v9 = vld [vmem:[#allocation7 + $0x338] sm:$0xff] }
 0x1d4   :  { %v807_v32 = vadd.f32 %v805_v30, %v803_v27  ;;  %v806_v36 = vmul.f32 %v9455_v14, %v9934_v26  ;;  %v864_v27 = vld [vmem:[#allocation7 + $0x98] sm:$0xff]  ;;  %v855_v14 = vld [vmem:[#allocation7 + $0x50] sm:$0xff] }
 0x1d5   :  { %v8148_v3 = vcombine.high %v864_v27, %v868_v28 }
 0x1d6   :  { %v811_v37 = vmul.f32 %v809_v17, %v807_v32  ;;  %v808_v39 = vadd.f32 %v806_v36, %v804_v34  ;;  %v859_v32 = vld [vmem:[#allocation7 + $0x70] sm:$0xff]  ;;  %v856_v17 = vld [vmem:[#allocation7 + $0x58] sm:$0xff]  ;;  %v8145_v34 = vcombine.low %v863_v24, %v867_v25  ;;  %v8147_v36 = vcombine.low %v864_v27, %v868_v28 }
 0x1d7   :  { %v939_v24 = vld [vmem:[#allocation7 + $0x2f0] sm:$0xff]  ;;  %v936_v25 = vld [vmem:[#allocation7 + $0x2d8] sm:$0xff] }
 0x1d8   :  { %v825_v42 = vmul.f32 %v818_v33, %v811_v37  ;;  %v812_v43 = vmul.f32 %v810_v40, %v808_v39  ;;  %v860_v33 = vld [vmem:[#allocation7 + $0x78] sm:$0xff]  ;;  %v8138_v37 = vcombine.high %v855_v14, %v859_v32  ;;  %v847_v39 = vld [vmem:[#allocation7 + $0x10] sm:$0xff] }
 0x1d9   :  { %v851_v40 = vld [vmem:[#allocation7 + $0x30] sm:$0xff]  ;;  %v940_v27 = vld [vmem:[#allocation7 + $0x2f8] sm:$0xff] }
 0x1da   :  { %v839_v45 = vadd.f32 %v832_v38, %v825_v42  ;;  %v826_v29 = vmul.f32 %v822_v41, %v812_v43  ;;  %v8140_v38 = vcombine.high %v856_v17, %v860_v33  ;;  %v848_v41 = vld [vmem:[#allocation7 + $0x18] sm:$0xff]  ;;  %v8137_v43 = vcombine.low %v855_v14, %v859_v32  ;;  %v931_v14 = vld [vmem:[#allocation7 + $0x2b0] sm:$0xff] }
 0x1db   :  { %v852_v42 = vld [vmem:[#allocation7 + $0x38] sm:$0xff]  ;;  %v8129_v50 = vcombine.low %v847_v39, %v851_v40 }
 0x1dc   :  { %v840_v46 = vadd.f32 %v836_v44, %v826_v29  ;;  %v841_v47 = vmax.f32 %v839_v45, 0.0  ;;  %v8139_v44 = vcombine.low %v856_v17, %v860_v33  ;;  %v8130_v45 = vcombine.high %v847_v39, %v851_v40  ;;  %v928_v32 = vld [vmem:[#allocation7 + $0x298] sm:$0xff]  ;;  %v923_v39 = vld [vmem:[#allocation7 + $0x270] sm:$0xff] }
 0x1dd   :  { %v8132_v29 = vcombine.high %v848_v41, %v852_v42  ;;  %v8131_v51 = vcombine.low %v848_v41, %v852_v42  ;;  %v932_v17 = vld [vmem:[#allocation7 + $0x2b8] sm:$0xff] }
 0x1de   :  { %v842_v48 = vmax.f32 %v840_v46, 0.0  ;;  %v9986_v54 = vpack.c.bf16 %v841_v47, %v841_v47  ;;  %v967_v46 = vld [vmem:[#allocation7 + $0x3d0] sm:$0xff]  ;;  %v920_v40 = vld [vmem:[#allocation7 + $0x258] sm:$0xff] }
 0x1df   :  { %v971_v47 = vld [vmem:[#allocation7 + $0x3f0] sm:$0xff]  ;;  %v924_v41 = vld [vmem:[#allocation7 + $0x278] sm:$0xff] }
 0x1e0   :  { %v9984_v53 = vpack.c.bf16 %v842_v48, %v842_v48  ;;  %v968_v48 = vld [vmem:[#allocation7 + $0x3d8] sm:$0xff]  ;;  %v8250_v52 = vcombine.high %v967_v46, %v971_v47  ;;  %v8249_v59 = vcombine.low %v967_v46, %v971_v47  ;;  %v915_v46 = vld [vmem:[#allocation7 + $0x230] sm:$0xff] }
 0x1e1   :  { %v8252_v35 = vcombine.high %v968_v48, %v972_v49  ;;  %v912_v47 = vld [vmem:[#allocation7 + $0x218] sm:$0xff] }
 0x1e2   :  { %1687 = vmatprep.mubr.bf16.mxu0 %v9984_v53  ;;  %1728 = vmatprep.mubr.bf16.mxu1 %v9984_v53 }
 0x1e3   :  { %1688 = vmatmul.mubr.bf16.vlgmr.msra.gmra.mxu0 %v9986_v54  ;;  %1729 = vmatmul.mubr.bf16.vlgmr.msra.gmra.mxu1 %v9986_v54 }
 0x1e4   :  { %1738 = vmatpush1.bf16.msra.mxu0 %v8185_v11  ;;  %1779 = vmatpush1.bf16.msra.mxu1 %v8187_v12  ;;  %v871_v11 = vld [vmem:[#allocation7 + $0xd0] sm:$0xff] }
 0x1e5   :  { %1769 = vmatprep.mubr.bf16.mxu0 %v9984_v53  ;;  %1810 = vmatprep.mubr.bf16.mxu1 %v9984_v53  ;;  %v875_v12 = vld [vmem:[#allocation7 + $0xf0] sm:$0xff] }
 0x1e6   :  { %1739 = vmatprep.subr.bf16.mxu0 %v8178_v55  ;;  %1780 = vmatprep.subr.bf16.mxu1 %v8180_v56  ;;  %v8154_v22 = vcombine.high %v871_v11, %v875_v12  ;;  %v8153_v30 = vcombine.low %v871_v11, %v875_v12  ;;  %v959_v55 = vld [vmem:[#allocation7 + $0x390] sm:$0xff]  ;;  %v944_v12 = vld [vmem:[#allocation7 + $0x318] sm:$0xff] }
 0x1e7   :  { %v963_v56 = vld [vmem:[#allocation7 + $0x3b0] sm:$0xff] }
 0x1e8   :  { %1740 = vmatpush1.bf16.msra.mxu0 %v8177_v60  ;;  %1781 = vmatpush1.bf16.msra.mxu1 %v8179_v61  ;;  %v8251_v60 = vcombine.low %v968_v48, %v972_v49  ;;  %v8242_v61 = vcombine.high %v959_v55, %v963_v56  ;;  %v8241_v5 = vcombine.low %v959_v55, %v963_v56  ;;  %v947_v11 = vld [vmem:[#allocation7 + $0x330] sm:$0xff]  ;;  %v916_v48 = vld [vmem:[#allocation7 + $0x238] sm:$0xff]  ;;  %v9320_v56 = vld [vmem:[#allocation10 + $0x78] sm:$0xff]  }
 0x1e9   :  { %1741 = vmatprep.subr.bf16.mxu0 %v8170_v62  ;;  %1782 = vmatprep.subr.bf16.mxu1 %v8172_v63  ;;  %v8244_v62 = vcombine.high %v960_v57, %v964_v58  ;;  %v951_v63 = vld [vmem:[#allocation7 + $0x350] sm:$0xff]  ;;  %v8195_v55 = vcombine.low %v912_v47, %v916_v48 }
 0x1ea   :  { %v8233_v13 = vcombine.low %v951_v63, %v955_v0 }
 0x1ec   :  { %1742 = vmatpush1.bf16.msra.mxu0 %v8169_v6  ;;  %1783 = vmatpush1.bf16.msra.mxu1 %v8171_v7  ;;  %v8243_v6 = vcombine.low %v960_v57, %v964_v58  ;;  %v8234_v7 = vcombine.high %v951_v63, %v955_v0  ;;  %v9321_v57 = vld [vmem:[#allocation10 + $0xf8] sm:$0xff]   ;;  %v9327_v63 = vld [vmem:[#allocation10 + $0xb0] sm:$0xff]   ;;  %v9328_v0 = vld [vmem:[#allocation10 + $0x68] sm:$0xff]  }
 0x1ed   :  { %1743 = vmatprep.subr.bf16.mxu0 %v8162_v8  ;;  %1784 = vmatprep.subr.bf16.mxu1 %v8164_v10  ;;  %v8236_v8 = vcombine.high %v952_v1, %v956_v4  ;;  %v943_v10 = vld [vmem:[#allocation7 + $0x310] sm:$0xff]  ;;  %v9322_v58 = vld [vmem:[#allocation10 + $0x38] sm:$0xff]  }
 0x1ee   :  { %v8225_v28 = vcombine.low %v943_v10, %v947_v11 }
 0x1f0   :  { %1744 = vmatpush1.bf16.msra.mxu0 %v8161_v19  ;;  %1785 = vmatpush1.bf16.msra.mxu1 %v8163_v20  ;;  %v8235_v19 = vcombine.low %v952_v1, %v956_v4  ;;  %v8226_v20 = vcombine.high %v943_v10, %v947_v11  ;;  %v9329_v1 = vld [vmem:[#allocation10 + $0xe8] sm:$0xff]   ;;  %v9335_v10 = vld [vmem:[#allocation10 + $0xa0] sm:$0xff]   ;;  %v9336_v11 = vld [vmem:[#allocation10 + $0x58] sm:$0xff]  }
 0x1f1   :  { %1745 = vmatprep.subr.bf16.mxu0 %v8154_v22  ;;  %1786 = vmatprep.subr.bf16.mxu1 %v8156_v23  ;;  %v8228_v22 = vcombine.high %v944_v12, %v948_v9  ;;  %v935_v23 = vld [vmem:[#allocation7 + $0x2d0] sm:$0xff] }
 0x1f2   :  { %v8217_v33 = vcombine.low %v935_v23, %v939_v24  ;;  %v9330_v4 = vld [vmem:[#allocation10 + $0x28] sm:$0xff]  }
 0x1f4   :  { %1746 = vmatpush1.bf16.msra.mxu0 %v8153_v30  ;;  %1787 = vmatpush1.bf16.msra.mxu1 %v8155_v31  ;;  %v8227_v30 = vcombine.low %v944_v12, %v948_v9  ;;  %v8218_v31 = vcombine.high %v935_v23, %v939_v24  ;;  %v9337_v12 = vld [vmem:[#allocation10 + $0xd8] sm:$0xff]   ;;  %v9343_v23 = vld [vmem:[#allocation10 + $0x90] sm:$0xff]   ;;  %v9344_v24 = vld [vmem:[#allocation10 + $0x48] sm:$0xff]  }
 0x1f5   :  { %1747 = vmatprep.subr.bf16.mxu0 %v8146_v2  ;;  %1788 = vmatprep.subr.bf16.mxu1 %v8148_v3  ;;  %v8220_v2 = vcombine.high %v936_v25, %v940_v27  ;;  %v927_v3 = vld [vmem:[#allocation7 + $0x290] sm:$0xff]  ;;  %v9338_v9 = vld [vmem:[#allocation10 + $0x18] sm:$0xff]  }
 0x1f6   :  { %v8209_v42 = vcombine.low %v927_v3, %v931_v14 }
 0x1f8   :  { %1748 = vmatpush1.bf16.msra.mxu0 %v8145_v34  ;;  %1789 = vmatpush1.bf16.msra.mxu1 %v8147_v36  ;;  %v8219_v34 = vcombine.low %v936_v25, %v940_v27  ;;  %v8210_v36 = vcombine.high %v927_v3, %v931_v14  ;;  %v9345_v25 = vld [vmem:[#allocation10 + $0xc8] sm:$0xff]   ;;  %v9351_v3 = vld [vmem:[#allocation10 + $0x80] sm:$0xff]   ;;  %v9352_v14 = vld [vmem:[#allocation10 + $0x178] sm:$0xff]  }
 0x1f9   :  { %1749 = vmatprep.subr.bf16.mxu0 %v8138_v37  ;;  %1790 = vmatprep.subr.bf16.mxu1 %v8140_v38  ;;  %v8212_v37 = vcombine.high %v928_v32, %v932_v17  ;;  %v919_v38 = vld [vmem:[#allocation7 + $0x250] sm:$0xff] }
 0x1fa   :  { %v8201_v49 = vcombine.low %v919_v38, %v923_v39  ;;  %v9346_v27 = vld [vmem:[#allocation10 + $0x8] sm:$0xff]  }
 0x1fc   :  { %1750 = vmatpush1.bf16.msra.mxu0 %v8137_v43  ;;  %1791 = vmatpush1.bf16.msra.mxu1 %v8139_v44  ;;  %v8211_v43 = vcombine.low %v928_v32, %v932_v17  ;;  %v8202_v44 = vcombine.high %v919_v38, %v923_v39  ;;  %v9353_v32 = vld [vmem:[#allocation10 + $0x1f8] sm:$0xff]   ;;  %v10003_v17 = vsub.s32 2, %v9920_v15 }
 0x1fd   :  { %1751 = vmatprep.subr.bf16.mxu0 %v8130_v45  ;;  %1792 = vmatprep.subr.bf16.mxu1 %v8132_v29  ;;  %v8204_v45 = vcombine.high %v920_v40, %v924_v41  ;;  %v911_v29 = vld [vmem:[#allocation7 + $0x210] sm:$0xff] }
 0x200   :  { %1752 = vmatpush1.bf16.msra.mxu0 %v8129_v50  ;;  %1793 = vmatpush1.bf16.msra.mxu1 %v8131_v51  ;;  %v8203_v50 = vcombine.low %v920_v40, %v924_v41  ;;  %v8194_v51 = vcombine.high %v911_v29, %v915_v46 }
 0x201   :  { %1753 = vmatprep.subr.bf16.mxu0 %v8250_v52  ;;  %1794 = vmatprep.subr.bf16.mxu1 %v8252_v35  ;;  %v8196_v52 = vcombine.high %v912_v47, %v916_v48  ;;  %v8193_v35 = vcombine.low %v911_v29, %v915_v46 }
 0x204   :  { %1754 = vmatpush2.bf16.msra.mxu0 %v8249_v59  ;;  %1795 = vmatpush2.bf16.msra.mxu1 %v8251_v60  ;;  %v9323_v59 = vld [vmem:[#allocation10 + $0xb8] sm:$0xff]   ;;  %v9324_v60 = vld [vmem:[#allocation10 + $0x70] sm:$0xff]  }
 0x205   :  { %1755 = vmatprep.subr.bf16.mxu0 %v8242_v61  ;;  %1796 = vmatprep.subr.bf16.mxu1 %v8244_v62  ;;  %v9325_v61 = vld [vmem:[#allocation10 + $0xf0] sm:$0xff]  }
 0x206   :  { %v9326_v62 = vld [vmem:[#allocation10 + $0x30] sm:$0xff]  }
 0x208   :  { %1756 = vmatpush2.bf16.msra.mxu0 %v8241_v5  ;;  %1797 = vmatpush2.bf16.msra.mxu1 %v8243_v6  ;;  %v9331_v5 = vld [vmem:[#allocation10 + $0xa8] sm:$0xff]   ;;  %v9332_v6 = vld [vmem:[#allocation10 + $0x60] sm:$0xff]  }
 0x209   :  { %1757 = vmatprep.subr.bf16.mxu0 %v8234_v7  ;;  %1798 = vmatprep.subr.bf16.mxu1 %v8236_v8  ;;  %v9333_v7 = vld [vmem:[#allocation10 + $0xe0] sm:$0xff]  }
 0x20a   :  { %v9334_v8 = vld [vmem:[#allocation10 + $0x20] sm:$0xff]  }
 0x20c   :  { %1758 = vmatpush2.bf16.msra.mxu0 %v8233_v13  ;;  %1799 = vmatpush2.bf16.msra.mxu1 %v8235_v19  ;;  %v9339_v13 = vld [vmem:[#allocation10 + $0x98] sm:$0xff]   ;;  %v9340_v19 = vld [vmem:[#allocation10 + $0x50] sm:$0xff]  }
 0x20d   :  { %1759 = vmatprep.subr.bf16.mxu0 %v8226_v20  ;;  %1800 = vmatprep.subr.bf16.mxu1 %v8228_v22  ;;  %v9341_v20 = vld [vmem:[#allocation10 + $0xd0] sm:$0xff]  }
 0x20e   :  { %v9342_v22 = vld [vmem:[#allocation10 + $0x10] sm:$0xff]  }
 0x210   :  { %1760 = vmatpush2.bf16.msra.mxu0 %v8225_v28  ;;  %1801 = vmatpush2.bf16.msra.mxu1 %v8227_v30  ;;  %v9347_v28 = vld [vmem:[#allocation10 + $0x88] sm:$0xff]   ;;  %v9348_v30 = vld [vmem:[#allocation10 + $0x40] sm:$0xff]  }
 0x211   :  { %1761 = vmatprep.subr.bf16.mxu0 %v8218_v31  ;;  %1802 = vmatprep.subr.bf16.mxu1 %v8220_v2  ;;  %v9349_v31 = vld [vmem:[#allocation10 + $0xc0] sm:$0xff]  }
 0x212   :  { %v9350_v2 = vld [vmem:[#allocation10] sm:$0xff]  }
 0x214   :  { %1762 = vmatpush2.bf16.msra.mxu0 %v8217_v33  ;;  %1803 = vmatpush2.bf16.msra.mxu1 %v8219_v34  ;;  %v10005_v33 = vld [vmem:[#allocation8] sm:$0xff]  ;;  %v10008_v34 = vsub.s32 3, %v9920_v15 }
 0x215   :  { %1763 = vmatprep.subr.bf16.mxu0 %v8210_v36  ;;  %1804 = vmatprep.subr.bf16.mxu1 %v8212_v37  ;;  %v978_v36 = vrot.slane %v10005_v33, %v9923_v16  ;;  %v986_v37 = vrot.slane %v10005_v33, %v10003_v17  ;;  %v982_v38 = vrot.slane %v10005_v33, %v9927_v18 }
 0x216   :  { %v990_v39 = vrot.slane %v10005_v33, %v10008_v34 }
 0x218   :  { %1764 = vmatpush2.bf16.msra.mxu0 %v8209_v42  ;;  %1805 = vmatpush2.bf16.msra.mxu1 %v8211_v43 }
 0x219   :  { %1765 = vmatprep.subr.bf16.mxu0 %v8202_v44  ;;  %1806 = vmatprep.subr.bf16.mxu1 %v8204_v45 }
 0x21c   :  { %1766 = vmatpush2.bf16.msra.mxu0 %v8201_v49  ;;  %1807 = vmatpush2.bf16.msra.mxu1 %v8203_v50 }
 0x21d   :  { %1767 = vmatprep.subr.bf16.mxu0 %v8194_v51  ;;  %1808 = vmatprep.subr.bf16.mxu1 %v8196_v52 }
 0x220   :  { %1768 = vmatpush2.bf16.msra.mxu0 %v8193_v35  ;;  %1809 = vmatpush2.bf16.msra.mxu1 %v8195_v55 }
 0x221   :  { %9023 = vmatprep.subr.bf16.mxu0 %v9320_v56  ;;  %9045 = vmatprep.subr.bf16.mxu1 %v9321_v57 }
 0x223   :  { %1770 = vmatmul.mubr.bf16.vlgmr.msra.gmra.mxu0 %v9986_v54  ;;  %1811 = vmatmul.mubr.bf16.vlgmr.msra.gmra.mxu1 %v9986_v54 }
 0x224   :  { %9024 = vmatpush3.bf16.msra.mxu0 %v9322_v58  ;;  %9046 = vmatpush3.bf16.msra.mxu1 %v9323_v59  ;;  %v9354_v58 = vld [vmem:[#allocation10 + $0x138] sm:$0xff]  }
 0x225   :  { %9025 = vmatprep.subr.bf16.mxu0 %v9324_v60  ;;  %9047 = vmatprep.subr.bf16.mxu1 %v9325_v61  ;;  %v9355_v59 = vld [vmem:[#allocation10 + $0x1b8] sm:$0xff]  }
 0x228   :  { %9026 = vmatpush3.bf16.msra.mxu0 %v9326_v62  ;;  %9048 = vmatpush3.bf16.msra.mxu1 %v9327_v63  ;;  %v9356_v62 = vld [vmem:[#allocation10 + $0x170] sm:$0xff]  }
 0x229   :  { %9027 = vmatprep.subr.bf16.mxu0 %v9328_v0  ;;  %9049 = vmatprep.subr.bf16.mxu1 %v9329_v1  ;;  %v9357_v63 = vld [vmem:[#allocation10 + $0x1f0] sm:$0xff]  }
 0x22a   :  { %v9358_v0 = vld [vmem:[#allocation10 + $0x130] sm:$0xff]  }
 0x22b   :  { %v9359_v1 = vld [vmem:[#allocation10 + $0x1b0] sm:$0xff]  }
 0x22c   :  { %9028 = vmatpush3.bf16.msra.mxu0 %v9330_v4  ;;  %9050 = vmatpush3.bf16.msra.mxu1 %v9331_v5  ;;  %v9360_v4 = vld [vmem:[#allocation10 + $0x168] sm:$0xff]  }
 0x22d   :  { %9029 = vmatprep.subr.bf16.mxu0 %v9332_v6  ;;  %9051 = vmatprep.subr.bf16.mxu1 %v9333_v7  ;;  %v9361_v5 = vld [vmem:[#allocation10 + $0x1e8] sm:$0xff]  }
 0x22e   :  { %v9362_v6 = vld [vmem:[#allocation10 + $0x128] sm:$0xff]  }
 0x22f   :  { %v9363_v7 = vld [vmem:[#allocation10 + $0x1a8] sm:$0xff]  }
 0x230   :  { %9030 = vmatpush3.bf16.msra.mxu0 %v9334_v8  ;;  %9052 = vmatpush3.bf16.msra.mxu1 %v9335_v10  ;;  %v9364_v8 = vld [vmem:[#allocation10 + $0x160] sm:$0xff]  }
 0x231   :  { %9031 = vmatprep.subr.bf16.mxu0 %v9336_v11  ;;  %9053 = vmatprep.subr.bf16.mxu1 %v9337_v12  ;;  %v9365_v10 = vld [vmem:[#allocation10 + $0x1e0] sm:$0xff]  }
 0x232   :  { %v9366_v11 = vld [vmem:[#allocation10 + $0x120] sm:$0xff]  }
 0x233   :  { %v9367_v12 = vld [vmem:[#allocation10 + $0x1a0] sm:$0xff]  }
 0x234   :  { %9032 = vmatpush3.bf16.msra.mxu0 %v9338_v9  ;;  %9054 = vmatpush3.bf16.msra.mxu1 %v9339_v13  ;;  %v9368_v9 = vld [vmem:[#allocation10 + $0x158] sm:$0xff]  }
 0x235   :  { %9033 = vmatprep.subr.bf16.mxu0 %v9340_v19  ;;  %9055 = vmatprep.subr.bf16.mxu1 %v9341_v20  ;;  %v9369_v13 = vld [vmem:[#allocation10 + $0x1d8] sm:$0xff]  }
 0x236   :  { %v9370_v19 = vld [vmem:[#allocation10 + $0x118] sm:$0xff]  }
 0x237   :  { %v9371_v20 = vld [vmem:[#allocation10 + $0x198] sm:$0xff]  }
 0x238   :  { %9034 = vmatpush3.bf16.msra.mxu0 %v9342_v22  ;;  %9056 = vmatpush3.bf16.msra.mxu1 %v9343_v23  ;;  %v9372_v22 = vld [vmem:[#allocation10 + $0x150] sm:$0xff]  }
 0x239   :  { %9035 = vmatprep.subr.bf16.mxu0 %v9344_v24  ;;  %9057 = vmatprep.subr.bf16.mxu1 %v9345_v25  ;;  %v9373_v23 = vld [vmem:[#allocation10 + $0x1d0] sm:$0xff]  }
 0x23a   :  { %v9374_v24 = vld [vmem:[#allocation10 + $0x110] sm:$0xff]  }
 0x23b   :  { %v9375_v25 = vld [vmem:[#allocation10 + $0x190] sm:$0xff]  }
 0x23c   :  { %9036 = vmatpush3.bf16.msra.mxu0 %v9346_v27  ;;  %9058 = vmatpush3.bf16.msra.mxu1 %v9347_v28  ;;  %v9376_v27 = vld [vmem:[#allocation10 + $0x148] sm:$0xff]  }
 0x23d   :  { %9037 = vmatprep.subr.bf16.mxu0 %v9348_v30  ;;  %9059 = vmatprep.subr.bf16.mxu1 %v9349_v31  ;;  %v9377_v28 = vld [vmem:[#allocation10 + $0x1c8] sm:$0xff]  }
 0x23e   :  { %v9378_v30 = vld [vmem:[#allocation10 + $0x108] sm:$0xff]  }
 0x23f   :  { %v9379_v31 = vld [vmem:[#allocation10 + $0x188] sm:$0xff]  }
 0x240   :  { %9038 = vmatpush3.bf16.msra.mxu0 %v9350_v2  ;;  %9060 = vmatpush3.bf16.msra.mxu1 %v9351_v3  ;;  %v9380_v2 = vld [vmem:[#allocation10 + $0x140] sm:$0xff]  }
 0x241   :  { %9067 = vmatprep.subr.bf16.mxu0 %v9352_v14  ;;  %9089 = vmatprep.subr.bf16.mxu1 %v9353_v32  ;;  %v9381_v3 = vld [vmem:[#allocation10 + $0x1c0] sm:$0xff]  }
 0x242   :  { %v2598_v14 = vld [vmem:[#allocation13 + $0x1c0] sm:$0xff] }
 0x243   :  { %v2602_v32 = vld [vmem:[#allocation13 + $0x1e0] sm:$0xff] }
 0x2a3   :  { %v1689_v40 = vpop.f32.mrf.mxu0  ;;  %v1730_v41 = vpop.f32.mrf.mxu1 }
 0x2a4   :  { %v1690_v42 = vadd.f32 %v1689_v40, %v978_v36  ;;  %v1731_v43 = vadd.f32 %v1730_v41, %v986_v37  ;;  %v2599_v36 = vld [vmem:[#allocation13 + $0x1c8] sm:$0xff]  ;;  %v8375_v40 = vcombine.high %v2598_v14, %v2602_v32 }
 0x2a5   :  { %v1691_v44 = vpop.f32.mrf.mxu0  ;;  %v1732_v45 = vpop.f32.mrf.mxu1  ;;  %v2603_v37 = vld [vmem:[#allocation13 + $0x1e8] sm:$0xff] }
 0x2a6   :  { %v1692_v29 = vadd.f32 %v1691_v44, %v982_v38  ;;  %v1733_v46 = vadd.f32 %v1732_v45, %v990_v39  ;;  %v1819_v47 = vmax.f32 %v1690_v42, 0.0  ;;  %v1821_v48 = vmax.f32 %v1731_v43, 0.0  ;;  %v9382_v38 = vld [vmem:[#allocation10 + $0x100] sm:$0xff]  }
 0x2a7   :  { %v1693_v49 = vpop.f32.mrf.mxu0  ;;  %v1734_v50 = vpop.f32.mrf.mxu1  ;;  %v9383_v39 = vld [vmem:[#allocation10 + $0x180] sm:$0xff]   ;;  %v8377_v41 = vcombine.high %v2599_v36, %v2603_v37  ;;  %v10019_v42 = vsub.s32 4, %v9920_v15  ;;  %v10022_v43 = vsub.s32 6, %v9920_v15  ;;  %v10025_v44 = vsub.s32 5, %v9920_v15 }
 0x2a8   :  { %v1820_v51 = vmax.f32 %v1692_v29, 0.0  ;;  %v1822_v52 = vmax.f32 %v1733_v46, 0.0  ;;  %v1827_v60 = vpack.c.bf16 %v1819_v47, %v1819_v47  ;;  %v1829_v61 = vpack.c.bf16 %v1821_v48, %v1821_v48 }
 0x2a9   :  { %v1694_v35 = vpop.f32.mrf.mxu0  ;;  %v1735_v55 = vpop.f32.mrf.mxu1  ;;  %v10028_v45 = vsub.s32 7, %v9920_v15  ;;  %v994_v29 = vrot.slane %v10005_v33, %v10019_v42  ;;  %v1002_v46 = vrot.slane %v10005_v33, %v10022_v43  ;;  %v998_v47 = vrot.slane %v10005_v33, %v10025_v44 }
 0x2aa   :  { %v1828_v56 = vpack.c.bf16 %v1820_v51, %v1820_v51  ;;  %v1830_v57 = vpack.c.bf16 %v1822_v52, %v1822_v52 }
 0x2ab   :  { %v1006_v48 = vrot.slane %v10005_v33, %v10028_v45  ;;  %v2595_v33 = vld [vmem:[#allocation13 + $0x1a8] sm:$0xff] }
 0x2ac   :  { %2386 = vmatprep.mubr.bf16.mxu0 %v1828_v56  ;;  %2426 = vmatprep.mubr.bf16.mxu1 %v1830_v57 }
 0x2ad   :  { %2387 = vmatmul.mubr.bf16.vlgmr.msra.gmra.mxu0 %v1827_v60  ;;  %2427 = vmatmul.mubr.bf16.vlgmr.msra.gmra.mxu1 %v1829_v61 }
 0x2ae   :  { %9068 = vmatpush3.bf16.msra.mxu0 %v9354_v58  ;;  %9090 = vmatpush3.bf16.msra.mxu1 %v9355_v59 }
 0x2af   :  { %9069 = vmatprep.subr.bf16.mxu0 %v9356_v62  ;;  %9091 = vmatprep.subr.bf16.mxu1 %v9357_v63  ;;  %v2590_v63 = vld [vmem:[#allocation13 + $0x180] sm:$0xff] }
 0x2b2   :  { %9070 = vmatpush3.bf16.msra.mxu0 %v9358_v0  ;;  %9092 = vmatpush3.bf16.msra.mxu1 %v9359_v1 }
 0x2b3   :  { %9071 = vmatprep.subr.bf16.mxu0 %v9360_v4  ;;  %9093 = vmatprep.subr.bf16.mxu1 %v9361_v5  ;;  %v2594_v4 = vld [vmem:[#allocation13 + $0x1a0] sm:$0xff]  ;;  %v2591_v5 = vld [vmem:[#allocation13 + $0x188] sm:$0xff] }
 0x2b6   :  { %9072 = vmatpush3.bf16.msra.mxu0 %v9362_v6  ;;  %9094 = vmatpush3.bf16.msra.mxu1 %v9363_v7 }
 0x2b7   :  { %9073 = vmatprep.subr.bf16.mxu0 %v9364_v8  ;;  %9095 = vmatprep.subr.bf16.mxu1 %v9365_v10  ;;  %v8374_v8 = vcombine.low %v2598_v14, %v2602_v32  ;;  %v8376_v10 = vcombine.low %v2599_v36, %v2603_v37 }
 0x2ba   :  { %9074 = vmatpush3.bf16.msra.mxu0 %v9366_v11  ;;  %9096 = vmatpush3.bf16.msra.mxu1 %v9367_v12 }
 0x2bb   :  { %9075 = vmatprep.subr.bf16.mxu0 %v9368_v9  ;;  %9097 = vmatprep.subr.bf16.mxu1 %v9369_v13  ;;  %v2582_v9 = vld [vmem:[#allocation13 + $0x140] sm:$0xff]  ;;  %v8367_v13 = vcombine.high %v2590_v63, %v2594_v4 }
 0x2be   :  { %9076 = vmatpush3.bf16.msra.mxu0 %v9370_v19  ;;  %9098 = vmatpush3.bf16.msra.mxu1 %v9371_v20  ;;  %v8369_v19 = vcombine.high %v2591_v5, %v2595_v33  ;;  %v2586_v20 = vld [vmem:[#allocation13 + $0x160] sm:$0xff] }
 0x2bf   :  { %9077 = vmatprep.subr.bf16.mxu0 %v9372_v22  ;;  %9099 = vmatprep.subr.bf16.mxu1 %v9373_v23  ;;  %v2583_v22 = vld [vmem:[#allocation13 + $0x148] sm:$0xff]  ;;  %v8358_v14 = vcombine.low %v2582_v9, %v2586_v20 }
 0x2c0   :  { %v2587_v23 = vld [vmem:[#allocation13 + $0x168] sm:$0xff] }
 0x2c1   :  { %v8360_v32 = vcombine.low %v2583_v22, %v2587_v23 }
 0x2c2   :  { %9078 = vmatpush3.bf16.msra.mxu0 %v9374_v24  ;;  %9100 = vmatpush3.bf16.msra.mxu1 %v9375_v25  ;;  %v8366_v24 = vcombine.low %v2590_v63, %v2594_v4  ;;  %v8368_v25 = vcombine.low %v2591_v5, %v2595_v33  ;;  %v2546_v4 = vld [vmem:[#allocation13 + $0x20] sm:$0xff]  ;;  %v2543_v5 = vld [vmem:[#allocation13 + $0x8] sm:$0xff] }
 0x2c3   :  { %9079 = vmatprep.subr.bf16.mxu0 %v9376_v27  ;;  %9101 = vmatprep.subr.bf16.mxu1 %v9377_v28  ;;  %v8359_v27 = vcombine.high %v2582_v9, %v2586_v20  ;;  %v8361_v28 = vcombine.high %v2583_v22, %v2587_v23  ;;  %v2547_v33 = vld [vmem:[#allocation13 + $0x28] sm:$0xff] }
 0x2c4   :  { %v2663_v9 = vld [vmem:[#allocation13 + $0x3c8] sm:$0xff]  ;;  %v8320_v20 = vcombine.low %v2543_v5, %v2547_v33 }
 0x2c6   :  { %9080 = vmatpush3.bf16.msra.mxu0 %v9378_v30  ;;  %9102 = vmatpush3.bf16.msra.mxu1 %v9379_v31  ;;  %v2574_v30 = vld [vmem:[#allocation13 + $0x100] sm:$0xff] }
 0x2c7   :  { %9081 = vmatprep.subr.bf16.mxu0 %v9380_v2  ;;  %9103 = vmatprep.subr.bf16.mxu1 %v9381_v3  ;;  %v2578_v31 = vld [vmem:[#allocation13 + $0x120] sm:$0xff]  ;;  %v2575_v2 = vld [vmem:[#allocation13 + $0x108] sm:$0xff] }
 0x2c8   :  { %v2579_v3 = vld [vmem:[#allocation13 + $0x128] sm:$0xff]  ;;  %v8351_v36 = vcombine.high %v2574_v30, %v2578_v31 }
 0x2c9   :  { %v8353_v37 = vcombine.high %v2575_v2, %v2579_v3 }
 0x2ca   :  { %9082 = vmatpush3.bf16.msra.mxu0 %v9382_v38  ;;  %9104 = vmatpush3.bf16.msra.mxu1 %v9383_v39  ;;  %v2566_v38 = vld [vmem:[#allocation13 + $0xc0] sm:$0xff] }
 0x2cb   :  { %3352 = vmatprep.subr.bf16.mxu0 %v8375_v40  ;;  %3393 = vmatprep.subr.bf16.mxu1 %v8377_v41  ;;  %v2570_v39 = vld [vmem:[#allocation13 + $0xe0] sm:$0xff]  ;;  %v2567_v40 = vld [vmem:[#allocation13 + $0xc8] sm:$0xff] }
 0x2cc   :  { %v2571_v41 = vld [vmem:[#allocation13 + $0xe8] sm:$0xff] }
 0x2e3   :  { %v1771_v49 = vpop.f32.mrf.mxu0  ;;  %v1812_v50 = vpop.f32.mrf.mxu1 }
 0x2e4   :  { %v1772_v51 = vadd.f32 %v1771_v49, %v994_v29  ;;  %v1813_v52 = vadd.f32 %v1812_v50, %v1002_v46  ;;  %v8350_v29 = vcombine.low %v2574_v30, %v2578_v31  ;;  %v8352_v46 = vcombine.low %v2575_v2, %v2579_v3  ;;  %v2558_v49 = vld [vmem:[#allocation13 + $0x80] sm:$0xff] }
 0x2e5   :  { %v1773_v35 = vpop.f32.mrf.mxu0  ;;  %v1814_v55 = vpop.f32.mrf.mxu1  ;;  %v2562_v50 = vld [vmem:[#allocation13 + $0xa0] sm:$0xff] }
 0x2e6   :  { %v1774_v15 = vadd.f32 %v1773_v35, %v998_v47  ;;  %v1815_v56 = vadd.f32 %v1814_v55, %v1006_v48  ;;  %v1823_v57 = vmax.f32 %v1772_v51, 0.0  ;;  %v1825_v58 = vmax.f32 %v1813_v52, 0.0  ;;  %v2559_v51 = vld [vmem:[#allocation13 + $0x88] sm:$0xff] }
 0x2e7   :  { %v1775_v59 = vpop.f32.mrf.mxu0  ;;  %v1816_v60 = vpop.f32.mrf.mxu1  ;;  %v8343_v47 = vcombine.high %v2566_v38, %v2570_v39  ;;  %v8345_v48 = vcombine.high %v2567_v40, %v2571_v41  ;;  %v2563_v52 = vld [vmem:[#allocation13 + $0xa8] sm:$0xff]  ;;  %v8342_v35 = vcombine.low %v2566_v38, %v2570_v39  ;;  %v8344_v55 = vcombine.low %v2567_v40, %v2571_v41 }
 0x2e8   :  { %v1824_v61 = vmax.f32 %v1774_v15, 0.0  ;;  %v1826_v62 = vmax.f32 %v1815_v56, 0.0  ;;  %v1831_v11 = vpack.c.bf16 %v1823_v57, %v1823_v57  ;;  %v1833_v12 = vpack.c.bf16 %v1825_v58, %v1825_v58  ;;  %v2550_v57 = vld [vmem:[#allocation13 + $0x40] sm:$0xff]  ;;  %v2551_v59 = vld [vmem:[#allocation13 + $0x48] sm:$0xff] }
 0x2e9   :  { %v1776_v0 = vpop.f32.mrf.mxu0  ;;  %v1817_v1 = vpop.f32.mrf.mxu1  ;;  %v8335_v15 = vcombine.high %v2558_v49, %v2562_v50  ;;  %v8337_v56 = vcombine.high %v2559_v51, %v2563_v52  ;;  %v2554_v58 = vld [vmem:[#allocation13 + $0x60] sm:$0xff]  ;;  %v2555_v60 = vld [vmem:[#allocation13 + $0x68] sm:$0xff] }
 0x2ea   :  { %v1832_v6 = vpack.c.bf16 %v1824_v61, %v1824_v61  ;;  %v1834_v7 = vpack.c.bf16 %v1826_v62, %v1826_v62  ;;  %v8334_v61 = vcombine.low %v2558_v49, %v2562_v50  ;;  %v8336_v62 = vcombine.low %v2559_v51, %v2563_v52  ;;  %v2542_v1 = vld [vmem:[#allocation13] sm:$0xff] }
 0x2eb   :  { %v8327_v63 = vcombine.high %v2550_v57, %v2554_v58  ;;  %v8329_v0 = vcombine.high %v2551_v59, %v2555_v60 }
 0x2ec   :  { %2466 = vmatprep.mubr.bf16.mxu0 %v1832_v6  ;;  %2506 = vmatprep.mubr.bf16.mxu1 %v1834_v7  ;;  %v8326_v6 = vcombine.low %v2550_v57, %v2554_v58  ;;  %v8328_v7 = vcombine.low %v2551_v59, %v2555_v60 }
 0x2ed   :  { %2467 = vmatmul.mubr.bf16.vlgmr.msra.gmra.mxu0 %v1831_v11  ;;  %2507 = vmatmul.mubr.bf16.vlgmr.msra.gmra.mxu1 %v1833_v12  ;;  %v2662_v11 = vld [vmem:[#allocation13 + $0x3c0] sm:$0xff] }
 0x2ee   :  { %3353 = vmatpush1.bf16.msra.mxu0 %v8374_v8  ;;  %3394 = vmatpush1.bf16.msra.mxu1 %v8376_v10  ;;  %v8319_v8 = vcombine.high %v2542_v1, %v2546_v4  ;;  %v8321_v10 = vcombine.high %v2543_v5, %v2547_v33  ;;  %v2666_v12 = vld [vmem:[#allocation13 + $0x3e0] sm:$0xff] }
 0x2ef   :  { %3384 = vmatprep.mubr.bf16.mxu0 %v9984_v53  ;;  %3425 = vmatprep.mubr.bf16.mxu1 %v9984_v53  ;;  %v8439_v22 = vcombine.high %v2662_v11, %v2666_v12  ;;  %v8438_v30 = vcombine.low %v2662_v11, %v2666_v12 }
 0x2f0   :  { %3354 = vmatprep.subr.bf16.mxu0 %v8367_v13  ;;  %3395 = vmatprep.subr.bf16.mxu1 %v8369_v19  ;;  %v2667_v13 = vld [vmem:[#allocation13 + $0x3e8] sm:$0xff]  ;;  %v8318_v19 = vcombine.low %v2542_v1, %v2546_v4 }
 0x2f1   :  { %v8441_v23 = vcombine.high %v2663_v9, %v2667_v13  ;;  %v8440_v31 = vcombine.low %v2663_v9, %v2667_v13 }
 0x2f2   :  { %3355 = vmatpush1.bf16.msra.mxu0 %v8366_v24  ;;  %3396 = vmatpush1.bf16.msra.mxu1 %v8368_v25  ;;  %v2654_v24 = vld [vmem:[#allocation13 + $0x380] sm:$0xff] }
 0x2f3   :  { %3356 = vmatprep.subr.bf16.mxu0 %v8359_v27  ;;  %3397 = vmatprep.subr.bf16.mxu1 %v8361_v28  ;;  %v2658_v25 = vld [vmem:[#allocation13 + $0x3a0] sm:$0xff]  ;;  %v2655_v27 = vld [vmem:[#allocation13 + $0x388] sm:$0xff] }
 0x2f4   :  { %v2659_v28 = vld [vmem:[#allocation13 + $0x3a8] sm:$0xff]  ;;  %v8431_v2 = vcombine.high %v2654_v24, %v2658_v25  ;;  %v8430_v38 = vcombine.low %v2654_v24, %v2658_v25 }
 0x2f5   :  { %v8433_v3 = vcombine.high %v2655_v27, %v2659_v28  ;;  %v8432_v39 = vcombine.low %v2655_v27, %v2659_v28 }
 0x2f6   :  { %3357 = vmatpush1.bf16.msra.mxu0 %v8358_v14  ;;  %3398 = vmatpush1.bf16.msra.mxu1 %v8360_v32  ;;  %v2646_v14 = vld [vmem:[#allocation13 + $0x340] sm:$0xff] }
 0x2f7   :  { %3358 = vmatprep.subr.bf16.mxu0 %v8351_v36  ;;  %3399 = vmatprep.subr.bf16.mxu1 %v8353_v37  ;;  %v2650_v32 = vld [vmem:[#allocation13 + $0x360] sm:$0xff]  ;;  %v2647_v36 = vld [vmem:[#allocation13 + $0x348] sm:$0xff] }
 0x2f8   :  { %v2651_v37 = vld [vmem:[#allocation13 + $0x368] sm:$0xff]  ;;  %v8423_v40 = vcombine.high %v2646_v14, %v2650_v32  ;;  %v8422_v49 = vcombine.low %v2646_v14, %v2650_v32 }
 0x2f9   :  { %v8425_v41 = vcombine.high %v2647_v36, %v2651_v37  ;;  %v8424_v50 = vcombine.low %v2647_v36, %v2651_v37 }
 0x2fa   :  { %3359 = vmatpush1.bf16.msra.mxu0 %v8350_v29  ;;  %3400 = vmatpush1.bf16.msra.mxu1 %v8352_v46  ;;  %v2638_v29 = vld [vmem:[#allocation13 + $0x300] sm:$0xff] }
 0x2fb   :  { %3360 = vmatprep.subr.bf16.mxu0 %v8343_v47  ;;  %3401 = vmatprep.subr.bf16.mxu1 %v8345_v48  ;;  %v2642_v46 = vld [vmem:[#allocation13 + $0x320] sm:$0xff]  ;;  %v2639_v47 = vld [vmem:[#allocation13 + $0x308] sm:$0xff] }
 0x2fc   :  { %v2643_v48 = vld [vmem:[#allocation13 + $0x328] sm:$0xff]  ;;  %v8415_v51 = vcombine.high %v2638_v29, %v2642_v46  ;;  %v8414_v57 = vcombine.low %v2638_v29, %v2642_v46 }
 0x2fd   :  { %v8417_v52 = vcombine.high %v2639_v47, %v2643_v48  ;;  %v8416_v58 = vcombine.low %v2639_v47, %v2643_v48 }
 0x2fe   :  { %3361 = vmatpush1.bf16.msra.mxu0 %v8342_v35  ;;  %3402 = vmatpush1.bf16.msra.mxu1 %v8344_v55  ;;  %v2630_v35 = vld [vmem:[#allocation13 + $0x2c0] sm:$0xff] }
 0x2ff   :  { %3362 = vmatprep.subr.bf16.mxu0 %v8335_v15  ;;  %3403 = vmatprep.subr.bf16.mxu1 %v8337_v56  ;;  %v2634_v55 = vld [vmem:[#allocation13 + $0x2e0] sm:$0xff]  ;;  %v2631_v15 = vld [vmem:[#allocation13 + $0x2c8] sm:$0xff] }
 0x300   :  { %v2635_v56 = vld [vmem:[#allocation13 + $0x2e8] sm:$0xff]  ;;  %v8407_v59 = vcombine.high %v2630_v35, %v2634_v55  ;;  %v8406_v1 = vcombine.low %v2630_v35, %v2634_v55 }
 0x301   :  { %v8409_v60 = vcombine.high %v2631_v15, %v2635_v56  ;;  %v8408_v4 = vcombine.low %v2631_v15, %v2635_v56 }
 0x302   :  { %3363 = vmatpush1.bf16.msra.mxu0 %v8334_v61  ;;  %3404 = vmatpush1.bf16.msra.mxu1 %v8336_v62  ;;  %v2622_v61 = vld [vmem:[#allocation13 + $0x280] sm:$0xff] }
 0x303   :  { %3364 = vmatprep.subr.bf16.mxu0 %v8327_v63  ;;  %3405 = vmatprep.subr.bf16.mxu1 %v8329_v0  ;;  %v2626_v62 = vld [vmem:[#allocation13 + $0x2a0] sm:$0xff]  ;;  %v2623_v63 = vld [vmem:[#allocation13 + $0x288] sm:$0xff] }
 0x304   :  { %v2627_v0 = vld [vmem:[#allocation13 + $0x2a8] sm:$0xff]  ;;  %v8399_v5 = vcombine.high %v2622_v61, %v2626_v62  ;;  %v8398_v11 = vcombine.low %v2622_v61, %v2626_v62 }
 0x305   :  { %v8401_v33 = vcombine.high %v2623_v63, %v2627_v0  ;;  %v8400_v12 = vcombine.low %v2623_v63, %v2627_v0 }
 0x306   :  { %3365 = vmatpush1.bf16.msra.mxu0 %v8326_v6  ;;  %3406 = vmatpush1.bf16.msra.mxu1 %v8328_v7  ;;  %v2614_v6 = vld [vmem:[#allocation13 + $0x240] sm:$0xff] }
 0x307   :  { %3366 = vmatprep.subr.bf16.mxu0 %v8319_v8  ;;  %3407 = vmatprep.subr.bf16.mxu1 %v8321_v10  ;;  %v2618_v7 = vld [vmem:[#allocation13 + $0x260] sm:$0xff]  ;;  %v2615_v8 = vld [vmem:[#allocation13 + $0x248] sm:$0xff] }
 0x308   :  { %v2619_v10 = vld [vmem:[#allocation13 + $0x268] sm:$0xff]  ;;  %v8391_v9 = vcombine.high %v2614_v6, %v2618_v7  ;;  %v8390_v24 = vcombine.low %v2614_v6, %v2618_v7 }
 0x309   :  { %v8393_v13 = vcombine.high %v2615_v8, %v2619_v10  ;;  %v8392_v25 = vcombine.low %v2615_v8, %v2619_v10  ;;  %v2560_v10 = vld [vmem:[#allocation13 + $0x90] sm:$0xff] }
 0x30a   :  { %3367 = vmatpush1.bf16.msra.mxu0 %v8318_v19  ;;  %3408 = vmatpush1.bf16.msra.mxu1 %v8320_v20  ;;  %v2606_v19 = vld [vmem:[#allocation13 + $0x200] sm:$0xff] }
 0x30b   :  { %3368 = vmatprep.subr.bf16.mxu0 %v8439_v22  ;;  %3409 = vmatprep.subr.bf16.mxu1 %v8441_v23  ;;  %v2610_v20 = vld [vmem:[#allocation13 + $0x220] sm:$0xff]  ;;  %v2607_v22 = vld [vmem:[#allocation13 + $0x208] sm:$0xff] }
 0x30c   :  { %v2611_v23 = vld [vmem:[#allocation13 + $0x228] sm:$0xff]  ;;  %v8383_v27 = vcombine.high %v2606_v19, %v2610_v20  ;;  %v8382_v14 = vcombine.low %v2606_v19, %v2610_v20 }
 0x30d   :  { %v8385_v28 = vcombine.high %v2607_v22, %v2611_v23  ;;  %v8384_v32 = vcombine.low %v2607_v22, %v2611_v23  ;;  %v2552_v23 = vld [vmem:[#allocation13 + $0x50] sm:$0xff] }
 0x30e   :  { %3369 = vmatpush2.bf16.msra.mxu0 %v8438_v30  ;;  %3410 = vmatpush2.bf16.msra.mxu1 %v8440_v31  ;;  %v2600_v30 = vld [vmem:[#allocation13 + $0x1d0] sm:$0xff] }
 0x30f   :  { %3370 = vmatprep.subr.bf16.mxu0 %v8431_v2  ;;  %3411 = vmatprep.subr.bf16.mxu1 %v8433_v3  ;;  %v2604_v31 = vld [vmem:[#allocation13 + $0x1f0] sm:$0xff]  ;;  %v2601_v2 = vld [vmem:[#allocation13 + $0x1d8] sm:$0xff] }
 0x310   :  { %v2605_v3 = vld [vmem:[#allocation13 + $0x1f8] sm:$0xff]  ;;  %v8379_v36 = vcombine.high %v2600_v30, %v2604_v31  ;;  %v8378_v29 = vcombine.low %v2600_v30, %v2604_v31 }
 0x311   :  { %v8381_v37 = vcombine.high %v2601_v2, %v2605_v3  ;;  %v8380_v46 = vcombine.low %v2601_v2, %v2605_v3  ;;  %v2544_v3 = vld [vmem:[#allocation13 + $0x10] sm:$0xff] }
 0x312   :  { %3371 = vmatpush2.bf16.msra.mxu0 %v8430_v38  ;;  %3412 = vmatpush2.bf16.msra.mxu1 %v8432_v39  ;;  %v2592_v38 = vld [vmem:[#allocation13 + $0x190] sm:$0xff] }
 0x313   :  { %3372 = vmatprep.subr.bf16.mxu0 %v8423_v40  ;;  %3413 = vmatprep.subr.bf16.mxu1 %v8425_v41  ;;  %v2596_v39 = vld [vmem:[#allocation13 + $0x1b0] sm:$0xff]  ;;  %v2593_v40 = vld [vmem:[#allocation13 + $0x198] sm:$0xff] }
 0x314   :  { %v2597_v41 = vld [vmem:[#allocation13 + $0x1b8] sm:$0xff]  ;;  %v8371_v47 = vcombine.high %v2592_v38, %v2596_v39  ;;  %v8370_v35 = vcombine.low %v2592_v38, %v2596_v39 }
 0x315   :  { %v8373_v48 = vcombine.high %v2593_v40, %v2597_v41  ;;  %v8372_v55 = vcombine.low %v2593_v40, %v2597_v41  ;;  %v2664_v41 = vld [vmem:[#allocation13 + $0x3d0] sm:$0xff] }
 0x316   :  { %3373 = vmatpush2.bf16.msra.mxu0 %v8422_v49  ;;  %3414 = vmatpush2.bf16.msra.mxu1 %v8424_v50  ;;  %v2584_v49 = vld [vmem:[#allocation13 + $0x150] sm:$0xff] }
 0x317   :  { %3374 = vmatprep.subr.bf16.mxu0 %v8415_v51  ;;  %3415 = vmatprep.subr.bf16.mxu1 %v8417_v52  ;;  %v2588_v50 = vld [vmem:[#allocation13 + $0x170] sm:$0xff]  ;;  %v2585_v51 = vld [vmem:[#allocation13 + $0x158] sm:$0xff] }
 0x318   :  { %v2589_v52 = vld [vmem:[#allocation13 + $0x178] sm:$0xff]  ;;  %v8363_v15 = vcombine.high %v2584_v49, %v2588_v50  ;;  %v8362_v61 = vcombine.low %v2584_v49, %v2588_v50 }
 0x319   :  { %v8365_v56 = vcombine.high %v2585_v51, %v2589_v52  ;;  %v8364_v62 = vcombine.low %v2585_v51, %v2589_v52  ;;  %v2656_v52 = vld [vmem:[#allocation13 + $0x390] sm:$0xff] }
 0x31a   :  { %3375 = vmatpush2.bf16.msra.mxu0 %v8414_v57  ;;  %3416 = vmatpush2.bf16.msra.mxu1 %v8416_v58  ;;  %v2576_v57 = vld [vmem:[#allocation13 + $0x110] sm:$0xff] }
 0x31b   :  { %3376 = vmatprep.subr.bf16.mxu0 %v8407_v59  ;;  %3417 = vmatprep.subr.bf16.mxu1 %v8409_v60  ;;  %v2580_v58 = vld [vmem:[#allocation13 + $0x130] sm:$0xff]  ;;  %v2577_v59 = vld [vmem:[#allocation13 + $0x118] sm:$0xff] }
 0x31c   :  { %v2581_v60 = vld [vmem:[#allocation13 + $0x138] sm:$0xff]  ;;  %v8355_v63 = vcombine.high %v2576_v57, %v2580_v58 }
 0x31d   :  { %v8357_v0 = vcombine.high %v2577_v59, %v2581_v60  ;;  %v8356_v6 = vcombine.low %v2577_v59, %v2581_v60  ;;  %v2648_v60 = vld [vmem:[#allocation13 + $0x350] sm:$0xff] }
 0x31e   :  { %3377 = vmatpush2.bf16.msra.mxu0 %v8406_v1  ;;  %3418 = vmatpush2.bf16.msra.mxu1 %v8408_v4  ;;  %v2568_v1 = vld [vmem:[#allocation13 + $0xd0] sm:$0xff] }
 0x31f   :  { %3378 = vmatprep.subr.bf16.mxu0 %v8399_v5  ;;  %3419 = vmatprep.subr.bf16.mxu1 %v8401_v33  ;;  %v2572_v4 = vld [vmem:[#allocation13 + $0xf0] sm:$0xff]  ;;  %v2573_v5 = vld [vmem:[#allocation13 + $0xf8] sm:$0xff]  ;;  %v8354_v33 = vcombine.low %v2576_v57, %v2580_v58 }
 0x320   :  { %v8347_v7 = vcombine.high %v2568_v1, %v2572_v4 }
 0x322   :  { %3379 = vmatpush2.bf16.msra.mxu0 %v8398_v11  ;;  %3420 = vmatpush2.bf16.msra.mxu1 %v8400_v12  ;;  %v2564_v11 = vld [vmem:[#allocation13 + $0xb0] sm:$0xff]  ;;  %v2561_v12 = vld [vmem:[#allocation13 + $0x98] sm:$0xff] }
 0x323   :  { %3380 = vmatprep.subr.bf16.mxu0 %v8391_v9  ;;  %3421 = vmatprep.subr.bf16.mxu1 %v8393_v13  ;;  %v2565_v9 = vld [vmem:[#allocation13 + $0xb8] sm:$0xff]  ;;  %v8346_v13 = vcombine.low %v2568_v1, %v2572_v4  ;;  %v8339_v20 = vcombine.high %v2560_v10, %v2564_v11 }
 0x324   :  { %v8341_v22 = vcombine.high %v2561_v12, %v2565_v9  ;;  %v8340_v30 = vcombine.low %v2561_v12, %v2565_v9  ;;  %v2632_v9 = vld [vmem:[#allocation13 + $0x2d0] sm:$0xff] }
 0x326   :  { %3381 = vmatpush2.bf16.msra.mxu0 %v8390_v24  ;;  %3422 = vmatpush2.bf16.msra.mxu1 %v8392_v25  ;;  %v2556_v24 = vld [vmem:[#allocation13 + $0x70] sm:$0xff]  ;;  %v2553_v25 = vld [vmem:[#allocation13 + $0x58] sm:$0xff] }
 0x327   :  { %3382 = vmatprep.subr.bf16.mxu0 %v8383_v27  ;;  %3423 = vmatprep.subr.bf16.mxu1 %v8385_v28  ;;  %v2557_v27 = vld [vmem:[#allocation13 + $0x78] sm:$0xff]  ;;  %v8338_v28 = vcombine.low %v2560_v10, %v2564_v11  ;;  %v8331_v31 = vcombine.high %v2552_v23, %v2556_v24 }
 0x328   :  { %v8333_v2 = vcombine.high %v2553_v25, %v2557_v27  ;;  %v8332_v38 = vcombine.low %v2553_v25, %v2557_v27  ;;  %v2624_v27 = vld [vmem:[#allocation13 + $0x290] sm:$0xff] }
 0x32a   :  { %3383 = vmatpush2.bf16.msra.mxu0 %v8382_v14  ;;  %3424 = vmatpush2.bf16.msra.mxu1 %v8384_v32  ;;  %v2548_v14 = vld [vmem:[#allocation13 + $0x30] sm:$0xff]  ;;  %v2545_v32 = vld [vmem:[#allocation13 + $0x18] sm:$0xff] }
 0x32b   :  { %3434 = vmatprep.subr.bf16.mxu0 %v8379_v36  ;;  %3475 = vmatprep.subr.bf16.mxu1 %v8381_v37  ;;  %v2549_v36 = vld [vmem:[#allocation13 + $0x38] sm:$0xff]  ;;  %v8330_v37 = vcombine.low %v2552_v23, %v2556_v24  ;;  %v8323_v39 = vcombine.high %v2544_v3, %v2548_v14 }
 0x32c   :  { %v8325_v40 = vcombine.high %v2545_v32, %v2549_v36  ;;  %v8324_v49 = vcombine.low %v2545_v32, %v2549_v36  ;;  %v2616_v36 = vld [vmem:[#allocation13 + $0x250] sm:$0xff] }
 0x32d   :  { %3385 = vmatmul.mubr.bf16.vlgmr.msra.gmra.mxu0 %v9986_v54  ;;  %3426 = vmatmul.mubr.bf16.vlgmr.msra.gmra.mxu1 %v9986_v54 }
 0x32e   :  { %3435 = vmatpush1.bf16.msra.mxu0 %v8378_v29  ;;  %3466 = vmatprep.mubr.bf16.mxu0 %v9984_v53  ;;  %v2668_v29 = vld [vmem:[#allocation13 + $0x3f0] sm:$0xff] }
 0x32f   :  { %3476 = vmatpush1.bf16.msra.mxu1 %v8380_v46  ;;  %3507 = vmatprep.mubr.bf16.mxu1 %v9984_v53  ;;  %v2569_v53 = vld [vmem:[#allocation13 + $0xd8] sm:$0xff]  ;;  %v8443_v50 = vcombine.high %v2664_v41, %v2668_v29 }
 0x330   :  { %3436 = vmatprep.subr.bf16.mxu0 %v8371_v47  ;;  %3477 = vmatprep.subr.bf16.mxu1 %v8373_v48  ;;  %v8349_v8 = vcombine.high %v2569_v53, %v2573_v5  ;;  %v8348_v19 = vcombine.low %v2569_v53, %v2573_v5  ;;  %v2665_v46 = vld [vmem:[#allocation13 + $0x3d8] sm:$0xff]  ;;  %v8322_v48 = vcombine.low %v2544_v3, %v2548_v14  ;;  %v2640_v5 = vld [vmem:[#allocation13 + $0x310] sm:$0xff] }
 0x331   :  { %v2669_v47 = vld [vmem:[#allocation13 + $0x3f8] sm:$0xff] }
 0x332   :  { %3437 = vmatpush1.bf16.msra.mxu0 %v8370_v35  ;;  %v8445_v51 = vcombine.high %v2665_v46, %v2669_v47  ;;  %v2660_v35 = vld [vmem:[#allocation13 + $0x3b0] sm:$0xff]  ;;  %v8444_v57 = vcombine.low %v2665_v46, %v2669_v47 }
 0x333   :  { %3478 = vmatpush1.bf16.msra.mxu1 %v8372_v55  ;;  %3438 = vmatprep.subr.bf16.mxu0 %v8363_v15  ;;  %v2657_v55 = vld [vmem:[#allocation13 + $0x398] sm:$0xff]  ;;  %v8435_v58 = vcombine.high %v2656_v52, %v2660_v35  ;;  %v2608_v47 = vld [vmem:[#allocation13 + $0x210] sm:$0xff] }
 0x334   :  { %3479 = vmatprep.subr.bf16.mxu1 %v8365_v56  ;;  %v2661_v15 = vld [vmem:[#allocation13 + $0x3b8] sm:$0xff]  ;;  %v8442_v56 = vcombine.low %v2664_v41, %v2668_v29 }
 0x335   :  { %v8437_v59 = vcombine.high %v2657_v55, %v2661_v15  ;;  %v8436_v1 = vcombine.low %v2657_v55, %v2661_v15  ;;  %v3588_v15 = vld [vmem:[#allocation16 + $0x1c0] sm:$0xff] }
 0x336   :  { %3439 = vmatpush1.bf16.msra.mxu0 %v8362_v61  ;;  %v2652_v61 = vld [vmem:[#allocation13 + $0x370] sm:$0xff] }
 0x337   :  { %3480 = vmatpush1.bf16.msra.mxu1 %v8364_v62  ;;  %3440 = vmatprep.subr.bf16.mxu0 %v8355_v63  ;;  %v2649_v62 = vld [vmem:[#allocation13 + $0x358] sm:$0xff]  ;;  %v8427_v4 = vcombine.high %v2648_v60, %v2652_v61 }
 0x338   :  { %3481 = vmatprep.subr.bf16.mxu1 %v8357_v0  ;;  %v2653_v63 = vld [vmem:[#allocation13 + $0x378] sm:$0xff]  ;;  %v8434_v0 = vcombine.low %v2656_v52, %v2660_v35 }
 0x339   :  { %v8429_v53 = vcombine.high %v2649_v62, %v2653_v63  ;;  %v8428_v10 = vcombine.low %v2649_v62, %v2653_v63  ;;  %v3580_v63 = vld [vmem:[#allocation16 + $0x180] sm:$0xff] }
 0x33a   :  { %3441 = vmatpush1.bf16.msra.mxu0 %v8354_v33  ;;  %v2644_v33 = vld [vmem:[#allocation13 + $0x330] sm:$0xff] }
 0x33b   :  { %3482 = vmatpush1.bf16.msra.mxu1 %v8356_v6  ;;  %3442 = vmatprep.subr.bf16.mxu0 %v8347_v7  ;;  %v2641_v6 = vld [vmem:[#allocation13 + $0x318] sm:$0xff]  ;;  %v8419_v11 = vcombine.high %v2640_v5, %v2644_v33 }
 0x33c   :  { %3483 = vmatprep.subr.bf16.mxu1 %v8349_v8  ;;  %v2645_v7 = vld [vmem:[#allocation13 + $0x338] sm:$0xff]  ;;  %v8426_v8 = vcombine.low %v2648_v60, %v2652_v61 }
 0x33d   :  { %v8421_v12 = vcombine.high %v2641_v6, %v2645_v7  ;;  %v8420_v23 = vcombine.low %v2641_v6, %v2645_v7  ;;  %v3572_v7 = vld [vmem:[#allocation16 + $0x140] sm:$0xff] }
 0x33e   :  { %3443 = vmatpush1.bf16.msra.mxu0 %v8346_v13  ;;  %v2636_v13 = vld [vmem:[#allocation13 + $0x2f0] sm:$0xff] }
 0x33f   :  { %3484 = vmatpush1.bf16.msra.mxu1 %v8348_v19  ;;  %3444 = vmatprep.subr.bf16.mxu0 %v8339_v20  ;;  %v2633_v19 = vld [vmem:[#allocation13 + $0x2d8] sm:$0xff]  ;;  %v8411_v24 = vcombine.high %v2632_v9, %v2636_v13 }
 0x340   :  { %3485 = vmatprep.subr.bf16.mxu1 %v8341_v22  ;;  %v2637_v20 = vld [vmem:[#allocation13 + $0x2f8] sm:$0xff]  ;;  %v8418_v22 = vcombine.low %v2640_v5, %v2644_v33 }
 0x341   :  { %v8413_v25 = vcombine.high %v2633_v19, %v2637_v20  ;;  %v8412_v3 = vcombine.low %v2633_v19, %v2637_v20  ;;  %v8253_v19 = vld [vmem:[#allocation11] ss:$0 sm:$0xff] }
 0x342   :  { %3445 = vmatpush1.bf16.msra.mxu0 %v8338_v28  ;;  %v2628_v28 = vld [vmem:[#allocation13 + $0x2b0] sm:$0xff] }
 0x343   :  { %3486 = vmatpush1.bf16.msra.mxu1 %v8340_v30  ;;  %3446 = vmatprep.subr.bf16.mxu0 %v8331_v31  ;;  %v2625_v30 = vld [vmem:[#allocation13 + $0x298] sm:$0xff]  ;;  %v8403_v14 = vcombine.high %v2624_v27, %v2628_v28 }
 0x344   :  { %3487 = vmatprep.subr.bf16.mxu1 %v8333_v2  ;;  %v2629_v31 = vld [vmem:[#allocation13 + $0x2b8] sm:$0xff]  ;;  %v8410_v2 = vcombine.low %v2632_v9, %v2636_v13  ;;  %v3704_v9 = vld [vmem:[#allocation16 + $0x560] sm:$0xff] }
 0x345   :  { %v8405_v32 = vcombine.high %v2625_v30, %v2629_v31  ;;  %v8404_v41 = vcombine.low %v2625_v30, %v2629_v31  ;;  %v3564_v30 = vld [vmem:[#allocation16 + $0x100] sm:$0xff] }
 0x346   :  { %3447 = vmatpush1.bf16.msra.mxu0 %v8330_v37  ;;  %v2620_v37 = vld [vmem:[#allocation13 + $0x270] sm:$0xff]  ;;  %v3568_v31 = vld [vmem:[#allocation16 + $0x120] sm:$0xff] }
 0x347   :  { %3488 = vmatpush1.bf16.msra.mxu1 %v8332_v38  ;;  %3448 = vmatprep.subr.bf16.mxu0 %v8323_v39  ;;  %v2617_v38 = vld [vmem:[#allocation13 + $0x258] sm:$0xff]  ;;  %v8395_v29 = vcombine.high %v2616_v36, %v2620_v37 }
 0x348   :  { %3489 = vmatprep.subr.bf16.mxu1 %v8325_v40  ;;  %v2621_v39 = vld [vmem:[#allocation13 + $0x278] sm:$0xff]  ;;  %v8402_v40 = vcombine.low %v2624_v27, %v2628_v28 }
 0x349   :  { %v8397_v46 = vcombine.high %v2617_v38, %v2621_v39  ;;  %v8396_v52 = vcombine.low %v2617_v38, %v2621_v39 }
 0x34a   :  { %3449 = vmatpush1.bf16.msra.mxu0 %v8322_v48  ;;  %v2612_v48 = vld [vmem:[#allocation13 + $0x230] sm:$0xff] }
 0x34b   :  { %3490 = vmatpush1.bf16.msra.mxu1 %v8324_v49  ;;  %3450 = vmatprep.subr.bf16.mxu0 %v8443_v50  ;;  %v2609_v49 = vld [vmem:[#allocation13 + $0x218] sm:$0xff]  ;;  %v8387_v35 = vcombine.high %v2608_v47, %v2612_v48 }
 0x34c   :  { %3491 = vmatprep.subr.bf16.mxu1 %v8445_v51  ;;  %v2613_v50 = vld [vmem:[#allocation13 + $0x238] sm:$0xff]  ;;  %v8394_v51 = vcombine.low %v2616_v36, %v2620_v37 }
 0x34d   :  { %v8389_v55 = vcombine.high %v2609_v49, %v2613_v50  ;;  %v8388_v60 = vcombine.low %v2609_v49, %v2613_v50  ;;  %v10050_v49 = vld [vmem:[#allocation16 + $0x9e0] sm:$0xff] }
 0x34e   :  { %3451 = vmatpush2.bf16.msra.mxu0 %v8442_v56  ;;  %v3592_v56 = vld [vmem:[#allocation16 + $0x1e0] sm:$0xff] }
 0x34f   :  { %3492 = vmatpush2.bf16.msra.mxu1 %v8444_v57  ;;  %3452 = vmatprep.subr.bf16.mxu0 %v8435_v58  ;;  %v3716_v57 = vld [vmem:[#allocation16 + $0x5c0] sm:$0xff]  ;;  %v8503_v61 = vcombine.high %v3588_v15, %v3592_v56 }
 0x350   :  { %3493 = vmatprep.subr.bf16.mxu1 %v8437_v59  ;;  %v3720_v58 = vld [vmem:[#allocation16 + $0x5e0] sm:$0xff]  ;;  %v8386_v59 = vcombine.low %v2608_v47, %v2612_v48 }
 0x351   :  { %v8631_v62 = vcombine.high %v3716_v57, %v3720_v58  ;;  %v8630_v5 = vcombine.low %v3716_v57, %v3720_v58  ;;  %v10048_v48 = vld [vmem:[#allocation16 + $0x9c0] sm:$0xff] }
 0x352   :  { %3453 = vmatpush2.bf16.msra.mxu0 %v8434_v0  ;;  %v3584_v0 = vld [vmem:[#allocation16 + $0x1a0] sm:$0xff] }
 0x353   :  { %3494 = vmatpush2.bf16.msra.mxu1 %v8436_v1  ;;  %3454 = vmatprep.subr.bf16.mxu0 %v8427_v4  ;;  %v3708_v1 = vld [vmem:[#allocation16 + $0x580] sm:$0xff]  ;;  %v8495_v33 = vcombine.high %v3580_v63, %v3584_v0  ;;  %v8494_v13 = vcombine.low %v3580_v63, %v3584_v0 }
 0x354   :  { %3495 = vmatprep.subr.bf16.mxu1 %v8429_v53  ;;  %v3712_v4 = vld [vmem:[#allocation16 + $0x5a0] sm:$0xff]  ;;  %v8502_v53 = vcombine.low %v3588_v15, %v3592_v56  ;;  %v8758_v15 = vcombine.low %v10048_v48, %v10050_v49 }
 0x355   :  { %v8623_v6 = vcombine.high %v3708_v1, %v3712_v4  ;;  %v10052_v50 = vld [vmem:[#allocation16 + $0xdc0] sm:$0xff] }
 0x356   :  { %3455 = vmatpush2.bf16.msra.mxu0 %v8426_v8  ;;  %v3576_v8 = vld [vmem:[#allocation16 + $0x160] sm:$0xff] }
 0x357   :  { %3496 = vmatpush2.bf16.msra.mxu1 %v8428_v10  ;;  %3456 = vmatprep.subr.bf16.mxu0 %v8419_v11  ;;  %v8486_v36 = vcombine.low %v3572_v7, %v3576_v8  ;;  %v3680_v63 = vld [vmem:[#allocation16 + $0x4a0] sm:$0xff] }
 0x358   :  { %3497 = vmatprep.subr.bf16.mxu1 %v8421_v12  ;;  %v3700_v12 = vld [vmem:[#allocation16 + $0x540] sm:$0xff] }
 0x359   :  { %v8615_v28 = vcombine.high %v3700_v12, %v3704_v9  ;;  %v8614_v39 = vcombine.low %v3700_v12, %v3704_v9  ;;  %v3532_v9 = vld [vmem:[#allocation16] sm:$0xff] }
 0x35a   :  { %3457 = vmatpush2.bf16.msra.mxu0 %v8418_v22 }
 0x35b   :  { %3498 = vmatpush2.bf16.msra.mxu1 %v8420_v23  ;;  %3458 = vmatprep.subr.bf16.mxu0 %v8411_v24  ;;  %v8622_v23 = vcombine.low %v3708_v1, %v3712_v4  ;;  %v8487_v24 = vcombine.high %v3572_v7, %v3576_v8  ;;  %v3672_v7 = vld [vmem:[#allocation16 + $0x460] sm:$0xff] }
 0x35c   :  { %3499 = vmatprep.subr.bf16.mxu1 %v8413_v25 }
 0x35e   :  { %3459 = vmatpush2.bf16.msra.mxu0 %v8410_v2 }
 0x35f   :  { %3500 = vmatpush2.bf16.msra.mxu1 %v8412_v3  ;;  %3460 = vmatprep.subr.bf16.mxu0 %v8403_v14  ;;  %v3692_v14 = vld [vmem:[#allocation16 + $0x500] sm:$0xff] }
 0x360   :  { %3501 = vmatprep.subr.bf16.mxu1 %v8405_v32  ;;  %v3696_v32 = vld [vmem:[#allocation16 + $0x520] sm:$0xff] }
 0x361   :  { %v8607_v47 = vcombine.high %v3692_v14, %v3696_v32  ;;  %v8606_v57 = vcombine.low %v3692_v14, %v3696_v32 }
 0x362   :  { %3461 = vmatpush2.bf16.msra.mxu0 %v8402_v40  ;;  %v8479_v40 = vcombine.high %v3564_v30, %v3568_v31 }
 0x363   :  { %3502 = vmatpush2.bf16.msra.mxu1 %v8404_v41  ;;  %3462 = vmatprep.subr.bf16.mxu0 %v8395_v29  ;;  %v3556_v41 = vld [vmem:[#allocation16 + $0xc0] sm:$0xff] }
 0x364   :  { %3503 = vmatprep.subr.bf16.mxu1 %v8397_v46  ;;  %v3560_v29 = vld [vmem:[#allocation16 + $0xe0] sm:$0xff] }
 0x365   :  { %v8471_v58 = vcombine.high %v3556_v41, %v3560_v29  ;;  %v8470_v0 = vcombine.low %v3556_v41, %v3560_v29 }
 0x366   :  { %3463 = vmatpush2.bf16.msra.mxu0 %v8394_v51  ;;  %v3684_v51 = vld [vmem:[#allocation16 + $0x4c0] sm:$0xff] }
 0x367   :  { %3504 = vmatpush2.bf16.msra.mxu1 %v8396_v52  ;;  %3464 = vmatprep.subr.bf16.mxu0 %v8387_v35  ;;  %v3688_v52 = vld [vmem:[#allocation16 + $0x4e0] sm:$0xff] }
 0x368   :  { %3505 = vmatprep.subr.bf16.mxu1 %v8389_v55  ;;  %v10054_v35 = vld [vmem:[#allocation16 + $0xde0] sm:$0xff]  ;;  %v8478_v55 = vcombine.low %v3564_v30, %v3568_v31  ;;  %v8598_v1 = vcombine.low %v3684_v51, %v3688_v52 }
 0x369   :  { %v8886_v56 = vcombine.low %v10052_v50, %v10054_v35  ;;  %v3780_v30 = vld [vmem:[#allocation16 + $0x7c0] sm:$0xff] }
 0x36a   :  { %3465 = vmatpush2.bf16.msra.mxu0 %v8386_v59  ;;  %v8599_v59 = vcombine.high %v3684_v51, %v3688_v52  ;;  %v3784_v31 = vld [vmem:[#allocation16 + $0x7e0] sm:$0xff] }
 0x36b   :  { %3506 = vmatpush2.bf16.msra.mxu1 %v8388_v60  ;;  %6646 = vmatprep.subr.bf16.mxu0 %v8503_v61  ;;  %v3548_v60 = vld [vmem:[#allocation16 + $0x80] sm:$0xff]  ;;  %v8695_v32 = vcombine.high %v3780_v30, %v3784_v31 }
 0x36c   :  { %6687 = vmatprep.subr.bf16.mxu1 %v8631_v62  ;;  %v3552_v61 = vld [vmem:[#allocation16 + $0xa0] sm:$0xff] }
 0x36d   :  { %3467 = vmatmul.mubr.bf16.vlgmr.msra.gmra.mxu0 %v9986_v54  ;;  %v9039_v10 = vpop.f32.mrf.mxu0  ;;  %v9061_v11 = vpop.f32.mrf.mxu1  ;;  %v3676_v62 = vld [vmem:[#allocation16 + $0x480] sm:$0xff]  ;;  %v8463_v4 = vcombine.high %v3548_v60, %v3552_v61  ;;  %v8462_v8 = vcombine.low %v3548_v60, %v3552_v61 }
 0x36e   :  { %3508 = vmatmul.mubr.bf16.vlgmr.msra.gmra.mxu1 %v9986_v54  ;;  %6647 = vmatpush1.bf16.msra.mxu0 %v8502_v53  ;;  %v8591_v53 = vcombine.high %v3676_v62, %v3680_v63  ;;  %v3640_v51 = vld [vmem:[#allocation16 + $0x360] sm:$0xff] }
 0x36f   :  { %v9040_v20 = vpop.f32.mrf.mxu0  ;;  %v9062_v22 = vpop.f32.mrf.mxu1  ;;  %6688 = vmatpush1.bf16.msra.mxu1 %v8630_v5  ;;  %6648 = vmatprep.subr.bf16.mxu0 %v8495_v33  ;;  %v3540_v5 = vld [vmem:[#allocation16 + $0x40] sm:$0xff] }
 0x370   :  { %v9041_v25 = vadd.f32 %v9040_v20, %v9039_v10  ;;  %v9063_v27 = vadd.f32 %v9062_v22, %v9061_v11  ;;  %6689 = vmatprep.subr.bf16.mxu1 %v8623_v6  ;;  %v3544_v33 = vld [vmem:[#allocation16 + $0x60] sm:$0xff]  ;;  %v8590_v10 = vcombine.low %v3676_v62, %v3680_v63 }
 0x371   :  { %v9042_v2 = vpop.f32.mrf.mxu0  ;;  %v9064_v3 = vpop.f32.mrf.mxu1  ;;  %v3668_v6 = vld [vmem:[#allocation16 + $0x440] sm:$0xff]  ;;  %v8455_v11 = vcombine.high %v3540_v5, %v3544_v33  ;;  %v8454_v22 = vcombine.low %v3540_v5, %v3544_v33 }
 0x372   :  { %v2389_v54 = vadd.f32 %v9041_v25, %v8253_v19  ;;  %6649 = vmatpush1.bf16.msra.mxu0 %v8494_v13  ;;  %v8583_v12 = vcombine.high %v3668_v6, %v3672_v7  ;;  %v3536_v13 = vld [vmem:[#allocation16 + $0x20] sm:$0xff] }
 0x373   :  { %v9043_v37 = vpop.f32.mrf.mxu0  ;;  %v9065_v38 = vpop.f32.mrf.mxu1  ;;  %6690 = vmatpush1.bf16.msra.mxu1 %v8622_v23  ;;  %6650 = vmatprep.subr.bf16.mxu0 %v8487_v24  ;;  %v3660_v19 = vld [vmem:[#allocation16 + $0x400] sm:$0xff]  ;;  %v8582_v23 = vcombine.low %v3668_v6, %v3672_v7  ;;  %v8447_v24 = vcombine.high %v3532_v9, %v3536_v13  ;;  %v8446_v2 = vcombine.low %v3532_v9, %v3536_v13 }
 0x374   :  { %v10046_v46 = vadd.f32 %v9063_v27, %v2389_v54  ;;  %6691 = vmatprep.subr.bf16.mxu1 %v8615_v28  ;;  %v3664_v20 = vld [vmem:[#allocation16 + $0x420] sm:$0xff] }
 0x375   :  { %v8575_v25 = vcombine.high %v3660_v19, %v3664_v20  ;;  %v3652_v27 = vld [vmem:[#allocation16 + $0x3c0] sm:$0xff]  ;;  %v8574_v3 = vcombine.low %v3660_v19, %v3664_v20 }
 0x376   :  { %6651 = vmatpush1.bf16.msra.mxu0 %v8486_v36  ;;  %v3656_v28 = vld [vmem:[#allocation16 + $0x3e0] sm:$0xff] }
 0x377   :  { %6692 = vmatpush1.bf16.msra.mxu1 %v8614_v39  ;;  %6652 = vmatprep.subr.bf16.mxu0 %v8479_v40  ;;  %v8567_v14 = vcombine.high %v3652_v27, %v3656_v28  ;;  %v3644_v54 = vld [vmem:[#allocation16 + $0x380] sm:$0xff]  ;;  %v8566_v39 = vcombine.low %v3652_v27, %v3656_v28  ;;  %v8694_v40 = vcombine.low %v3780_v30, %v3784_v31 }
 0x378   :  { %6693 = vmatprep.subr.bf16.mxu1 %v8607_v47  ;;  %v3648_v36 = vld [vmem:[#allocation16 + $0x3a0] sm:$0xff] }
 0x379   :  { %v3772_v37 = vld [vmem:[#allocation16 + $0x780] sm:$0xff]  ;;  %v8559_v41 = vcombine.high %v3644_v54, %v3648_v36 }
 0x37a   :  { %6653 = vmatpush1.bf16.msra.mxu0 %v8478_v55  ;;  %v3776_v38 = vld [vmem:[#allocation16 + $0x7a0] sm:$0xff] }
 0x37b   :  { %6694 = vmatpush1.bf16.msra.mxu1 %v8606_v57  ;;  %6654 = vmatprep.subr.bf16.mxu0 %v8471_v58  ;;  %v8687_v29 = vcombine.high %v3772_v37, %v3776_v38  ;;  %v3636_v47 = vld [vmem:[#allocation16 + $0x340] sm:$0xff]  ;;  %v8558_v57 = vcombine.low %v3644_v54, %v3648_v36  ;;  %v8686_v58 = vcombine.low %v3772_v37, %v3776_v38 }
 0x37c   :  { %6695 = vmatprep.subr.bf16.mxu1 %v8599_v59  ;;  %v3764_v52 = vld [vmem:[#allocation16 + $0x740] sm:$0xff]  ;;  %v8551_v59 = vcombine.high %v3636_v47, %v3640_v51 }
 0x37d   :  { %v3768_v55 = vld [vmem:[#allocation16 + $0x760] sm:$0xff] }
 0x37e   :  { %6655 = vmatpush1.bf16.msra.mxu0 %v8470_v0  ;;  %v8679_v60 = vcombine.high %v3764_v52, %v3768_v55  ;;  %v3628_v61 = vld [vmem:[#allocation16 + $0x300] sm:$0xff] }
 0x37f   :  { %6696 = vmatpush1.bf16.msra.mxu1 %v8598_v1  ;;  %6656 = vmatprep.subr.bf16.mxu0 %v8463_v4  ;;  %v3632_v62 = vld [vmem:[#allocation16 + $0x320] sm:$0xff]  ;;  %v8550_v1 = vcombine.low %v3636_v47, %v3640_v51  ;;  %v8678_v4 = vcombine.low %v3764_v52, %v3768_v55  ;;  %v8759_v55 = vcombine.high %v10048_v48, %v10050_v49 }
 0x380   :  { %6697 = vmatprep.subr.bf16.mxu1 %v8591_v53  ;;  %v3756_v63 = vld [vmem:[#allocation16 + $0x700] sm:$0xff]  ;;  %v8543_v53 = vcombine.high %v3628_v61, %v3632_v62 }
 0x381   :  { %v3760_v0 = vld [vmem:[#allocation16 + $0x720] sm:$0xff] }
 0x382   :  { %6657 = vmatpush1.bf16.msra.mxu0 %v8462_v8  ;;  %v8671_v5 = vcombine.high %v3756_v63, %v3760_v0  ;;  %v3620_v33 = vld [vmem:[#allocation16 + $0x2c0] sm:$0xff] }
 0x383   :  { %6698 = vmatpush1.bf16.msra.mxu1 %v8590_v10  ;;  %6658 = vmatprep.subr.bf16.mxu0 %v8455_v11  ;;  %v3624_v6 = vld [vmem:[#allocation16 + $0x2e0] sm:$0xff]  ;;  %v8542_v10 = vcombine.low %v3628_v61, %v3632_v62  ;;  %v8670_v11 = vcombine.low %v3756_v63, %v3760_v0 }
 0x384   :  { %6699 = vmatprep.subr.bf16.mxu1 %v8583_v12  ;;  %v3748_v7 = vld [vmem:[#allocation16 + $0x6c0] sm:$0xff]  ;;  %v8535_v12 = vcombine.high %v3620_v33, %v3624_v6 }
 0x385   :  { %v3752_v8 = vld [vmem:[#allocation16 + $0x6e0] sm:$0xff] }
 0x386   :  { %6659 = vmatpush1.bf16.msra.mxu0 %v8454_v22  ;;  %v8663_v9 = vcombine.high %v3748_v7, %v3752_v8  ;;  %v3612_v13 = vld [vmem:[#allocation16 + $0x280] sm:$0xff] }
 0x387   :  { %6700 = vmatpush1.bf16.msra.mxu1 %v8582_v23  ;;  %6660 = vmatprep.subr.bf16.mxu0 %v8447_v24  ;;  %v3616_v19 = vld [vmem:[#allocation16 + $0x2a0] sm:$0xff]  ;;  %v8534_v23 = vcombine.low %v3620_v33, %v3624_v6  ;;  %v8662_v24 = vcombine.low %v3748_v7, %v3752_v8  ;;  %v10067_v6 = vld [vmem:[#allocation14] sm:$0xff] }
 0x388   :  { %6701 = vmatprep.subr.bf16.mxu1 %v8575_v25  ;;  %v3740_v20 = vld [vmem:[#allocation16 + $0x680] sm:$0xff]  ;;  %v8527_v25 = vcombine.high %v3612_v13, %v3616_v19  ;;  %v2675_v7 = vrot.slane %v10067_v6, %v9923_v16  ;;  %v2683_v8 = vrot.slane %v10067_v6, %v10003_v17 }
 0x389   :  { %v3744_v22 = vld [vmem:[#allocation16 + $0x6a0] sm:$0xff] }
 0x38a   :  { %6661 = vmatpush1.bf16.msra.mxu0 %v8446_v2  ;;  %v8655_v27 = vcombine.high %v3740_v20, %v3744_v22  ;;  %v3604_v28 = vld [vmem:[#allocation16 + $0x240] sm:$0xff] }
 0x38b   :  { %6702 = vmatpush1.bf16.msra.mxu1 %v8574_v3  ;;  %6662 = vmatprep.subr.bf16.mxu0 %v8567_v14  ;;  %v3608_v30 = vld [vmem:[#allocation16 + $0x260] sm:$0xff]  ;;  %v8526_v3 = vcombine.low %v3612_v13, %v3616_v19  ;;  %v8654_v14 = vcombine.low %v3740_v20, %v3744_v22 }
 0x38c   :  { %6703 = vmatprep.subr.bf16.mxu1 %v8695_v32  ;;  %v3732_v31 = vld [vmem:[#allocation16 + $0x640] sm:$0xff]  ;;  %v8519_v32 = vcombine.high %v3604_v28, %v3608_v30 }
 0x38d   :  { %v3736_v2 = vld [vmem:[#allocation16 + $0x660] sm:$0xff] }
 0x38e   :  { %6663 = vmatpush2.bf16.msra.mxu0 %v8566_v39  ;;  %v8647_v54 = vcombine.high %v3732_v31, %v3736_v2  ;;  %v3596_v36 = vld [vmem:[#allocation16 + $0x200] sm:$0xff] }
 0x38f   :  { %6704 = vmatpush2.bf16.msra.mxu1 %v8694_v40  ;;  %6664 = vmatprep.subr.bf16.mxu0 %v8559_v41  ;;  %v3600_v37 = vld [vmem:[#allocation16 + $0x220] sm:$0xff]  ;;  %v8518_v40 = vcombine.low %v3604_v28, %v3608_v30  ;;  %v8646_v41 = vcombine.low %v3732_v31, %v3736_v2 }
 0x390   :  { %6705 = vmatprep.subr.bf16.mxu1 %v8687_v29  ;;  %v3724_v38 = vld [vmem:[#allocation16 + $0x600] sm:$0xff]  ;;  %v8511_v29 = vcombine.high %v3596_v36, %v3600_v37  ;;  %v8510_v51 = vcombine.low %v3596_v36, %v3600_v37 }
 0x391   :  { %v3728_v39 = vld [vmem:[#allocation16 + $0x620] sm:$0xff] }
 0x392   :  { %6665 = vmatpush2.bf16.msra.mxu0 %v8558_v57  ;;  %v8639_v47 = vcombine.high %v3724_v38, %v3728_v39  ;;  %v8638_v52 = vcombine.low %v3724_v38, %v3728_v39  ;;  %v8887_v57 = vcombine.high %v10052_v50, %v10054_v35  ;;  %v3836_v30 = vld [vmem:[#allocation16 + $0x980] sm:$0xff] }
 0x393   :  { %6706 = vmatpush2.bf16.msra.mxu1 %v8686_v58  ;;  %6666 = vmatprep.subr.bf16.mxu0 %v8551_v59  ;;  %v3812_v50 = vld [vmem:[#allocation16 + $0x8c0] sm:$0xff] }
 0x394   :  { %6707 = vmatprep.subr.bf16.mxu1 %v8679_v60  ;;  %v3816_v35 = vld [vmem:[#allocation16 + $0x8e0] sm:$0xff] }
 0x396   :  { %6667 = vmatpush2.bf16.msra.mxu0 %v8550_v1 }
 0x397   :  { %6708 = vmatpush2.bf16.msra.mxu1 %v8678_v4  ;;  %6668 = vmatprep.subr.bf16.mxu0 %v8543_v53 }
 0x398   :  { %6709 = vmatprep.subr.bf16.mxu1 %v8671_v5 }
 0x39a   :  { %6669 = vmatpush2.bf16.msra.mxu0 %v8542_v10  ;;  %v2679_v10 = vrot.slane %v10067_v6, %v9927_v18 }
 0x39b   :  { %6710 = vmatpush2.bf16.msra.mxu1 %v8670_v11  ;;  %6670 = vmatprep.subr.bf16.mxu0 %v8535_v12  ;;  %v2687_v11 = vrot.slane %v10067_v6, %v10008_v34 }
 0x39c   :  { %6711 = vmatprep.subr.bf16.mxu1 %v8663_v9 }
 0x39e   :  { %6671 = vmatpush2.bf16.msra.mxu0 %v8534_v23 }
 0x39f   :  { %6712 = vmatpush2.bf16.msra.mxu1 %v8662_v24  ;;  %6672 = vmatprep.subr.bf16.mxu0 %v8527_v25 }
 0x3a0   :  { %6713 = vmatprep.subr.bf16.mxu1 %v8655_v27 }
 0x3a2   :  { %6673 = vmatpush2.bf16.msra.mxu0 %v8526_v3  ;;  %v3840_v3 = vld [vmem:[#allocation16 + $0x9a0] sm:$0xff] }
 0x3a3   :  { %6714 = vmatpush2.bf16.msra.mxu1 %v8654_v14  ;;  %6674 = vmatprep.subr.bf16.mxu0 %v8519_v32  ;;  %v3964_v14 = vld [vmem:[#allocation16 + $0xd80] sm:$0xff] }
 0x3a4   :  { %6715 = vmatprep.subr.bf16.mxu1 %v8647_v54  ;;  %v3968_v32 = vld [vmem:[#allocation16 + $0xda0] sm:$0xff] }
 0x3a6   :  { %6675 = vmatpush2.bf16.msra.mxu0 %v8518_v40 }
 0x3a7   :  { %6716 = vmatpush2.bf16.msra.mxu1 %v8646_v41  ;;  %6676 = vmatprep.subr.bf16.mxu0 %v8511_v29  ;;  %v8751_v41 = vcombine.high %v3836_v30, %v3840_v3  ;;  %v8879_v29 = vcombine.high %v3964_v14, %v3968_v32 }
 0x3a8   :  { %6717 = vmatprep.subr.bf16.mxu1 %v8639_v47  ;;  %v3828_v47 = vld [vmem:[#allocation16 + $0x940] sm:$0xff] }
 0x3aa   :  { %6677 = vmatpush2.bf16.msra.mxu0 %v8510_v51  ;;  %v3832_v51 = vld [vmem:[#allocation16 + $0x960] sm:$0xff] }
 0x3ab   :  { %6718 = vmatpush2.bf16.msra.mxu1 %v8638_v52  ;;  %6728 = vmatprep.subr.bf16.mxu0 %v8759_v55  ;;  %v3956_v52 = vld [vmem:[#allocation16 + $0xd40] sm:$0xff] }
 0x3ac   :  { %6769 = vmatprep.subr.bf16.mxu1 %v8887_v57  ;;  %v3960_v55 = vld [vmem:[#allocation16 + $0xd60] sm:$0xff]  ;;  %v8750_v57 = vcombine.low %v3836_v30, %v3840_v3 }
 0x3ad   :  { %v9083_v58 = vpop.f32.mrf.mxu0  ;;  %v9105_v59 = vpop.f32.mrf.mxu1  ;;  %v3792_v3 = vld [vmem:[#allocation16 + $0x820] sm:$0xff] }
 0x3af   :  { %v9084_v60 = vpop.f32.mrf.mxu0  ;;  %v9106_v61 = vpop.f32.mrf.mxu1 }
 0x3b0   :  { %v9085_v62 = vadd.f32 %v9084_v60, %v9083_v58  ;;  %v9107_v63 = vadd.f32 %v9106_v61, %v9105_v59  ;;  %v8878_v58 = vcombine.low %v3964_v14, %v3968_v32  ;;  %v8743_v59 = vcombine.high %v3828_v47, %v3832_v51  ;;  %v3820_v61 = vld [vmem:[#allocation16 + $0x900] sm:$0xff] }
 0x3b1   :  { %v9086_v0 = vpop.f32.mrf.mxu0  ;;  %v9108_v1 = vpop.f32.mrf.mxu1  ;;  %v8871_v60 = vcombine.high %v3956_v52, %v3960_v55  ;;  %v3916_v14 = vld [vmem:[#allocation16 + $0xc00] sm:$0xff] }
 0x3b2   :  { %v2469_v4 = vadd.f32 %v9085_v62, %v10046_v46  ;;  %v3824_v62 = vld [vmem:[#allocation16 + $0x920] sm:$0xff]  ;;  %v8742_v1 = vcombine.low %v3828_v47, %v3832_v51 }
 0x3b3   :  { %v9087_v53 = vpop.f32.mrf.mxu0  ;;  %v9109_v5 = vpop.f32.mrf.mxu1  ;;  %v3952_v0 = vld [vmem:[#allocation16 + $0xd20] sm:$0xff]  ;;  %v8735_v48 = vcombine.high %v3820_v61, %v3824_v62 }
 0x3b4   :  { %v10065_v33 = vadd.f32 %v9107_v63, %v2469_v4  ;;  %v3948_v63 = vld [vmem:[#allocation16 + $0xd00] sm:$0xff]  ;;  %v8870_v4 = vcombine.low %v3956_v52, %v3960_v55  ;;  %v8734_v53 = vcombine.low %v3820_v61, %v3824_v62 }
 0x3b5   :  { %v8863_v49 = vcombine.high %v3948_v63, %v3952_v0  ;;  %v8862_v5 = vcombine.low %v3948_v63, %v3952_v0  ;;  %v3920_v32 = vld [vmem:[#allocation16 + $0xc20] sm:$0xff] }
 0x3b6   :  { %v3908_v47 = vld [vmem:[#allocation16 + $0xbc0] sm:$0xff] }
 0x3b7   :  { %v3912_v51 = vld [vmem:[#allocation16 + $0xbe0] sm:$0xff] }
 0x3b8   :  { %v4036_v52 = vld [vmem:[#allocation16 + $0xfc0] sm:$0xff] }
 0x3b9   :  { %v4040_v55 = vld [vmem:[#allocation16 + $0xfe0] sm:$0xff] }
 0x3ba   :  { %v3900_v61 = vld [vmem:[#allocation16 + $0xb80] sm:$0xff] }
 0x3bb   :  { %v3904_v62 = vld [vmem:[#allocation16 + $0xba0] sm:$0xff] }
 0x3bc   :  { %v4028_v63 = vld [vmem:[#allocation16 + $0xf80] sm:$0xff] }
 0x3bd   :  { %v4032_v0 = vld [vmem:[#allocation16 + $0xfa0] sm:$0xff] }
 0x3ed   :  { %v3386_v12 = vpop.f32.mrf.mxu0  ;;  %v3427_v46 = vpop.f32.mrf.mxu1 }
 0x3ee   :  { %v3387_v9 = vadd.f32 %v3386_v12, %v2675_v7  ;;  %v3428_v13 = vadd.f32 %v3427_v46, %v2683_v8  ;;  %v8727_v7 = vcombine.high %v3812_v50, %v3816_v35  ;;  %v3932_v12 = vld [vmem:[#allocation16 + $0xc80] sm:$0xff] }
 0x3ef   :  { %v3388_v19 = vpop.f32.mrf.mxu0  ;;  %v3429_v20 = vpop.f32.mrf.mxu1  ;;  %v3936_v46 = vld [vmem:[#allocation16 + $0xca0] sm:$0xff] }
 0x3f0   :  { %v3389_v22 = vadd.f32 %v3388_v19, %v2679_v10  ;;  %v3430_v23 = vadd.f32 %v3429_v20, %v2687_v11  ;;  %v3516_v24 = vmax.f32 %v3387_v9, 0.0  ;;  %v3518_v25 = vmax.f32 %v3428_v13, 0.0  ;;  %v3804_v10 = vld [vmem:[#allocation16 + $0x880] sm:$0xff] }
 0x3f1   :  { %v3390_v27 = vpop.f32.mrf.mxu0  ;;  %v3431_v28 = vpop.f32.mrf.mxu1  ;;  %v3808_v11 = vld [vmem:[#allocation16 + $0x8a0] sm:$0xff]  ;;  %v8726_v9 = vcombine.low %v3812_v50, %v3816_v35  ;;  %v8847_v20 = vcombine.high %v3932_v12, %v3936_v46 }
 0x3f2   :  { %v3517_v31 = vmax.f32 %v3389_v22, 0.0  ;;  %v3519_v2 = vmax.f32 %v3430_v23, 0.0  ;;  %v10081_v39 = vpack.c.bf16 %v3516_v24, %v3516_v24  ;;  %v10083_v40 = vpack.c.bf16 %v3518_v25, %v3518_v25  ;;  %v3796_v22 = vld [vmem:[#allocation16 + $0x840] sm:$0xff] }
 0x3f3   :  { %v3391_v54 = vpop.f32.mrf.mxu0  ;;  %v3432_v36 = vpop.f32.mrf.mxu1  ;;  %v8719_v19 = vcombine.high %v3804_v10, %v3808_v11  ;;  %v3800_v23 = vld [vmem:[#allocation16 + $0x860] sm:$0xff]  ;;  %v8718_v27 = vcombine.low %v3804_v10, %v3808_v11  ;;  %v8846_v28 = vcombine.low %v3932_v12, %v3936_v46 }
 0x3f4   :  { %v10077_v37 = vpack.c.bf16 %v3517_v31, %v3517_v31  ;;  %v10079_v38 = vpack.c.bf16 %v3519_v2, %v3519_v2  ;;  %v3924_v24 = vld [vmem:[#allocation16 + $0xc40] sm:$0xff]  ;;  %v8711_v30 = vcombine.high %v3796_v22, %v3800_v23  ;;  %v8710_v54 = vcombine.low %v3796_v22, %v3800_v23 }
 0x3f5   :  { %v3928_v25 = vld [vmem:[#allocation16 + $0xc60] sm:$0xff] }
 0x3f6   :  { %6678 = vmatprep.mubr.bf16.mxu0 %v10077_v37  ;;  %6719 = vmatprep.mubr.bf16.mxu1 %v10079_v38  ;;  %v8839_v31 = vcombine.high %v3924_v24, %v3928_v25  ;;  %v3788_v2 = vld [vmem:[#allocation16 + $0x800] sm:$0xff]  ;;  %v8838_v36 = vcombine.low %v3924_v24, %v3928_v25 }
 0x3f7   :  { %6679 = vmatmul.mubr.bf16.vlgmr.msra.gmra.mxu0 %v10081_v39  ;;  %6720 = vmatmul.mubr.bf16.vlgmr.msra.gmra.mxu1 %v10083_v40  ;;  %v3892_v50 = vld [vmem:[#allocation16 + $0xb40] sm:$0xff] }
 0x3f8   :  { %6729 = vmatpush1.bf16.msra.mxu0 %v8758_v15  ;;  %6770 = vmatpush1.bf16.msra.mxu1 %v8886_v56  ;;  %v3940_v15 = vld [vmem:[#allocation16 + $0xcc0] sm:$0xff] }
 0x3f9   :  { %6730 = vmatprep.subr.bf16.mxu0 %v8751_v41  ;;  %6771 = vmatprep.subr.bf16.mxu1 %v8879_v29  ;;  %v3944_v56 = vld [vmem:[#allocation16 + $0xce0] sm:$0xff]  ;;  %v8703_v41 = vcombine.high %v3788_v2, %v3792_v3  ;;  %v8831_v29 = vcombine.high %v3916_v14, %v3920_v32 }
 0x3fa   :  { %v8855_v8 = vcombine.high %v3940_v15, %v3944_v56  ;;  %v8854_v13 = vcombine.low %v3940_v15, %v3944_v56  ;;  %v3896_v35 = vld [vmem:[#allocation16 + $0xb60] sm:$0xff] }
 0x3fb   :  { %v4020_v15 = vld [vmem:[#allocation16 + $0xf40] sm:$0xff] }
 0x3fc   :  { %6731 = vmatpush1.bf16.msra.mxu0 %v8750_v57  ;;  %6772 = vmatpush1.bf16.msra.mxu1 %v8878_v58  ;;  %v8702_v57 = vcombine.low %v3788_v2, %v3792_v3  ;;  %v8830_v58 = vcombine.low %v3916_v14, %v3920_v32  ;;  %v4024_v56 = vld [vmem:[#allocation16 + $0xf60] sm:$0xff] }
 0x3fd   :  { %6732 = vmatprep.subr.bf16.mxu0 %v8743_v59  ;;  %6773 = vmatprep.subr.bf16.mxu1 %v8871_v60  ;;  %v8823_v59 = vcombine.high %v3908_v47, %v3912_v51  ;;  %v8951_v60 = vcombine.high %v4036_v52, %v4040_v55  ;;  %v3884_v10 = vld [vmem:[#allocation16 + $0xb00] sm:$0xff] }
 0x3fe   :  { %v3888_v11 = vld [vmem:[#allocation16 + $0xb20] sm:$0xff] }
 0x3ff   :  { %v4012_v12 = vld [vmem:[#allocation16 + $0xf00] sm:$0xff] }
 0x400   :  { %6733 = vmatpush1.bf16.msra.mxu0 %v8742_v1  ;;  %6774 = vmatpush1.bf16.msra.mxu1 %v8870_v4  ;;  %v8822_v1 = vcombine.low %v3908_v47, %v3912_v51  ;;  %v8950_v4 = vcombine.low %v4036_v52, %v4040_v55  ;;  %v4016_v46 = vld [vmem:[#allocation16 + $0xf20] sm:$0xff] }
 0x401   :  { %6734 = vmatprep.subr.bf16.mxu0 %v8735_v48  ;;  %6775 = vmatprep.subr.bf16.mxu1 %v8863_v49  ;;  %v8815_v48 = vcombine.high %v3900_v61, %v3904_v62  ;;  %v8943_v49 = vcombine.high %v4028_v63, %v4032_v0  ;;  %v3876_v22 = vld [vmem:[#allocation16 + $0xac0] sm:$0xff] }
 0x402   :  { %v3880_v23 = vld [vmem:[#allocation16 + $0xae0] sm:$0xff] }
 0x403   :  { %v4004_v24 = vld [vmem:[#allocation16 + $0xec0] sm:$0xff] }
 0x404   :  { %6735 = vmatpush1.bf16.msra.mxu0 %v8734_v53  ;;  %6776 = vmatpush1.bf16.msra.mxu1 %v8862_v5  ;;  %v8814_v53 = vcombine.low %v3900_v61, %v3904_v62  ;;  %v8942_v5 = vcombine.low %v4028_v63, %v4032_v0  ;;  %v4008_v25 = vld [vmem:[#allocation16 + $0xee0] sm:$0xff]  ;;  %v2691_v62 = vrot.slane %v10067_v6, %v10019_v42 }
 0x405   :  { %6736 = vmatprep.subr.bf16.mxu0 %v8727_v7  ;;  %6777 = vmatprep.subr.bf16.mxu1 %v8855_v8  ;;  %v8807_v7 = vcombine.high %v3892_v50, %v3896_v35  ;;  %v8935_v8 = vcombine.high %v4020_v15, %v4024_v56  ;;  %v3868_v2 = vld [vmem:[#allocation16 + $0xa80] sm:$0xff] }
 0x406   :  { %v3872_v3 = vld [vmem:[#allocation16 + $0xaa0] sm:$0xff] }
 0x407   :  { %v3996_v14 = vld [vmem:[#allocation16 + $0xe80] sm:$0xff] }
 0x408   :  { %6737 = vmatpush1.bf16.msra.mxu0 %v8726_v9  ;;  %6778 = vmatpush1.bf16.msra.mxu1 %v8854_v13  ;;  %v8806_v9 = vcombine.low %v3892_v50, %v3896_v35  ;;  %v8934_v13 = vcombine.low %v4020_v15, %v4024_v56  ;;  %v4000_v32 = vld [vmem:[#allocation16 + $0xea0] sm:$0xff]  ;;  %v2695_v50 = vrot.slane %v10067_v6, %v10025_v44 }
 0x409   :  { %6738 = vmatprep.subr.bf16.mxu0 %v8719_v19  ;;  %6779 = vmatprep.subr.bf16.mxu1 %v8847_v20  ;;  %v8799_v19 = vcombine.high %v3884_v10, %v3888_v11  ;;  %v8927_v20 = vcombine.high %v4012_v12, %v4016_v46  ;;  %v3860_v47 = vld [vmem:[#allocation16 + $0xa40] sm:$0xff]  ;;  %v2703_v15 = vrot.slane %v10067_v6, %v10028_v45 }
 0x40a   :  { %v3864_v51 = vld [vmem:[#allocation16 + $0xa60] sm:$0xff] }
 0x40b   :  { %v3988_v52 = vld [vmem:[#allocation16 + $0xe40] sm:$0xff] }
 0x40c   :  { %6739 = vmatpush1.bf16.msra.mxu0 %v8718_v27  ;;  %6780 = vmatpush1.bf16.msra.mxu1 %v8846_v28  ;;  %v8798_v27 = vcombine.low %v3884_v10, %v3888_v11  ;;  %v8926_v28 = vcombine.low %v4012_v12, %v4016_v46  ;;  %v3992_v55 = vld [vmem:[#allocation16 + $0xe60] sm:$0xff]  ;;  %v3593_v10 = vld [vmem:[#allocation16 + $0x1e8] sm:$0xff] }
 0x40d   :  { %6740 = vmatprep.subr.bf16.mxu0 %v8711_v30  ;;  %6781 = vmatprep.subr.bf16.mxu1 %v8839_v31  ;;  %v8791_v30 = vcombine.high %v3876_v22, %v3880_v23  ;;  %v8919_v31 = vcombine.high %v4004_v24, %v4008_v25  ;;  %v3852_v61 = vld [vmem:[#allocation16 + $0xa00] sm:$0xff]  ;;  %v3717_v11 = vld [vmem:[#allocation16 + $0x5c8] sm:$0xff] }
 0x40e   :  { %v3856_v63 = vld [vmem:[#allocation16 + $0xa20] sm:$0xff]  ;;  %v3721_v12 = vld [vmem:[#allocation16 + $0x5e8] sm:$0xff] }
 0x40f   :  { %v3980_v0 = vld [vmem:[#allocation16 + $0xe00] sm:$0xff]  ;;  %v8767_v56 = vcombine.high %v3852_v61, %v3856_v63 }
 0x410   :  { %6741 = vmatpush1.bf16.msra.mxu0 %v8710_v54  ;;  %6782 = vmatpush1.bf16.msra.mxu1 %v8838_v36  ;;  %v8790_v54 = vcombine.low %v3876_v22, %v3880_v23  ;;  %v8918_v36 = vcombine.low %v4004_v24, %v4008_v25 }
 0x411   :  { %6742 = vmatprep.subr.bf16.mxu0 %v8703_v41  ;;  %6783 = vmatprep.subr.bf16.mxu1 %v8831_v29  ;;  %v8783_v41 = vcombine.high %v3868_v2, %v3872_v3  ;;  %v8911_v29 = vcombine.high %v3996_v14, %v4000_v32 }
 0x414   :  { %6743 = vmatpush1.bf16.msra.mxu0 %v8702_v57  ;;  %6784 = vmatpush1.bf16.msra.mxu1 %v8830_v58  ;;  %v8782_v57 = vcombine.low %v3868_v2, %v3872_v3  ;;  %v8910_v58 = vcombine.low %v3996_v14, %v4000_v32  ;;  %v3581_v14 = vld [vmem:[#allocation16 + $0x188] sm:$0xff] }
 0x415   :  { %6744 = vmatprep.subr.bf16.mxu0 %v8823_v59  ;;  %6785 = vmatprep.subr.bf16.mxu1 %v8951_v60  ;;  %v8775_v59 = vcombine.high %v3860_v47, %v3864_v51  ;;  %v8903_v60 = vcombine.high %v3988_v52, %v3992_v55  ;;  %v3585_v32 = vld [vmem:[#allocation16 + $0x1a8] sm:$0xff] }
 0x418   :  { %6745 = vmatpush2.bf16.msra.mxu0 %v8822_v1  ;;  %6786 = vmatpush2.bf16.msra.mxu1 %v8950_v4  ;;  %v3984_v1 = vld [vmem:[#allocation16 + $0xe20] sm:$0xff]  ;;  %v2699_v4 = vrot.slane %v10067_v6, %v10022_v43 }
 0x419   :  { %6746 = vmatprep.subr.bf16.mxu0 %v8815_v48  ;;  %6787 = vmatprep.subr.bf16.mxu1 %v8943_v49  ;;  %v8774_v48 = vcombine.low %v3860_v47, %v3864_v51  ;;  %v8902_v49 = vcombine.low %v3988_v52, %v3992_v55  ;;  %v8894_v22 = vcombine.low %v3980_v0, %v3984_v1  ;;  %v3713_v47 = vld [vmem:[#allocation16 + $0x5a8] sm:$0xff] }
 0x41a   :  { %v8632_v55 = vcombine.low %v3717_v11, %v3721_v12 }
 0x41c   :  { %6747 = vmatpush2.bf16.msra.mxu0 %v8814_v53  ;;  %6788 = vmatpush2.bf16.msra.mxu1 %v8942_v5  ;;  %v8895_v53 = vcombine.high %v3980_v0, %v3984_v1  ;;  %v3589_v5 = vld [vmem:[#allocation16 + $0x1c8] sm:$0xff]  ;;  %v8496_v0 = vcombine.low %v3581_v14, %v3585_v32 }
 0x41d   :  { %6748 = vmatprep.subr.bf16.mxu0 %v8807_v7  ;;  %6789 = vmatprep.subr.bf16.mxu1 %v8935_v8  ;;  %v8505_v6 = vcombine.high %v3589_v5, %v3593_v10 }
 0x420   :  { %6749 = vmatpush2.bf16.msra.mxu0 %v8806_v9  ;;  %6790 = vmatpush2.bf16.msra.mxu1 %v8934_v13 }
 0x421   :  { %6750 = vmatprep.subr.bf16.mxu0 %v8799_v19  ;;  %6791 = vmatprep.subr.bf16.mxu1 %v8927_v20  ;;  %v8766_v20 = vcombine.low %v3852_v61, %v3856_v63  ;;  %v3705_v63 = vld [vmem:[#allocation16 + $0x568] sm:$0xff] }
 0x424   :  { %6751 = vmatpush2.bf16.msra.mxu0 %v8798_v27  ;;  %6792 = vmatpush2.bf16.msra.mxu1 %v8926_v28  ;;  %v8633_v27 = vcombine.high %v3717_v11, %v3721_v12  ;;  %v3685_v11 = vld [vmem:[#allocation16 + $0x4c8] sm:$0xff] }
 0x425   :  { %6752 = vmatprep.subr.bf16.mxu0 %v8791_v30  ;;  %6793 = vmatprep.subr.bf16.mxu1 %v8919_v31  ;;  %v3689_v12 = vld [vmem:[#allocation16 + $0x4e8] sm:$0xff] }
 0x428   :  { %6753 = vmatpush2.bf16.msra.mxu0 %v8790_v54  ;;  %6794 = vmatpush2.bf16.msra.mxu1 %v8918_v36 }
 0x429   :  { %6754 = vmatprep.subr.bf16.mxu0 %v8783_v41  ;;  %6795 = vmatprep.subr.bf16.mxu1 %v8911_v29  ;;  %v8504_v41 = vcombine.low %v3589_v5, %v3593_v10  ;;  %v3709_v29 = vld [vmem:[#allocation16 + $0x588] sm:$0xff] }
 0x42a   :  { %v8625_v61 = vcombine.high %v3709_v29, %v3713_v47  ;;  %v8624_v1 = vcombine.low %v3709_v29, %v3713_v47  ;;  %v3561_v10 = vld [vmem:[#allocation16 + $0xe8] sm:$0xff] }
 0x42b   :  { %v3533_v29 = vld [vmem:[#allocation16 + $0x8] sm:$0xff] }
 0x42c   :  { %6755 = vmatpush2.bf16.msra.mxu0 %v8782_v57  ;;  %6796 = vmatpush2.bf16.msra.mxu1 %v8910_v58  ;;  %v8497_v58 = vcombine.high %v3581_v14, %v3585_v32  ;;  %v3537_v47 = vld [vmem:[#allocation16 + $0x28] sm:$0xff] }
 0x42d   :  { %v3468_v35 = vpop.f32.mrf.mxu0  ;;  %6756 = vmatprep.subr.bf16.mxu0 %v8775_v59  ;;  %6797 = vmatprep.subr.bf16.mxu1 %v8903_v60  ;;  %v3573_v59 = vld [vmem:[#allocation16 + $0x148] sm:$0xff] }
 0x42e   :  { %v3469_v7 = vadd.f32 %v3468_v35, %v2691_v62  ;;  %v3509_v8 = vpop.f32.mrf.mxu1  ;;  %v3577_v60 = vld [vmem:[#allocation16 + $0x168] sm:$0xff] }
 0x42f   :  { %v3510_v46 = vadd.f32 %v3509_v8, %v2699_v4  ;;  %v3470_v9 = vpop.f32.mrf.mxu0  ;;  %v3701_v62 = vld [vmem:[#allocation16 + $0x548] sm:$0xff]  ;;  %v8489_v4 = vcombine.high %v3573_v59, %v3577_v60 }
 0x430   :  { %v3471_v13 = vadd.f32 %v3470_v9, %v2695_v50  ;;  %v3511_v19 = vpop.f32.mrf.mxu1  ;;  %6757 = vmatpush2.bf16.msra.mxu0 %v8774_v48  ;;  %6798 = vmatpush2.bf16.msra.mxu1 %v8902_v49  ;;  %v3520_v23 = vmax.f32 %v3469_v7, 0.0  ;;  %v8617_v48 = vcombine.high %v3701_v62, %v3705_v63  ;;  %v3565_v49 = vld [vmem:[#allocation16 + $0x108] sm:$0xff] }
 0x431   :  { %v3512_v24 = vadd.f32 %v3511_v19, %v2703_v15  ;;  %v3472_v25 = vpop.f32.mrf.mxu0  ;;  %6758 = vmatprep.subr.bf16.mxu0 %v8767_v56  ;;  %6799 = vmatprep.subr.bf16.mxu1 %v8895_v53  ;;  %v3522_v28 = vmax.f32 %v3510_v46, 0.0  ;;  %v3569_v50 = vld [vmem:[#allocation16 + $0x128] sm:$0xff]  ;;  %v8488_v56 = vcombine.low %v3573_v59, %v3577_v60  ;;  %v8616_v53 = vcombine.low %v3701_v62, %v3705_v63 }
 0x432   :  { %v3521_v30 = vmax.f32 %v3471_v13, 0.0  ;;  %v3513_v31 = vpop.f32.mrf.mxu1  ;;  %v10105_v51 = vpack.c.bf16 %v3520_v23, %v3520_v23  ;;  %v3693_v35 = vld [vmem:[#allocation16 + $0x508] sm:$0xff]  ;;  %v8481_v5 = vcombine.high %v3565_v49, %v3569_v50  ;;  %v8480_v46 = vcombine.low %v3565_v49, %v3569_v50 }
 0x433   :  { %v3523_v2 = vmax.f32 %v3512_v24, 0.0  ;;  %v3473_v3 = vpop.f32.mrf.mxu0  ;;  %v10109_v57 = vpack.c.bf16 %v3522_v28, %v3522_v28  ;;  %v3697_v15 = vld [vmem:[#allocation16 + $0x528] sm:$0xff]  ;;  %v8601_v19 = vcombine.high %v3685_v11, %v3689_v12 }
 0x434   :  { %v10103_v54 = vpack.c.bf16 %v3521_v30, %v3521_v30  ;;  %v3514_v36 = vpop.f32.mrf.mxu1  ;;  %6759 = vmatpush2.bf16.msra.mxu0 %v8766_v20  ;;  %6800 = vmatpush2.bf16.msra.mxu1 %v8894_v22  ;;  %v8609_v7 = vcombine.high %v3693_v35, %v3697_v15  ;;  %v3557_v8 = vld [vmem:[#allocation16 + $0xc8] sm:$0xff]  ;;  %v8608_v9 = vcombine.low %v3693_v35, %v3697_v15 }
 0x435   :  { %v10107_v52 = vpack.c.bf16 %v3523_v2, %v3523_v2  ;;  %6810 = vmatprep.subr.bf16.mxu0 %v8505_v6  ;;  %6851 = vmatprep.subr.bf16.mxu1 %v8633_v27  ;;  %v8473_v13 = vcombine.high %v3557_v8, %v3561_v10  ;;  %v3549_v20 = vld [vmem:[#allocation16 + $0x88] sm:$0xff]  ;;  %v8472_v25 = vcombine.low %v3557_v8, %v3561_v10 }
 0x436   :  { %6760 = vmatprep.mubr.bf16.mxu0 %v10103_v54  ;;  %v3553_v22 = vld [vmem:[#allocation16 + $0xa8] sm:$0xff]  ;;  %v8600_v6 = vcombine.low %v3685_v11, %v3689_v12 }
 0x437   :  { %6801 = vmatprep.mubr.bf16.mxu1 %v10107_v52  ;;  %6761 = vmatmul.mubr.bf16.vlgmr.msra.gmra.mxu0 %v10105_v51  ;;  %v3677_v23 = vld [vmem:[#allocation16 + $0x488] sm:$0xff]  ;;  %v8465_v27 = vcombine.high %v3549_v20, %v3553_v22  ;;  %v8464_v14 = vcombine.low %v3549_v20, %v3553_v22 }
 0x438   :  { %6802 = vmatmul.mubr.bf16.vlgmr.msra.gmra.mxu1 %v10109_v57  ;;  %6811 = vmatpush1.bf16.msra.mxu0 %v8504_v41  ;;  %v3681_v24 = vld [vmem:[#allocation16 + $0x4a8] sm:$0xff] }
 0x439   :  { %6852 = vmatpush1.bf16.msra.mxu1 %v8632_v55  ;;  %6842 = vmatprep.mubr.bf16.mxu0 %v10077_v37  ;;  %v8593_v28 = vcombine.high %v3677_v23, %v3681_v24  ;;  %v3541_v30 = vld [vmem:[#allocation16 + $0x48] sm:$0xff]  ;;  %v8592_v32 = vcombine.low %v3677_v23, %v3681_v24 }
 0x43a   :  { %6883 = vmatprep.mubr.bf16.mxu1 %v10079_v38  ;;  %6812 = vmatprep.subr.bf16.mxu0 %v8497_v58  ;;  %v3545_v31 = vld [vmem:[#allocation16 + $0x68] sm:$0xff] }
 0x43b   :  { %6853 = vmatprep.subr.bf16.mxu1 %v8625_v61  ;;  %v3669_v2 = vld [vmem:[#allocation16 + $0x448] sm:$0xff]  ;;  %v8457_v36 = vcombine.high %v3541_v30, %v3545_v31  ;;  %v8456_v59 = vcombine.low %v3541_v30, %v3545_v31  ;;  %v8449_v61 = vcombine.high %v3533_v29, %v3537_v47 }
 0x43c   :  { %6813 = vmatpush1.bf16.msra.mxu0 %v8496_v0  ;;  %v3673_v3 = vld [vmem:[#allocation16 + $0x468] sm:$0xff] }
 0x43d   :  { %6854 = vmatpush1.bf16.msra.mxu1 %v8624_v1  ;;  %6814 = vmatprep.subr.bf16.mxu0 %v8489_v4  ;;  %v8585_v41 = vcombine.high %v3669_v2, %v3673_v3  ;;  %v3661_v55 = vld [vmem:[#allocation16 + $0x408] sm:$0xff]  ;;  %v8584_v60 = vcombine.low %v3669_v2, %v3673_v3 }
 0x43e   :  { %6855 = vmatprep.subr.bf16.mxu1 %v8617_v48  ;;  %v3665_v58 = vld [vmem:[#allocation16 + $0x428] sm:$0xff]  ;;  %v8448_v48 = vcombine.low %v3533_v29, %v3537_v47 }
 0x43f   :  { %v8577_v62 = vcombine.high %v3661_v55, %v3665_v58  ;;  %v3653_v63 = vld [vmem:[#allocation16 + $0x3c8] sm:$0xff]  ;;  %v8576_v49 = vcombine.low %v3661_v55, %v3665_v58 }
 0x440   :  { %6815 = vmatpush1.bf16.msra.mxu0 %v8488_v56  ;;  %v3657_v0 = vld [vmem:[#allocation16 + $0x3e8] sm:$0xff] }
 0x441   :  { %6856 = vmatpush1.bf16.msra.mxu1 %v8616_v53  ;;  %6816 = vmatprep.subr.bf16.mxu0 %v8481_v5  ;;  %v3781_v1 = vld [vmem:[#allocation16 + $0x7c8] sm:$0xff]  ;;  %v8569_v50 = vcombine.high %v3653_v63, %v3657_v0 }
 0x442   :  { %6857 = vmatprep.subr.bf16.mxu1 %v8609_v7  ;;  %v3785_v4 = vld [vmem:[#allocation16 + $0x7e8] sm:$0xff]  ;;  %v8568_v7 = vcombine.low %v3653_v63, %v3657_v0 }
 0x443   :  { %v8697_v35 = vcombine.high %v3781_v1, %v3785_v4  ;;  %v3645_v15 = vld [vmem:[#allocation16 + $0x388] sm:$0xff]  ;;  %v8696_v8 = vcombine.low %v3781_v1, %v3785_v4 }
 0x444   :  { %6817 = vmatpush1.bf16.msra.mxu0 %v8480_v46  ;;  %v3649_v56 = vld [vmem:[#allocation16 + $0x3a8] sm:$0xff] }
 0x445   :  { %6858 = vmatpush1.bf16.msra.mxu1 %v8608_v9  ;;  %6818 = vmatprep.subr.bf16.mxu0 %v8473_v13  ;;  %v3773_v53 = vld [vmem:[#allocation16 + $0x788] sm:$0xff]  ;;  %v8561_v10 = vcombine.high %v3645_v15, %v3649_v56 }
 0x446   :  { %6859 = vmatprep.subr.bf16.mxu1 %v8601_v19  ;;  %v3777_v5 = vld [vmem:[#allocation16 + $0x7a8] sm:$0xff]  ;;  %v8560_v19 = vcombine.low %v3645_v15, %v3649_v56 }
 0x447   :  { %v8689_v11 = vcombine.high %v3773_v53, %v3777_v5  ;;  %v3637_v12 = vld [vmem:[#allocation16 + $0x348] sm:$0xff]  ;;  %v8688_v20 = vcombine.low %v3773_v53, %v3777_v5 }
 0x448   :  { %6819 = vmatpush1.bf16.msra.mxu0 %v8472_v25  ;;  %v3641_v46 = vld [vmem:[#allocation16 + $0x368] sm:$0xff] }
 0x449   :  { %6860 = vmatpush1.bf16.msra.mxu1 %v8600_v6  ;;  %6820 = vmatprep.subr.bf16.mxu0 %v8465_v27  ;;  %v3765_v9 = vld [vmem:[#allocation16 + $0x748] sm:$0xff]  ;;  %v8553_v22 = vcombine.high %v3637_v12, %v3641_v46 }
 0x44a   :  { %6861 = vmatprep.subr.bf16.mxu1 %v8593_v28  ;;  %v3769_v13 = vld [vmem:[#allocation16 + $0x768] sm:$0xff]  ;;  %v8552_v28 = vcombine.low %v3637_v12, %v3641_v46 }
 0x44b   :  { %v8681_v23 = vcombine.high %v3765_v9, %v3769_v13  ;;  %v3629_v24 = vld [vmem:[#allocation16 + $0x308] sm:$0xff]  ;;  %v8680_v30 = vcombine.low %v3765_v9, %v3769_v13 }
 0x44c   :  { %6821 = vmatpush1.bf16.msra.mxu0 %v8464_v14  ;;  %v3633_v25 = vld [vmem:[#allocation16 + $0x328] sm:$0xff] }
 0x44d   :  { %6862 = vmatpush1.bf16.msra.mxu1 %v8592_v32  ;;  %6822 = vmatprep.subr.bf16.mxu0 %v8457_v36  ;;  %v3757_v6 = vld [vmem:[#allocation16 + $0x708] sm:$0xff]  ;;  %v8545_v31 = vcombine.high %v3629_v24, %v3633_v25 }
 0x44e   :  { %6863 = vmatprep.subr.bf16.mxu1 %v8585_v41  ;;  %v3761_v27 = vld [vmem:[#allocation16 + $0x728] sm:$0xff]  ;;  %v8544_v41 = vcombine.low %v3629_v24, %v3633_v25 }
 0x44f   :  { %v8673_v2 = vcombine.high %v3757_v6, %v3761_v27  ;;  %v3621_v3 = vld [vmem:[#allocation16 + $0x2c8] sm:$0xff]  ;;  %v8672_v29 = vcombine.low %v3757_v6, %v3761_v27 }
 0x450   :  { %6823 = vmatpush1.bf16.msra.mxu0 %v8456_v59  ;;  %v3625_v14 = vld [vmem:[#allocation16 + $0x2e8] sm:$0xff] }
 0x451   :  { %6864 = vmatpush1.bf16.msra.mxu1 %v8584_v60  ;;  %6824 = vmatprep.subr.bf16.mxu0 %v8449_v61  ;;  %v3749_v32 = vld [vmem:[#allocation16 + $0x6c8] sm:$0xff]  ;;  %v8537_v47 = vcombine.high %v3621_v3, %v3625_v14 }
 0x452   :  { %6865 = vmatprep.subr.bf16.mxu1 %v8577_v62  ;;  %v3753_v36 = vld [vmem:[#allocation16 + $0x6e8] sm:$0xff]  ;;  %v8536_v62 = vcombine.low %v3621_v3, %v3625_v14 }
 0x453   :  { %v8665_v55 = vcombine.high %v3749_v32, %v3753_v36  ;;  %v3613_v58 = vld [vmem:[#allocation16 + $0x288] sm:$0xff]  ;;  %v8664_v63 = vcombine.low %v3749_v32, %v3753_v36 }
 0x454   :  { %6825 = vmatpush1.bf16.msra.mxu0 %v8448_v48  ;;  %v3617_v59 = vld [vmem:[#allocation16 + $0x2a8] sm:$0xff] }
 0x455   :  { %6866 = vmatpush1.bf16.msra.mxu1 %v8576_v49  ;;  %6826 = vmatprep.subr.bf16.mxu0 %v8569_v50  ;;  %v3741_v60 = vld [vmem:[#allocation16 + $0x688] sm:$0xff]  ;;  %v8529_v0 = vcombine.high %v3613_v58, %v3617_v59 }
 0x456   :  { %6867 = vmatprep.subr.bf16.mxu1 %v8697_v35  ;;  %v3745_v61 = vld [vmem:[#allocation16 + $0x6a8] sm:$0xff]  ;;  %v8528_v35 = vcombine.low %v3613_v58, %v3617_v59 }
 0x457   :  { %v8657_v1 = vcombine.high %v3741_v60, %v3745_v61  ;;  %v3605_v4 = vld [vmem:[#allocation16 + $0x248] sm:$0xff]  ;;  %v8656_v15 = vcombine.low %v3741_v60, %v3745_v61 }
 0x458   :  { %6827 = vmatpush2.bf16.msra.mxu0 %v8568_v7  ;;  %v3609_v48 = vld [vmem:[#allocation16 + $0x268] sm:$0xff] }
 0x459   :  { %6868 = vmatpush2.bf16.msra.mxu1 %v8696_v8  ;;  %6828 = vmatprep.subr.bf16.mxu0 %v8561_v10  ;;  %v3733_v49 = vld [vmem:[#allocation16 + $0x648] sm:$0xff]  ;;  %v8521_v56 = vcombine.high %v3605_v4, %v3609_v48 }
 0x45a   :  { %6869 = vmatprep.subr.bf16.mxu1 %v8689_v11  ;;  %v3737_v50 = vld [vmem:[#allocation16 + $0x668] sm:$0xff]  ;;  %v8520_v11 = vcombine.low %v3605_v4, %v3609_v48 }
 0x45b   :  { %v8649_v53 = vcombine.high %v3733_v49, %v3737_v50  ;;  %v3597_v5 = vld [vmem:[#allocation16 + $0x208] sm:$0xff]  ;;  %v8648_v12 = vcombine.low %v3733_v49, %v3737_v50 }
 0x45c   :  { %6829 = vmatpush2.bf16.msra.mxu0 %v8560_v19  ;;  %v3601_v7 = vld [vmem:[#allocation16 + $0x228] sm:$0xff] }
 0x45d   :  { %6870 = vmatpush2.bf16.msra.mxu1 %v8688_v20  ;;  %6830 = vmatprep.subr.bf16.mxu0 %v8553_v22  ;;  %v3725_v8 = vld [vmem:[#allocation16 + $0x608] sm:$0xff]  ;;  %v8513_v46 = vcombine.high %v3597_v5, %v3601_v7 }
 0x45e   :  { %6871 = vmatprep.subr.bf16.mxu1 %v8681_v23  ;;  %v3729_v10 = vld [vmem:[#allocation16 + $0x628] sm:$0xff]  ;;  %v8512_v23 = vcombine.low %v3597_v5, %v3601_v7 }
 0x45f   :  { %v8641_v9 = vcombine.high %v3725_v8, %v3729_v10  ;;  %v3845_v13 = vld [vmem:[#allocation16 + $0x9c8] sm:$0xff]  ;;  %v8640_v24 = vcombine.low %v3725_v8, %v3729_v10 }
 0x460   :  { %6831 = vmatpush2.bf16.msra.mxu0 %v8552_v28  ;;  %v3849_v19 = vld [vmem:[#allocation16 + $0x9e8] sm:$0xff] }
 0x461   :  { %6872 = vmatpush2.bf16.msra.mxu1 %v8680_v30  ;;  %6832 = vmatprep.subr.bf16.mxu0 %v8545_v31  ;;  %v3973_v20 = vld [vmem:[#allocation16 + $0xdc8] sm:$0xff]  ;;  %v8761_v25 = vcombine.high %v3845_v13, %v3849_v19  ;;  %v8760_v30 = vcombine.low %v3845_v13, %v3849_v19 }
 0x462   :  { %6873 = vmatprep.subr.bf16.mxu1 %v8673_v2  ;;  %v3977_v22 = vld [vmem:[#allocation16 + $0xde8] sm:$0xff] }
 0x463   :  { %v8889_v6 = vcombine.high %v3973_v20, %v3977_v22  ;;  %v3837_v27 = vld [vmem:[#allocation16 + $0x988] sm:$0xff]  ;;  %v8888_v3 = vcombine.low %v3973_v20, %v3977_v22 }
 0x464   :  { %6833 = vmatpush2.bf16.msra.mxu0 %v8544_v41  ;;  %v3841_v28 = vld [vmem:[#allocation16 + $0x9a8] sm:$0xff] }
 0x465   :  { %6874 = vmatpush2.bf16.msra.mxu1 %v8672_v29  ;;  %6834 = vmatprep.subr.bf16.mxu0 %v8537_v47  ;;  %v3965_v31 = vld [vmem:[#allocation16 + $0xd88] sm:$0xff]  ;;  %v8753_v14 = vcombine.high %v3837_v27, %v3841_v28 }
 0x466   :  { %6875 = vmatprep.subr.bf16.mxu1 %v8665_v55  ;;  %v3969_v2 = vld [vmem:[#allocation16 + $0xda8] sm:$0xff]  ;;  %v8752_v55 = vcombine.low %v3837_v27, %v3841_v28 }
 0x467   :  { %v3829_v32 = vld [vmem:[#allocation16 + $0x948] sm:$0xff]  ;;  %v8881_v41 = vcombine.high %v3965_v31, %v3969_v2  ;;  %v8880_v58 = vcombine.low %v3965_v31, %v3969_v2 }
 0x468   :  { %6835 = vmatpush2.bf16.msra.mxu0 %v8536_v62  ;;  %v3833_v36 = vld [vmem:[#allocation16 + $0x968] sm:$0xff] }
 0x469   :  { %6876 = vmatpush2.bf16.msra.mxu1 %v8664_v63  ;;  %6836 = vmatprep.subr.bf16.mxu0 %v8529_v0  ;;  %v3957_v29 = vld [vmem:[#allocation16 + $0xd48] sm:$0xff]  ;;  %v8745_v59 = vcombine.high %v3829_v32, %v3833_v36 }
 0x46a   :  { %6877 = vmatprep.subr.bf16.mxu1 %v8657_v1  ;;  %v3961_v47 = vld [vmem:[#allocation16 + $0xd68] sm:$0xff]  ;;  %v8744_v1 = vcombine.low %v3829_v32, %v3833_v36 }
 0x46b   :  { %v8873_v60 = vcombine.high %v3957_v29, %v3961_v47  ;;  %v3821_v61 = vld [vmem:[#allocation16 + $0x908] sm:$0xff]  ;;  %v8872_v4 = vcombine.low %v3957_v29, %v3961_v47 }
 0x46c   :  { %6837 = vmatpush2.bf16.msra.mxu0 %v8528_v35  ;;  %v3825_v62 = vld [vmem:[#allocation16 + $0x928] sm:$0xff] }
 0x46d   :  { %6878 = vmatpush2.bf16.msra.mxu1 %v8656_v15  ;;  %6838 = vmatprep.subr.bf16.mxu0 %v8521_v56  ;;  %v3949_v63 = vld [vmem:[#allocation16 + $0xd08] sm:$0xff]  ;;  %v8737_v48 = vcombine.high %v3821_v61, %v3825_v62 }
 0x46e   :  { %6879 = vmatprep.subr.bf16.mxu1 %v8649_v53  ;;  %v3953_v0 = vld [vmem:[#allocation16 + $0xd28] sm:$0xff]  ;;  %v8736_v53 = vcombine.low %v3821_v61, %v3825_v62 }
 0x46f   :  { %v8865_v49 = vcombine.high %v3949_v63, %v3953_v0  ;;  %v3813_v50 = vld [vmem:[#allocation16 + $0x8c8] sm:$0xff]  ;;  %v8864_v5 = vcombine.low %v3949_v63, %v3953_v0 }
 0x470   :  { %6839 = vmatpush2.bf16.msra.mxu0 %v8520_v11  ;;  %v3817_v35 = vld [vmem:[#allocation16 + $0x8e8] sm:$0xff] }
 0x471   :  { %6880 = vmatpush2.bf16.msra.mxu1 %v8648_v12  ;;  %6840 = vmatprep.subr.bf16.mxu0 %v8513_v46  ;;  %v3941_v15 = vld [vmem:[#allocation16 + $0xcc8] sm:$0xff]  ;;  %v8729_v7 = vcombine.high %v3813_v50, %v3817_v35 }
 0x472   :  { %6881 = vmatprep.subr.bf16.mxu1 %v8641_v9  ;;  %v3945_v56 = vld [vmem:[#allocation16 + $0xce8] sm:$0xff]  ;;  %v8728_v9 = vcombine.low %v3813_v50, %v3817_v35 }
 0x473   :  { %v8857_v8 = vcombine.high %v3941_v15, %v3945_v56  ;;  %v3805_v10 = vld [vmem:[#allocation16 + $0x888] sm:$0xff]  ;;  %v8856_v13 = vcombine.low %v3941_v15, %v3945_v56 }
 0x474   :  { %6841 = vmatpush2.bf16.msra.mxu0 %v8512_v23  ;;  %v3809_v11 = vld [vmem:[#allocation16 + $0x8a8] sm:$0xff] }
 0x475   :  { %6882 = vmatpush2.bf16.msra.mxu1 %v8640_v24  ;;  %6892 = vmatprep.subr.bf16.mxu0 %v8761_v25  ;;  %v3933_v12 = vld [vmem:[#allocation16 + $0xc88] sm:$0xff]  ;;  %v8721_v19 = vcombine.high %v3805_v10, %v3809_v11 }
 0x476   :  { %6933 = vmatprep.subr.bf16.mxu1 %v8889_v6  ;;  %v3937_v46 = vld [vmem:[#allocation16 + $0xca8] sm:$0xff]  ;;  %v8720_v6 = vcombine.low %v3805_v10, %v3809_v11 }
 0x477   :  { %6843 = vmatmul.mubr.bf16.vlgmr.msra.gmra.mxu0 %v10081_v39  ;;  %v8849_v20 = vcombine.high %v3933_v12, %v3937_v46  ;;  %v3797_v22 = vld [vmem:[#allocation16 + $0x848] sm:$0xff]  ;;  %v8848_v27 = vcombine.low %v3933_v12, %v3937_v46 }
 0x478   :  { %6884 = vmatmul.mubr.bf16.vlgmr.msra.gmra.mxu1 %v10083_v40  ;;  %6893 = vmatpush1.bf16.msra.mxu0 %v8760_v30  ;;  %v3801_v23 = vld [vmem:[#allocation16 + $0x868] sm:$0xff] }
 0x479   :  { %6924 = vmatprep.mubr.bf16.mxu0 %v10103_v54  ;;  %6934 = vmatpush1.bf16.msra.mxu1 %v8888_v3  ;;  %v3925_v24 = vld [vmem:[#allocation16 + $0xc48] sm:$0xff]  ;;  %v8713_v28 = vcombine.high %v3797_v22, %v3801_v23  ;;  %v8712_v32 = vcombine.low %v3797_v22, %v3801_v23 }
 0x47a   :  { %6965 = vmatprep.mubr.bf16.mxu1 %v10107_v52  ;;  %6894 = vmatprep.subr.bf16.mxu0 %v8753_v14  ;;  %v3929_v25 = vld [vmem:[#allocation16 + $0xc68] sm:$0xff] }
 0x47b   :  { %6935 = vmatprep.subr.bf16.mxu1 %v8881_v41  ;;  %v8841_v30 = vcombine.high %v3925_v24, %v3929_v25  ;;  %v3789_v31 = vld [vmem:[#allocation16 + $0x808] sm:$0xff]  ;;  %v8840_v36 = vcombine.low %v3925_v24, %v3929_v25 }
 0x47c   :  { %6895 = vmatpush1.bf16.msra.mxu0 %v8752_v55  ;;  %v3793_v2 = vld [vmem:[#allocation16 + $0x828] sm:$0xff] }
 0x47d   :  { %6936 = vmatpush1.bf16.msra.mxu1 %v8880_v58  ;;  %6896 = vmatprep.subr.bf16.mxu0 %v8745_v59  ;;  %v3917_v3 = vld [vmem:[#allocation16 + $0xc08] sm:$0xff]  ;;  %v8705_v41 = vcombine.high %v3789_v31, %v3793_v2 }
 0x47e   :  { %6937 = vmatprep.subr.bf16.mxu1 %v8873_v60  ;;  %v3921_v14 = vld [vmem:[#allocation16 + $0xc28] sm:$0xff]  ;;  %v8704_v60 = vcombine.low %v3789_v31, %v3793_v2 }
 0x47f   :  { %v8833_v29 = vcombine.high %v3917_v3, %v3921_v14  ;;  %v3909_v47 = vld [vmem:[#allocation16 + $0xbc8] sm:$0xff]  ;;  %v8832_v61 = vcombine.low %v3917_v3, %v3921_v14 }
 0x480   :  { %6897 = vmatpush1.bf16.msra.mxu0 %v8744_v1  ;;  %v3913_v55 = vld [vmem:[#allocation16 + $0xbe8] sm:$0xff] }
 0x481   :  { %6938 = vmatpush1.bf16.msra.mxu1 %v8872_v4  ;;  %6898 = vmatprep.subr.bf16.mxu0 %v8737_v48  ;;  %v4037_v58 = vld [vmem:[#allocation16 + $0xfc8] sm:$0xff]  ;;  %v8825_v62 = vcombine.high %v3909_v47, %v3913_v55 }
 0x482   :  { %6939 = vmatprep.subr.bf16.mxu1 %v8865_v49  ;;  %v4041_v59 = vld [vmem:[#allocation16 + $0xfe8] sm:$0xff]  ;;  %v8824_v49 = vcombine.low %v3909_v47, %v3913_v55 }
 0x483   :  { %v8953_v63 = vcombine.high %v4037_v58, %v4041_v59  ;;  %v3901_v0 = vld [vmem:[#allocation16 + $0xb88] sm:$0xff]  ;;  %v8952_v50 = vcombine.low %v4037_v58, %v4041_v59 }
 0x484   :  { %6899 = vmatpush1.bf16.msra.mxu0 %v8736_v53  ;;  %v3905_v1 = vld [vmem:[#allocation16 + $0xba8] sm:$0xff] }
 0x485   :  { %6940 = vmatpush1.bf16.msra.mxu1 %v8864_v5  ;;  %6900 = vmatprep.subr.bf16.mxu0 %v8729_v7  ;;  %v4029_v4 = vld [vmem:[#allocation16 + $0xf88] sm:$0xff]  ;;  %v8817_v35 = vcombine.high %v3901_v0, %v3905_v1 }
 0x486   :  { %6941 = vmatprep.subr.bf16.mxu1 %v8857_v8  ;;  %v4033_v48 = vld [vmem:[#allocation16 + $0xfa8] sm:$0xff]  ;;  %v8816_v8 = vcombine.low %v3901_v0, %v3905_v1 }
 0x487   :  { %v8945_v15 = vcombine.high %v4029_v4, %v4033_v48  ;;  %v3893_v56 = vld [vmem:[#allocation16 + $0xb48] sm:$0xff]  ;;  %v8944_v10 = vcombine.low %v4029_v4, %v4033_v48 }
 0x488   :  { %6901 = vmatpush1.bf16.msra.mxu0 %v8728_v9  ;;  %v3897_v53 = vld [vmem:[#allocation16 + $0xb68] sm:$0xff] }
 0x489   :  { %6942 = vmatpush1.bf16.msra.mxu1 %v8856_v13  ;;  %6902 = vmatprep.subr.bf16.mxu0 %v8721_v19  ;;  %v4021_v5 = vld [vmem:[#allocation16 + $0xf48] sm:$0xff]  ;;  %v8809_v11 = vcombine.high %v3893_v56, %v3897_v53 }
 0x48a   :  { %6943 = vmatprep.subr.bf16.mxu1 %v8849_v20  ;;  %v4025_v7 = vld [vmem:[#allocation16 + $0xf68] sm:$0xff]  ;;  %v8808_v20 = vcombine.low %v3893_v56, %v3897_v53 }
 0x48b   :  { %v8937_v12 = vcombine.high %v4021_v5, %v4025_v7  ;;  %v3885_v46 = vld [vmem:[#allocation16 + $0xb08] sm:$0xff]  ;;  %v8936_v22 = vcombine.low %v4021_v5, %v4025_v7  ;;  %v3590_v7 = vld [vmem:[#allocation16 + $0x1d0] sm:$0xff] }
 0x48c   :  { %6903 = vmatpush1.bf16.msra.mxu0 %v8720_v6  ;;  %v3889_v9 = vld [vmem:[#allocation16 + $0xb28] sm:$0xff] }
 0x48d   :  { %6944 = vmatpush1.bf16.msra.mxu1 %v8848_v27  ;;  %6904 = vmatprep.subr.bf16.mxu0 %v8713_v28  ;;  %v4013_v13 = vld [vmem:[#allocation16 + $0xf08] sm:$0xff]  ;;  %v8801_v23 = vcombine.high %v3885_v46, %v3889_v9 }
 0x48e   :  { %6945 = vmatprep.subr.bf16.mxu1 %v8841_v30  ;;  %v4017_v19 = vld [vmem:[#allocation16 + $0xf28] sm:$0xff]  ;;  %v8800_v30 = vcombine.low %v3885_v46, %v3889_v9 }
 0x48f   :  { %v8929_v24 = vcombine.high %v4013_v13, %v4017_v19  ;;  %v3877_v25 = vld [vmem:[#allocation16 + $0xac8] sm:$0xff]  ;;  %v8928_v31 = vcombine.low %v4013_v13, %v4017_v19  ;;  %v10121_v13 = vld [vmem:[#allocation17] sm:$0xff] }
 0x490   :  { %6905 = vmatpush1.bf16.msra.mxu0 %v8712_v32  ;;  %v3881_v6 = vld [vmem:[#allocation16 + $0xae8] sm:$0xff] }
 0x491   :  { %6946 = vmatpush1.bf16.msra.mxu1 %v8840_v36  ;;  %6906 = vmatprep.subr.bf16.mxu0 %v8705_v41  ;;  %v4005_v27 = vld [vmem:[#allocation16 + $0xec8] sm:$0xff]  ;;  %v8793_v2 = vcombine.high %v3877_v25, %v3881_v6 }
 0x492   :  { %6947 = vmatprep.subr.bf16.mxu1 %v8833_v29  ;;  %v4009_v28 = vld [vmem:[#allocation16 + $0xee8] sm:$0xff]  ;;  %v8792_v29 = vcombine.low %v3877_v25, %v3881_v6  ;;  %v3710_v25 = vld [vmem:[#allocation16 + $0x590] sm:$0xff] }
 0x493   :  { %v8921_v3 = vcombine.high %v4005_v27, %v4009_v28  ;;  %v3869_v14 = vld [vmem:[#allocation16 + $0xa88] sm:$0xff]  ;;  %v8920_v47 = vcombine.low %v4005_v27, %v4009_v28  ;;  %v3714_v6 = vld [vmem:[#allocation16 + $0x5b0] sm:$0xff]  ;;  %v4053_v28 = vrot.slane %v10121_v13, %v9927_v18 }
 0x494   :  { %6907 = vmatpush1.bf16.msra.mxu0 %v8704_v60  ;;  %v3873_v32 = vld [vmem:[#allocation16 + $0xaa8] sm:$0xff] }
 0x495   :  { %6948 = vmatpush1.bf16.msra.mxu1 %v8832_v61  ;;  %6908 = vmatprep.subr.bf16.mxu0 %v8825_v62  ;;  %v3997_v36 = vld [vmem:[#allocation16 + $0xe88] sm:$0xff]  ;;  %v8785_v55 = vcombine.high %v3869_v14, %v3873_v32 }
 0x496   :  { %6949 = vmatprep.subr.bf16.mxu1 %v8953_v63  ;;  %v4001_v41 = vld [vmem:[#allocation16 + $0xea8] sm:$0xff]  ;;  %v8784_v63 = vcombine.low %v3869_v14, %v3873_v32  ;;  %v8627_v32 = vcombine.high %v3710_v25, %v3714_v6 }
 0x497   :  { %v8913_v58 = vcombine.high %v3997_v36, %v4001_v41  ;;  %v3861_v59 = vld [vmem:[#allocation16 + $0xa48] sm:$0xff]  ;;  %v8912_v0 = vcombine.low %v3997_v36, %v4001_v41  ;;  %v3702_v36 = vld [vmem:[#allocation16 + $0x550] sm:$0xff] }
 0x498   :  { %6909 = vmatpush2.bf16.msra.mxu0 %v8824_v49  ;;  %v3865_v60 = vld [vmem:[#allocation16 + $0xa68] sm:$0xff]  ;;  %v3706_v41 = vld [vmem:[#allocation16 + $0x570] sm:$0xff] }
 0x499   :  { %6950 = vmatpush2.bf16.msra.mxu1 %v8952_v50  ;;  %6910 = vmatprep.subr.bf16.mxu0 %v8817_v35  ;;  %v3989_v61 = vld [vmem:[#allocation16 + $0xe48] sm:$0xff]  ;;  %v8777_v1 = vcombine.high %v3861_v59, %v3865_v60 }
 0x49a   :  { %6951 = vmatprep.subr.bf16.mxu1 %v8945_v15  ;;  %v3993_v62 = vld [vmem:[#allocation16 + $0xe68] sm:$0xff]  ;;  %v8776_v15 = vcombine.low %v3861_v59, %v3865_v60 }
 0x49b   :  { %v8905_v4 = vcombine.high %v3989_v61, %v3993_v62  ;;  %v3853_v48 = vld [vmem:[#allocation16 + $0xa08] sm:$0xff]  ;;  %v8904_v56 = vcombine.low %v3989_v61, %v3993_v62  ;;  %v8619_v61 = vcombine.high %v3702_v36, %v3706_v41  ;;  %v3566_v62 = vld [vmem:[#allocation16 + $0x110] sm:$0xff] }
 0x49c   :  { %6911 = vmatpush2.bf16.msra.mxu0 %v8816_v8  ;;  %v3857_v49 = vld [vmem:[#allocation16 + $0xa28] sm:$0xff]  ;;  %v3594_v8 = vld [vmem:[#allocation16 + $0x1f0] sm:$0xff] }
 0x49d   :  { %6952 = vmatpush2.bf16.msra.mxu1 %v8944_v10  ;;  %6912 = vmatprep.subr.bf16.mxu0 %v8809_v11  ;;  %v3981_v50 = vld [vmem:[#allocation16 + $0xe08] sm:$0xff]  ;;  %v8769_v53 = vcombine.high %v3853_v48, %v3857_v49  ;;  %v3718_v10 = vld [vmem:[#allocation16 + $0x5d0] sm:$0xff]  ;;  %v8507_v9 = vcombine.high %v3590_v7, %v3594_v8 }
 0x49e   :  { %6953 = vmatprep.subr.bf16.mxu1 %v8937_v12  ;;  %v3985_v35 = vld [vmem:[#allocation16 + $0xe28] sm:$0xff]  ;;  %v3722_v11 = vld [vmem:[#allocation16 + $0x5f0] sm:$0xff]  ;;  %v8768_v12 = vcombine.low %v3853_v48, %v3857_v49 }
 0x49f   :  { %v8897_v5 = vcombine.high %v3981_v50, %v3985_v35  ;;  %v8896_v46 = vcombine.low %v3981_v50, %v3985_v35  ;;  %v8635_v19 = vcombine.high %v3718_v10, %v3722_v11  ;;  %v8634_v27 = vcombine.low %v3718_v10, %v3722_v11  ;;  %v3698_v48 = vld [vmem:[#allocation16 + $0x530] sm:$0xff] }
 0x4a0   :  { %6913 = vmatpush2.bf16.msra.mxu0 %v8808_v20  ;;  %v3582_v20 = vld [vmem:[#allocation16 + $0x190] sm:$0xff] }
 0x4a1   :  { %6954 = vmatpush2.bf16.msra.mxu1 %v8936_v22  ;;  %6914 = vmatprep.subr.bf16.mxu0 %v8801_v23  ;;  %v3586_v22 = vld [vmem:[#allocation16 + $0x1b0] sm:$0xff]  ;;  %v8506_v23 = vcombine.low %v3590_v7, %v3594_v8 }
 0x4a2   :  { %6955 = vmatprep.subr.bf16.mxu1 %v8929_v24  ;;  %v4049_v24 = vrot.slane %v10121_v13, %v9923_v16  ;;  %v3558_v7 = vld [vmem:[#allocation16 + $0xd0] sm:$0xff] }
 0x4a3   :  { %v3562_v8 = vld [vmem:[#allocation16 + $0xf0] sm:$0xff] }
 0x4a4   :  { %6915 = vmatpush2.bf16.msra.mxu0 %v8800_v30  ;;  %v8499_v30 = vcombine.high %v3582_v20, %v3586_v22  ;;  %v3686_v10 = vld [vmem:[#allocation16 + $0x4d0] sm:$0xff] }
 0x4a5   :  { %6956 = vmatpush2.bf16.msra.mxu1 %v8928_v31  ;;  %6916 = vmatprep.subr.bf16.mxu0 %v8793_v2  ;;  %v3574_v31 = vld [vmem:[#allocation16 + $0x150] sm:$0xff] }
 0x4a6   :  { %6957 = vmatprep.subr.bf16.mxu1 %v8921_v3  ;;  %v3578_v2 = vld [vmem:[#allocation16 + $0x170] sm:$0xff] }
 0x4a7   :  { %v8490_v50 = vcombine.low %v3574_v31, %v3578_v2  ;;  %v3690_v11 = vld [vmem:[#allocation16 + $0x4f0] sm:$0xff] }
 0x4a8   :  { %6917 = vmatpush2.bf16.msra.mxu0 %v8792_v29  ;;  %v8498_v29 = vcombine.low %v3582_v20, %v3586_v22  ;;  %v3550_v20 = vld [vmem:[#allocation16 + $0x90] sm:$0xff] }
 0x4a9   :  { %6958 = vmatpush2.bf16.msra.mxu1 %v8920_v47  ;;  %6918 = vmatprep.subr.bf16.mxu0 %v8785_v55  ;;  %v8626_v55 = vcombine.low %v3710_v25, %v3714_v6  ;;  %v3554_v22 = vld [vmem:[#allocation16 + $0xb0] sm:$0xff]  ;;  %v8474_v25 = vcombine.low %v3558_v7, %v3562_v8  ;;  %v8602_v6 = vcombine.low %v3686_v10, %v3690_v11 }
 0x4aa   :  { %6959 = vmatprep.subr.bf16.mxu1 %v8913_v58  ;;  %v8491_v58 = vcombine.high %v3574_v31, %v3578_v2  ;;  %v3546_v31 = vld [vmem:[#allocation16 + $0x70] sm:$0xff] }
 0x4ab   :  { %v3670_v2 = vld [vmem:[#allocation16 + $0x450] sm:$0xff] }
 0x4ac   :  { %6919 = vmatpush2.bf16.msra.mxu0 %v8784_v63  ;;  %v3570_v63 = vld [vmem:[#allocation16 + $0x130] sm:$0xff] }
 0x4ad   :  { %6960 = vmatpush2.bf16.msra.mxu1 %v8912_v0  ;;  %6920 = vmatprep.subr.bf16.mxu0 %v8777_v1 }
 0x4ae   :  { %6961 = vmatprep.subr.bf16.mxu1 %v8905_v4  ;;  %v3694_v4 = vld [vmem:[#allocation16 + $0x510] sm:$0xff] }
 0x4b0   :  { %6921 = vmatpush2.bf16.msra.mxu0 %v8776_v15 }
 0x4b1   :  { %6962 = vmatpush2.bf16.msra.mxu1 %v8904_v56  ;;  %6922 = vmatprep.subr.bf16.mxu0 %v8769_v53  ;;  %v8618_v56 = vcombine.low %v3702_v36, %v3706_v41  ;;  %v8483_v53 = vcombine.high %v3566_v62, %v3570_v63 }
 0x4b2   :  { %6963 = vmatprep.subr.bf16.mxu1 %v8897_v5  ;;  %v8611_v5 = vcombine.high %v3694_v4, %v3698_v48 }
 0x4b4   :  { %6923 = vmatpush2.bf16.msra.mxu0 %v8768_v12  ;;  %v8482_v12 = vcombine.low %v3566_v62, %v3570_v63  ;;  %v3654_v62 = vld [vmem:[#allocation16 + $0x3d0] sm:$0xff] }
 0x4b5   :  { %6964 = vmatpush2.bf16.msra.mxu1 %v8896_v46  ;;  %6974 = vmatprep.subr.bf16.mxu0 %v8507_v9  ;;  %v8610_v46 = vcombine.low %v3694_v4, %v3698_v48  ;;  %v8475_v9 = vcombine.high %v3558_v7, %v3562_v8  ;;  %v3658_v63 = vld [vmem:[#allocation16 + $0x3f0] sm:$0xff] }
 0x4b6   :  { %7015 = vmatprep.subr.bf16.mxu1 %v8635_v19  ;;  %v8603_v19 = vcombine.high %v3686_v10, %v3690_v11  ;;  %v8570_v7 = vcombine.low %v3654_v62, %v3658_v63 }
 0x4b7   :  { %6925 = vmatmul.mubr.bf16.vlgmr.msra.gmra.mxu0 %v10105_v51  ;;  %v6680_v3 = vpop.f32.mrf.mxu0  ;;  %v6721_v14 = vpop.f32.mrf.mxu1 }
 0x4b8   :  { %6966 = vmatmul.mubr.bf16.vlgmr.msra.gmra.mxu1 %v10109_v57  ;;  %v6681_v16 = vadd.f32 %v6680_v3, %v4049_v24  ;;  %6975 = vmatpush1.bf16.msra.mxu0 %v8506_v23  ;;  %v3678_v23 = vld [vmem:[#allocation16 + $0x490] sm:$0xff] }
 0x4b9   :  { %7006 = vmatprep.mubr.bf16.mxu0 %v10077_v37  ;;  %7016 = vmatpush1.bf16.msra.mxu1 %v8634_v27  ;;  %v6682_v47 = vpop.f32.mrf.mxu0  ;;  %v6723_v18 = vpop.f32.mrf.mxu1  ;;  %v3682_v24 = vld [vmem:[#allocation16 + $0x4b0] sm:$0xff]  ;;  %v8467_v27 = vcombine.high %v3550_v20, %v3554_v22 }
 0x4ba   :  { %v10130_v59 = vadd.f32 %v6721_v14, %v6681_v16  ;;  %7047 = vmatprep.mubr.bf16.mxu1 %v10079_v38  ;;  %v6683_v60 = vadd.f32 %v6682_v47, %v4053_v28  ;;  %6976 = vmatprep.subr.bf16.mxu0 %v8499_v30  ;;  %v8595_v28 = vcombine.high %v3678_v23, %v3682_v24  ;;  %v3542_v30 = vld [vmem:[#allocation16 + $0x50] sm:$0xff] }
 0x4bb   :  { %7017 = vmatprep.subr.bf16.mxu1 %v8627_v32  ;;  %v6684_v0 = vpop.f32.mrf.mxu0  ;;  %v6725_v1 = vpop.f32.mrf.mxu1  ;;  %v3674_v3 = vld [vmem:[#allocation16 + $0x470] sm:$0xff]  ;;  %v8466_v14 = vcombine.low %v3550_v20, %v3554_v22  ;;  %v8594_v32 = vcombine.low %v3678_v23, %v3682_v24  ;;  %v8459_v36 = vcombine.high %v3542_v30, %v3546_v31 }
 0x4bc   :  { %v10133_v49 = vadd.f32 %v6723_v18, %v6683_v60  ;;  %6977 = vmatpush1.bf16.msra.mxu0 %v8498_v29  ;;  %v8587_v41 = vcombine.high %v3670_v2, %v3674_v3  ;;  %v3534_v16 = vld [vmem:[#allocation16 + $0x10] sm:$0xff] }
 0x4bd   :  { %7018 = vmatpush1.bf16.msra.mxu1 %v8626_v55  ;;  %v6685_v35 = vpop.f32.mrf.mxu0  ;;  %v6726_v15 = vpop.f32.mrf.mxu1  ;;  %6978 = vmatprep.subr.bf16.mxu0 %v8491_v58  ;;  %v3538_v29 = vld [vmem:[#allocation16 + $0x30] sm:$0xff]  ;;  %v8458_v55 = vcombine.low %v3542_v30, %v3546_v31  ;;  %v8586_v58 = vcombine.low %v3670_v2, %v3674_v3 }
 0x4be   :  { %7019 = vmatprep.subr.bf16.mxu1 %v8619_v61  ;;  %v3662_v47 = vld [vmem:[#allocation16 + $0x410] sm:$0xff]  ;;  %v8451_v60 = vcombine.high %v3534_v16, %v3538_v29  ;;  %v8450_v4 = vcombine.low %v3534_v16, %v3538_v29 }
 0x4bf   :  { %v3666_v18 = vld [vmem:[#allocation16 + $0x430] sm:$0xff] }
 0x4c0   :  { %6979 = vmatpush1.bf16.msra.mxu0 %v8490_v50  ;;  %v8579_v61 = vcombine.high %v3662_v47, %v3666_v18  ;;  %v3782_v0 = vld [vmem:[#allocation16 + $0x7d0] sm:$0xff]  ;;  %v8578_v48 = vcombine.low %v3662_v47, %v3666_v18  ;;  %v8571_v50 = vcombine.high %v3654_v62, %v3658_v63 }
 0x4c1   :  { %7020 = vmatpush1.bf16.msra.mxu1 %v8618_v56  ;;  %6980 = vmatprep.subr.bf16.mxu0 %v8483_v53  ;;  %v3786_v1 = vld [vmem:[#allocation16 + $0x7f0] sm:$0xff] }
 0x4c2   :  { %7021 = vmatprep.subr.bf16.mxu1 %v8611_v5  ;;  %v8699_v35 = vcombine.high %v3782_v0, %v3786_v1  ;;  %v3646_v15 = vld [vmem:[#allocation16 + $0x390] sm:$0xff]  ;;  %v8698_v8 = vcombine.low %v3782_v0, %v3786_v1 }
 0x4c3   :  { %v3650_v56 = vld [vmem:[#allocation16 + $0x3b0] sm:$0xff] }
 0x4c4   :  { %6981 = vmatpush1.bf16.msra.mxu0 %v8482_v12  ;;  %v3774_v53 = vld [vmem:[#allocation16 + $0x790] sm:$0xff]  ;;  %v8563_v10 = vcombine.high %v3646_v15, %v3650_v56  ;;  %v8562_v20 = vcombine.low %v3646_v15, %v3650_v56 }
 0x4c5   :  { %7022 = vmatpush1.bf16.msra.mxu1 %v8610_v46  ;;  %6982 = vmatprep.subr.bf16.mxu0 %v8475_v9  ;;  %v3778_v5 = vld [vmem:[#allocation16 + $0x7b0] sm:$0xff] }
 0x4c6   :  { %7023 = vmatprep.subr.bf16.mxu1 %v8603_v19  ;;  %v8691_v11 = vcombine.high %v3774_v53, %v3778_v5  ;;  %v3638_v12 = vld [vmem:[#allocation16 + $0x350] sm:$0xff]  ;;  %v8690_v22 = vcombine.low %v3774_v53, %v3778_v5 }
 0x4c7   :  { %v3642_v46 = vld [vmem:[#allocation16 + $0x370] sm:$0xff] }
 0x4c8   :  { %6983 = vmatpush1.bf16.msra.mxu0 %v8474_v25  ;;  %v3766_v9 = vld [vmem:[#allocation16 + $0x750] sm:$0xff]  ;;  %v8555_v23 = vcombine.high %v3638_v12, %v3642_v46  ;;  %v8554_v30 = vcombine.low %v3638_v12, %v3642_v46 }
 0x4c9   :  { %7024 = vmatpush1.bf16.msra.mxu1 %v8602_v6  ;;  %6984 = vmatprep.subr.bf16.mxu0 %v8467_v27  ;;  %v3770_v19 = vld [vmem:[#allocation16 + $0x770] sm:$0xff] }
 0x4ca   :  { %7025 = vmatprep.subr.bf16.mxu1 %v8595_v28  ;;  %v8683_v24 = vcombine.high %v3766_v9, %v3770_v19  ;;  %v3630_v25 = vld [vmem:[#allocation16 + $0x310] sm:$0xff]  ;;  %v8682_v31 = vcombine.low %v3766_v9, %v3770_v19 }
 0x4cb   :  { %v3634_v6 = vld [vmem:[#allocation16 + $0x330] sm:$0xff] }
 0x4cc   :  { %6985 = vmatpush1.bf16.msra.mxu0 %v8466_v14  ;;  %v3758_v27 = vld [vmem:[#allocation16 + $0x710] sm:$0xff]  ;;  %v8547_v2 = vcombine.high %v3630_v25, %v3634_v6  ;;  %v8546_v16 = vcombine.low %v3630_v25, %v3634_v6 }
 0x4cd   :  { %7026 = vmatpush1.bf16.msra.mxu1 %v8594_v32  ;;  %6986 = vmatprep.subr.bf16.mxu0 %v8459_v36  ;;  %v3762_v28 = vld [vmem:[#allocation16 + $0x730] sm:$0xff] }
 0x4ce   :  { %7027 = vmatprep.subr.bf16.mxu1 %v8587_v41  ;;  %v8675_v3 = vcombine.high %v3758_v27, %v3762_v28  ;;  %v3622_v14 = vld [vmem:[#allocation16 + $0x2d0] sm:$0xff]  ;;  %v8674_v29 = vcombine.low %v3758_v27, %v3762_v28 }
 0x4cf   :  { %v3626_v32 = vld [vmem:[#allocation16 + $0x2f0] sm:$0xff] }
 0x4d0   :  { %6987 = vmatpush1.bf16.msra.mxu0 %v8458_v55  ;;  %v3750_v36 = vld [vmem:[#allocation16 + $0x6d0] sm:$0xff]  ;;  %v8539_v47 = vcombine.high %v3622_v14, %v3626_v32  ;;  %v8538_v62 = vcombine.low %v3622_v14, %v3626_v32 }
 0x4d1   :  { %7028 = vmatpush1.bf16.msra.mxu1 %v8586_v58  ;;  %6988 = vmatprep.subr.bf16.mxu0 %v8451_v60  ;;  %v3754_v41 = vld [vmem:[#allocation16 + $0x6f0] sm:$0xff] }
 0x4d2   :  { %7029 = vmatprep.subr.bf16.mxu1 %v8579_v61  ;;  %v8667_v18 = vcombine.high %v3750_v36, %v3754_v41  ;;  %v3614_v55 = vld [vmem:[#allocation16 + $0x290] sm:$0xff]  ;;  %v8666_v63 = vcombine.low %v3750_v36, %v3754_v41 }
 0x4d3   :  { %v3618_v58 = vld [vmem:[#allocation16 + $0x2b0] sm:$0xff] }
 0x4d4   :  { %6989 = vmatpush1.bf16.msra.mxu0 %v8450_v4  ;;  %v3742_v60 = vld [vmem:[#allocation16 + $0x690] sm:$0xff]  ;;  %v8531_v0 = vcombine.high %v3614_v55, %v3618_v58  ;;  %v8530_v15 = vcombine.low %v3614_v55, %v3618_v58 }
 0x4d5   :  { %7030 = vmatpush1.bf16.msra.mxu1 %v8578_v48  ;;  %6990 = vmatprep.subr.bf16.mxu0 %v8571_v50  ;;  %v3746_v61 = vld [vmem:[#allocation16 + $0x6b0] sm:$0xff] }
 0x4d6   :  { %7031 = vmatprep.subr.bf16.mxu1 %v8699_v35  ;;  %v8659_v1 = vcombine.high %v3742_v60, %v3746_v61  ;;  %v3606_v4 = vld [vmem:[#allocation16 + $0x250] sm:$0xff]  ;;  %v8658_v56 = vcombine.low %v3742_v60, %v3746_v61 }
 0x4d7   :  { %v3610_v48 = vld [vmem:[#allocation16 + $0x270] sm:$0xff] }
 0x4d8   :  { %6991 = vmatpush2.bf16.msra.mxu0 %v8570_v7  ;;  %v3734_v50 = vld [vmem:[#allocation16 + $0x650] sm:$0xff]  ;;  %v8523_v53 = vcombine.high %v3606_v4, %v3610_v48  ;;  %v8522_v12 = vcombine.low %v3606_v4, %v3610_v48 }
 0x4d9   :  { %7032 = vmatpush2.bf16.msra.mxu1 %v8698_v8  ;;  %6992 = vmatprep.subr.bf16.mxu0 %v8563_v10  ;;  %v3738_v35 = vld [vmem:[#allocation16 + $0x670] sm:$0xff] }
 0x4da   :  { %7033 = vmatprep.subr.bf16.mxu1 %v8691_v11  ;;  %v8651_v5 = vcombine.high %v3734_v50, %v3738_v35  ;;  %v3598_v7 = vld [vmem:[#allocation16 + $0x210] sm:$0xff]  ;;  %v8650_v46 = vcombine.low %v3734_v50, %v3738_v35 }
 0x4db   :  { %v3602_v8 = vld [vmem:[#allocation16 + $0x230] sm:$0xff] }
 0x4dc   :  { %6993 = vmatpush2.bf16.msra.mxu0 %v8562_v20  ;;  %v3726_v10 = vld [vmem:[#allocation16 + $0x610] sm:$0xff]  ;;  %v8515_v9 = vcombine.high %v3598_v7, %v3602_v8  ;;  %v8514_v25 = vcombine.low %v3598_v7, %v3602_v8 }
 0x4dd   :  { %7034 = vmatpush2.bf16.msra.mxu1 %v8690_v22  ;;  %6994 = vmatprep.subr.bf16.mxu0 %v8555_v23  ;;  %v3730_v11 = vld [vmem:[#allocation16 + $0x630] sm:$0xff] }
 0x4de   :  { %7035 = vmatprep.subr.bf16.mxu1 %v8683_v24  ;;  %v8643_v19 = vcombine.high %v3726_v10, %v3730_v11  ;;  %v3846_v20 = vld [vmem:[#allocation16 + $0x9d0] sm:$0xff]  ;;  %v8642_v6 = vcombine.low %v3726_v10, %v3730_v11 }
 0x4df   :  { %v3850_v22 = vld [vmem:[#allocation16 + $0x9f0] sm:$0xff] }
 0x4e0   :  { %6995 = vmatpush2.bf16.msra.mxu0 %v8554_v30  ;;  %v3974_v23 = vld [vmem:[#allocation16 + $0xdd0] sm:$0xff]  ;;  %v8763_v27 = vcombine.high %v3846_v20, %v3850_v22 }
 0x4e1   :  { %7036 = vmatpush2.bf16.msra.mxu1 %v8682_v31  ;;  %6996 = vmatprep.subr.bf16.mxu0 %v8547_v2  ;;  %v3978_v24 = vld [vmem:[#allocation16 + $0xdf0] sm:$0xff]  ;;  %v8762_v2 = vcombine.low %v3846_v20, %v3850_v22 }
 0x4e2   :  { %7037 = vmatprep.subr.bf16.mxu1 %v8675_v3  ;;  %v8891_v28 = vcombine.high %v3974_v23, %v3978_v24  ;;  %v3838_v30 = vld [vmem:[#allocation16 + $0x990] sm:$0xff]  ;;  %v8890_v32 = vcombine.low %v3974_v23, %v3978_v24 }
 0x4e3   :  { %v3842_v31 = vld [vmem:[#allocation16 + $0x9b0] sm:$0xff] }
 0x4e4   :  { %6997 = vmatpush2.bf16.msra.mxu0 %v8546_v16  ;;  %v3966_v3 = vld [vmem:[#allocation16 + $0xd90] sm:$0xff]  ;;  %v8755_v36 = vcombine.high %v3838_v30, %v3842_v31  ;;  %v8754_v61 = vcombine.low %v3838_v30, %v3842_v31 }
 0x4e5   :  { %7038 = vmatpush2.bf16.msra.mxu1 %v8674_v29  ;;  %6998 = vmatprep.subr.bf16.mxu0 %v8539_v47  ;;  %v3970_v14 = vld [vmem:[#allocation16 + $0xdb0] sm:$0xff] }
 0x4e6   :  { %7039 = vmatprep.subr.bf16.mxu1 %v8667_v18  ;;  %v3830_v41 = vld [vmem:[#allocation16 + $0x950] sm:$0xff]  ;;  %v8883_v47 = vcombine.high %v3966_v3, %v3970_v14 }
 0x4e7   :  { %v3834_v16 = vld [vmem:[#allocation16 + $0x970] sm:$0xff] }
 0x4e8   :  { %6999 = vmatpush2.bf16.msra.mxu0 %v8538_v62  ;;  %v3958_v18 = vld [vmem:[#allocation16 + $0xd50] sm:$0xff]  ;;  %v8746_v8 = vcombine.low %v3830_v41, %v3834_v16 }
 0x4e9   :  { %7040 = vmatpush2.bf16.msra.mxu1 %v8666_v63  ;;  %7000 = vmatprep.subr.bf16.mxu0 %v8531_v0  ;;  %v3962_v55 = vld [vmem:[#allocation16 + $0xd70] sm:$0xff]  ;;  %v8882_v63 = vcombine.low %v3966_v3, %v3970_v14  ;;  %v8747_v0 = vcombine.high %v3830_v41, %v3834_v16 }
 0x4ea   :  { %7041 = vmatprep.subr.bf16.mxu1 %v8659_v1  ;;  %v8875_v50 = vcombine.high %v3958_v18, %v3962_v55  ;;  %v3822_v35 = vld [vmem:[#allocation16 + $0x910] sm:$0xff]  ;;  %v8874_v11 = vcombine.low %v3958_v18, %v3962_v55 }
 0x4eb   :  { %v3942_v20 = vld [vmem:[#allocation16 + $0xcd0] sm:$0xff] }
 0x4ec   :  { %7001 = vmatpush2.bf16.msra.mxu0 %v8530_v15  ;;  %v3946_v22 = vld [vmem:[#allocation16 + $0xcf0] sm:$0xff] }
 0x4ed   :  { %7042 = vmatpush2.bf16.msra.mxu1 %v8658_v56  ;;  %7002 = vmatprep.subr.bf16.mxu0 %v8523_v53  ;;  %v3950_v56 = vld [vmem:[#allocation16 + $0xd10] sm:$0xff]  ;;  %v8858_v3 = vcombine.low %v3942_v20, %v3946_v22 }
 0x4ee   :  { %7043 = vmatprep.subr.bf16.mxu1 %v8651_v5  ;;  %v3954_v53 = vld [vmem:[#allocation16 + $0xd30] sm:$0xff] }
 0x4ef   :  { %v8866_v24 = vcombine.low %v3950_v56, %v3954_v53  ;;  %v3934_v30 = vld [vmem:[#allocation16 + $0xc90] sm:$0xff] }
 0x4f0   :  { %7003 = vmatpush2.bf16.msra.mxu0 %v8522_v12  ;;  %v3938_v31 = vld [vmem:[#allocation16 + $0xcb0] sm:$0xff] }
 0x4f1   :  { %7044 = vmatpush2.bf16.msra.mxu1 %v8650_v46  ;;  %7004 = vmatprep.subr.bf16.mxu0 %v8515_v9  ;;  %v8867_v46 = vcombine.high %v3950_v56, %v3954_v53  ;;  %v3814_v9 = vld [vmem:[#allocation16 + $0x8d0] sm:$0xff]  ;;  %v8850_v18 = vcombine.low %v3934_v30, %v3938_v31 }
 0x4f2   :  { %7045 = vmatprep.subr.bf16.mxu1 %v8643_v19  ;;  %v3818_v19 = vld [vmem:[#allocation16 + $0x8f0] sm:$0xff] }
 0x4f3   :  { %v3802_v41 = vld [vmem:[#allocation16 + $0x870] sm:$0xff] }
 0x4f4   :  { %7005 = vmatpush2.bf16.msra.mxu0 %v8514_v25  ;;  %v8731_v25 = vcombine.high %v3814_v9, %v3818_v19  ;;  %v3926_v16 = vld [vmem:[#allocation16 + $0xc50] sm:$0xff] }
 0x4f5   :  { %7046 = vmatpush2.bf16.msra.mxu1 %v8642_v6  ;;  %7056 = vmatprep.subr.bf16.mxu0 %v8763_v27  ;;  %v8859_v6 = vcombine.high %v3942_v20, %v3946_v22  ;;  %v3806_v27 = vld [vmem:[#allocation16 + $0x890] sm:$0xff] }
 0x4f6   :  { %7097 = vmatprep.subr.bf16.mxu1 %v8891_v28  ;;  %v3810_v28 = vld [vmem:[#allocation16 + $0x8b0] sm:$0xff] }
 0x4f7   :  { %7007 = vmatmul.mubr.bf16.vlgmr.msra.gmra.mxu0 %v10081_v39  ;;  %v6762_v29 = vpop.f32.mrf.mxu0  ;;  %v8723_v14 = vcombine.high %v3806_v27, %v3810_v28  ;;  %v4042_v56 = vld [vmem:[#allocation16 + $0xff0] sm:$0xff] }
 0x4f8   :  { %7048 = vmatmul.mubr.bf16.vlgmr.msra.gmra.mxu1 %v10083_v40  ;;  %v6763_v58 = vadd.f32 %v6762_v29, %v10130_v59  ;;  %v6803_v60 = vpop.f32.mrf.mxu1  ;;  %7057 = vmatpush1.bf16.msra.mxu0 %v8762_v2  ;;  %v3826_v59 = vld [vmem:[#allocation16 + $0x930] sm:$0xff]  ;;  %v8730_v2 = vcombine.low %v3814_v9, %v3818_v19 }
 0x4f9   :  { %7088 = vmatprep.mubr.bf16.mxu0 %v10103_v54  ;;  %7098 = vmatpush1.bf16.msra.mxu1 %v8890_v32  ;;  %v6764_v62 = vpop.f32.mrf.mxu0  ;;  %v8739_v12 = vcombine.high %v3822_v35, %v3826_v59  ;;  %v8738_v23 = vcombine.low %v3822_v35, %v3826_v59  ;;  %v8851_v32 = vcombine.high %v3934_v30, %v3938_v31  ;;  %v3930_v29 = vld [vmem:[#allocation16 + $0xc70] sm:$0xff] }
 0x4fa   :  { %v10139_v1 = vadd.f32 %v6803_v60, %v6763_v58  ;;  %7129 = vmatprep.mubr.bf16.mxu1 %v10107_v52  ;;  %v6765_v4 = vadd.f32 %v6764_v62, %v10133_v49  ;;  %v6805_v48 = vpop.f32.mrf.mxu1  ;;  %7058 = vmatprep.subr.bf16.mxu0 %v8755_v36  ;;  %v3798_v36 = vld [vmem:[#allocation16 + $0x850] sm:$0xff]  ;;  %v8843_v58 = vcombine.high %v3926_v16, %v3930_v29 }
 0x4fb   :  { %7099 = vmatprep.subr.bf16.mxu1 %v8883_v47  ;;  %v6766_v15 = vpop.f32.mrf.mxu0  ;;  %v8722_v47 = vcombine.low %v3806_v27, %v3810_v28  ;;  %v8715_v55 = vcombine.high %v3798_v36, %v3802_v41  ;;  %v3790_v60 = vld [vmem:[#allocation16 + $0x810] sm:$0xff] }
 0x4fc   :  { %v10143_v5 = vadd.f32 %v6805_v48, %v6765_v4  ;;  %v6807_v7 = vpop.f32.mrf.mxu1  ;;  %7059 = vmatpush1.bf16.msra.mxu0 %v8754_v61  ;;  %v3794_v61 = vld [vmem:[#allocation16 + $0x830] sm:$0xff]  ;;  %v8842_v4 = vcombine.low %v3926_v16, %v3930_v29 }
 0x4fd   :  { %7100 = vmatpush1.bf16.msra.mxu1 %v8882_v63  ;;  %v6767_v10 = vpop.f32.mrf.mxu0  ;;  %7060 = vmatprep.subr.bf16.mxu0 %v8747_v0  ;;  %v3918_v62 = vld [vmem:[#allocation16 + $0xc10] sm:$0xff]  ;;  %v8714_v0 = vcombine.low %v3798_v36, %v3802_v41  ;;  %v8707_v48 = vcombine.high %v3790_v60, %v3794_v61  ;;  %v8706_v53 = vcombine.low %v3790_v60, %v3794_v61 }
 0x4fe   :  { %v6808_v49 = vpop.f32.mrf.mxu1  ;;  %7101 = vmatprep.subr.bf16.mxu1 %v8875_v50  ;;  %v3922_v63 = vld [vmem:[#allocation16 + $0xc30] sm:$0xff] }
 0x4ff   :  { %v8835_v50 = vcombine.high %v3918_v62, %v3922_v63  ;;  %v3910_v35 = vld [vmem:[#allocation16 + $0xbd0] sm:$0xff]  ;;  %v8834_v7 = vcombine.low %v3918_v62, %v3922_v63 }
 0x500   :  { %7061 = vmatpush1.bf16.msra.mxu0 %v8746_v8  ;;  %v3914_v59 = vld [vmem:[#allocation16 + $0xbf0] sm:$0xff] }
 0x501   :  { %7102 = vmatpush1.bf16.msra.mxu1 %v8874_v11  ;;  %7062 = vmatprep.subr.bf16.mxu0 %v8739_v12  ;;  %v4038_v15 = vld [vmem:[#allocation16 + $0xfd0] sm:$0xff]  ;;  %v8827_v8 = vcombine.high %v3910_v35, %v3914_v59  ;;  %v8826_v9 = vcombine.low %v3910_v35, %v3914_v59 }
 0x502   :  { %7103 = vmatprep.subr.bf16.mxu1 %v8867_v46  ;;  %v8955_v10 = vcombine.high %v4038_v15, %v4042_v56  ;;  %v3902_v11 = vld [vmem:[#allocation16 + $0xb90] sm:$0xff]  ;;  %v8954_v19 = vcombine.low %v4038_v15, %v4042_v56 }
 0x503   :  { %v3906_v12 = vld [vmem:[#allocation16 + $0xbb0] sm:$0xff] }
 0x504   :  { %7063 = vmatpush1.bf16.msra.mxu0 %v8738_v23  ;;  %v4030_v49 = vld [vmem:[#allocation16 + $0xf90] sm:$0xff]  ;;  %v8819_v20 = vcombine.high %v3902_v11, %v3906_v12  ;;  %v8818_v27 = vcombine.low %v3902_v11, %v3906_v12 }
 0x505   :  { %7104 = vmatpush1.bf16.msra.mxu1 %v8866_v24  ;;  %7064 = vmatprep.subr.bf16.mxu0 %v8731_v25  ;;  %v4034_v46 = vld [vmem:[#allocation16 + $0xfb0] sm:$0xff] }
 0x506   :  { %7105 = vmatprep.subr.bf16.mxu1 %v8859_v6  ;;  %v8947_v22 = vcombine.high %v4030_v49, %v4034_v46  ;;  %v3894_v23 = vld [vmem:[#allocation16 + $0xb50] sm:$0xff]  ;;  %v8946_v28 = vcombine.low %v4030_v49, %v4034_v46 }
 0x507   :  { %v3898_v24 = vld [vmem:[#allocation16 + $0xb70] sm:$0xff] }
 0x508   :  { %7065 = vmatpush1.bf16.msra.mxu0 %v8730_v2  ;;  %v4022_v25 = vld [vmem:[#allocation16 + $0xf50] sm:$0xff]  ;;  %v8811_v30 = vcombine.high %v3894_v23, %v3898_v24  ;;  %v8810_v36 = vcombine.low %v3894_v23, %v3898_v24 }
 0x509   :  { %7106 = vmatpush1.bf16.msra.mxu1 %v8858_v3  ;;  %7066 = vmatprep.subr.bf16.mxu0 %v8723_v14  ;;  %v4026_v6 = vld [vmem:[#allocation16 + $0xf70] sm:$0xff] }
 0x50a   :  { %7107 = vmatprep.subr.bf16.mxu1 %v8851_v32  ;;  %v8939_v31 = vcombine.high %v4022_v25, %v4026_v6  ;;  %v3886_v2 = vld [vmem:[#allocation16 + $0xb10] sm:$0xff]  ;;  %v8938_v41 = vcombine.low %v4022_v25, %v4026_v6 }
 0x50b   :  { %v3890_v3 = vld [vmem:[#allocation16 + $0xb30] sm:$0xff] }
 0x50c   :  { %7067 = vmatpush1.bf16.msra.mxu0 %v8722_v47  ;;  %v4014_v14 = vld [vmem:[#allocation16 + $0xf10] sm:$0xff]  ;;  %v8803_v16 = vcombine.high %v3886_v2, %v3890_v3  ;;  %v8802_v60 = vcombine.low %v3886_v2, %v3890_v3 }
 0x50d   :  { %7108 = vmatpush1.bf16.msra.mxu1 %v8850_v18  ;;  %7068 = vmatprep.subr.bf16.mxu0 %v8715_v55  ;;  %v4018_v32 = vld [vmem:[#allocation16 + $0xf30] sm:$0xff] }
 0x50e   :  { %7109 = vmatprep.subr.bf16.mxu1 %v8843_v58  ;;  %v8931_v29 = vcombine.high %v4014_v14, %v4018_v32  ;;  %v3878_v47 = vld [vmem:[#allocation16 + $0xad0] sm:$0xff]  ;;  %v8930_v61 = vcombine.low %v4014_v14, %v4018_v32 }
 0x50f   :  { %v3882_v18 = vld [vmem:[#allocation16 + $0xaf0] sm:$0xff] }
 0x510   :  { %7069 = vmatpush1.bf16.msra.mxu0 %v8714_v0  ;;  %v4006_v55 = vld [vmem:[#allocation16 + $0xed0] sm:$0xff]  ;;  %v8795_v62 = vcombine.high %v3878_v47, %v3882_v18  ;;  %v8794_v35 = vcombine.low %v3878_v47, %v3882_v18  ;;  %v3711_v47 = vld [vmem:[#allocation16 + $0x598] sm:$0xff] }
 0x511   :  { %7110 = vmatpush1.bf16.msra.mxu1 %v8842_v4  ;;  %7070 = vmatprep.subr.bf16.mxu0 %v8707_v48  ;;  %v4010_v58 = vld [vmem:[#allocation16 + $0xef0] sm:$0xff]  ;;  %v3715_v18 = vld [vmem:[#allocation16 + $0x5b8] sm:$0xff] }
 0x512   :  { %7111 = vmatprep.subr.bf16.mxu1 %v8835_v50  ;;  %v8923_v63 = vcombine.high %v4006_v55, %v4010_v58  ;;  %v3870_v0 = vld [vmem:[#allocation16 + $0xa90] sm:$0xff]  ;;  %v8922_v59 = vcombine.low %v4006_v55, %v4010_v58  ;;  %v4061_v58 = vrot.slane %v10121_v13, %v10008_v34  ;;  %v8628_v34 = vcombine.low %v3711_v47, %v3715_v18 }
 0x513   :  { %v3874_v4 = vld [vmem:[#allocation16 + $0xab0] sm:$0xff] }
 0x514   :  { %7071 = vmatpush1.bf16.msra.mxu0 %v8706_v53  ;;  %v3998_v48 = vld [vmem:[#allocation16 + $0xe90] sm:$0xff]  ;;  %v8787_v15 = vcombine.high %v3870_v0, %v3874_v4  ;;  %v8786_v11 = vcombine.low %v3870_v0, %v3874_v4  ;;  %v8629_v0 = vcombine.high %v3711_v47, %v3715_v18  ;;  %v3703_v4 = vld [vmem:[#allocation16 + $0x558] sm:$0xff] }
 0x515   :  { %7112 = vmatpush1.bf16.msra.mxu1 %v8834_v7  ;;  %7072 = vmatprep.subr.bf16.mxu0 %v8827_v8  ;;  %v4002_v50 = vld [vmem:[#allocation16 + $0xeb0] sm:$0xff]  ;;  %v3543_v18 = vld [vmem:[#allocation16 + $0x58] sm:$0xff] }
 0x516   :  { %7113 = vmatprep.subr.bf16.mxu1 %v8955_v10  ;;  %v8915_v56 = vcombine.high %v3998_v48, %v4002_v50  ;;  %v3862_v53 = vld [vmem:[#allocation16 + $0xa50] sm:$0xff]  ;;  %v8914_v12 = vcombine.low %v3998_v48, %v4002_v50  ;;  %v3707_v48 = vld [vmem:[#allocation16 + $0x578] sm:$0xff] }
 0x517   :  { %v3866_v7 = vld [vmem:[#allocation16 + $0xa70] sm:$0xff] }
 0x518   :  { %7073 = vmatpush2.bf16.msra.mxu0 %v8826_v9  ;;  %v3990_v8 = vld [vmem:[#allocation16 + $0xe50] sm:$0xff]  ;;  %v8779_v49 = vcombine.high %v3862_v53, %v3866_v7  ;;  %v8778_v23 = vcombine.low %v3862_v53, %v3866_v7  ;;  %v8621_v7 = vcombine.high %v3703_v4, %v3707_v48 }
 0x519   :  { %7114 = vmatpush2.bf16.msra.mxu1 %v8954_v19  ;;  %7074 = vmatprep.subr.bf16.mxu0 %v8819_v20  ;;  %v3994_v10 = vld [vmem:[#allocation16 + $0xe70] sm:$0xff] }
 0x51a   :  { %7115 = vmatprep.subr.bf16.mxu1 %v8947_v22  ;;  %v8907_v46 = vcombine.high %v3990_v8, %v3994_v10  ;;  %v3854_v9 = vld [vmem:[#allocation16 + $0xa10] sm:$0xff]  ;;  %v8906_v24 = vcombine.low %v3990_v8, %v3994_v10  ;;  %v3567_v8 = vld [vmem:[#allocation16 + $0x118] sm:$0xff] }
 0x51b   :  { %v3858_v19 = vld [vmem:[#allocation16 + $0xa30] sm:$0xff]  ;;  %v3571_v10 = vld [vmem:[#allocation16 + $0x138] sm:$0xff] }
 0x51c   :  { %7075 = vmatpush2.bf16.msra.mxu0 %v8818_v27  ;;  %v3982_v20 = vld [vmem:[#allocation16 + $0xe10] sm:$0xff]  ;;  %v8771_v25 = vcombine.high %v3854_v9, %v3858_v19  ;;  %v3591_v27 = vld [vmem:[#allocation16 + $0x1d8] sm:$0xff]  ;;  %v8770_v2 = vcombine.low %v3854_v9, %v3858_v19 }
 0x51d   :  { %7116 = vmatpush2.bf16.msra.mxu1 %v8946_v28  ;;  %7076 = vmatprep.subr.bf16.mxu0 %v8811_v30  ;;  %v3986_v22 = vld [vmem:[#allocation16 + $0xe30] sm:$0xff]  ;;  %v3595_v28 = vld [vmem:[#allocation16 + $0x1f8] sm:$0xff] }
 0x51e   :  { %7117 = vmatprep.subr.bf16.mxu1 %v8939_v31  ;;  %v8899_v6 = vcombine.high %v3982_v20, %v3986_v22  ;;  %v3719_v30 = vld [vmem:[#allocation16 + $0x5d8] sm:$0xff]  ;;  %v8898_v3 = vcombine.low %v3982_v20, %v3986_v22  ;;  %v8509_v14 = vcombine.high %v3591_v27, %v3595_v28  ;;  %v8620_v20 = vcombine.low %v3703_v4, %v3707_v48 }
 0x51f   :  { %v3723_v31 = vld [vmem:[#allocation16 + $0x5f8] sm:$0xff] }
 0x520   :  { %7077 = vmatpush2.bf16.msra.mxu0 %v8810_v36  ;;  %v8637_v32 = vcombine.high %v3719_v30, %v3723_v31  ;;  %v3583_v36 = vld [vmem:[#allocation16 + $0x198] sm:$0xff]  ;;  %v8636_v55 = vcombine.low %v3719_v30, %v3723_v31 }
 0x521   :  { %7118 = vmatpush2.bf16.msra.mxu1 %v8938_v41  ;;  %7078 = vmatprep.subr.bf16.mxu0 %v8803_v16  ;;  %v3587_v41 = vld [vmem:[#allocation16 + $0x1b8] sm:$0xff]  ;;  %v4057_v16 = vrot.slane %v10121_v13, %v10003_v17 }
 0x522   :  { %7119 = vmatprep.subr.bf16.mxu1 %v8931_v29  ;;  %v8508_v29 = vcombine.low %v3591_v27, %v3595_v28  ;;  %v3691_v27 = vld [vmem:[#allocation16 + $0x4f8] sm:$0xff]  ;;  %v8484_v28 = vcombine.low %v3567_v8, %v3571_v10 }
 0x523   :  { %v3535_v4 = vld [vmem:[#allocation16 + $0x18] sm:$0xff] }
 0x524   :  { %7079 = vmatpush2.bf16.msra.mxu0 %v8802_v60  ;;  %v8501_v60 = vcombine.high %v3583_v36, %v3587_v41  ;;  %v3539_v48 = vld [vmem:[#allocation16 + $0x38] sm:$0xff] }
 0x525   :  { %7120 = vmatpush2.bf16.msra.mxu1 %v8930_v61  ;;  %7080 = vmatprep.subr.bf16.mxu0 %v8795_v62  ;;  %v3575_v61 = vld [vmem:[#allocation16 + $0x158] sm:$0xff] }
 0x526   :  { %7121 = vmatprep.subr.bf16.mxu1 %v8923_v63  ;;  %v3579_v62 = vld [vmem:[#allocation16 + $0x178] sm:$0xff] }
 0x527   :  { %v8493_v13 = vcombine.high %v3575_v61, %v3579_v62  ;;  %v8492_v9 = vcombine.low %v3575_v61, %v3579_v62 }
 0x528   :  { %7081 = vmatpush2.bf16.msra.mxu0 %v8794_v35  ;;  %v8500_v35 = vcombine.low %v3583_v36, %v3587_v41  ;;  %v3683_v36 = vld [vmem:[#allocation16 + $0x4b8] sm:$0xff] }
 0x529   :  { %7122 = vmatpush2.bf16.msra.mxu1 %v8922_v59  ;;  %7082 = vmatprep.subr.bf16.mxu0 %v8787_v15 }
 0x52a   :  { %7123 = vmatprep.subr.bf16.mxu1 %v8915_v56 }
 0x52c   :  { %7083 = vmatpush2.bf16.msra.mxu0 %v8786_v11 }
 0x52d   :  { %7124 = vmatpush2.bf16.msra.mxu1 %v8914_v12  ;;  %7084 = vmatprep.subr.bf16.mxu0 %v8779_v49  ;;  %v3695_v12 = vld [vmem:[#allocation16 + $0x518] sm:$0xff] }
 0x52e   :  { %7125 = vmatprep.subr.bf16.mxu1 %v8907_v46  ;;  %v3699_v49 = vld [vmem:[#allocation16 + $0x538] sm:$0xff] }
 0x52f   :  { %v8612_v30 = vcombine.low %v3695_v12, %v3699_v49 }
 0x530   :  { %7085 = vmatpush2.bf16.msra.mxu0 %v8778_v23  ;;  %v8613_v23 = vcombine.high %v3695_v12, %v3699_v49 }
 0x531   :  { %7126 = vmatpush2.bf16.msra.mxu1 %v8906_v24  ;;  %7086 = vmatprep.subr.bf16.mxu0 %v8771_v25  ;;  %v3559_v24 = vld [vmem:[#allocation16 + $0xd8] sm:$0xff] }
 0x532   :  { %7127 = vmatprep.subr.bf16.mxu1 %v8899_v6  ;;  %v3563_v25 = vld [vmem:[#allocation16 + $0xf8] sm:$0xff] }
 0x533   :  { %v3687_v6 = vld [vmem:[#allocation16 + $0x4d8] sm:$0xff]  ;;  %v8477_v31 = vcombine.high %v3559_v24, %v3563_v25  ;;  %v8476_v41 = vcombine.low %v3559_v24, %v3563_v25 }
 0x534   :  { %7087 = vmatpush2.bf16.msra.mxu0 %v8770_v2  ;;  %v8605_v2 = vcombine.high %v3687_v6, %v3691_v27  ;;  %v3639_v25 = vld [vmem:[#allocation16 + $0x358] sm:$0xff] }
 0x535   :  { %7128 = vmatpush2.bf16.msra.mxu1 %v8898_v3  ;;  %7138 = vmatprep.subr.bf16.mxu0 %v8509_v14  ;;  %v3551_v3 = vld [vmem:[#allocation16 + $0x98] sm:$0xff] }
 0x536   :  { %7179 = vmatprep.subr.bf16.mxu1 %v8637_v32  ;;  %v3555_v14 = vld [vmem:[#allocation16 + $0xb8] sm:$0xff] }
 0x537   :  { %v6844_v63 = vpop.f32.mrf.mxu0  ;;  %7089 = vmatmul.mubr.bf16.vlgmr.msra.gmra.mxu0 %v10105_v51  ;;  %v3679_v32 = vld [vmem:[#allocation16 + $0x498] sm:$0xff]  ;;  %v8468_v61 = vcombine.low %v3551_v3, %v3555_v14 }
 0x538   :  { %v6845_v17 = vadd.f32 %v6844_v63, %v4057_v16  ;;  %v6885_v50 = vpop.f32.mrf.mxu1  ;;  %7130 = vmatmul.mubr.bf16.vlgmr.msra.gmra.mxu1 %v10109_v57  ;;  %7139 = vmatpush1.bf16.msra.mxu0 %v8508_v29  ;;  %v8604_v16 = vcombine.low %v3687_v6, %v3691_v27  ;;  %v8469_v29 = vcombine.high %v3551_v3, %v3555_v14  ;;  %v3643_v6 = vld [vmem:[#allocation16 + $0x378] sm:$0xff] }
 0x539   :  { %7170 = vmatprep.mubr.bf16.mxu0 %v10077_v37  ;;  %7180 = vmatpush1.bf16.msra.mxu1 %v8636_v55  ;;  %v6846_v59 = vpop.f32.mrf.mxu0  ;;  %v8597_v47 = vcombine.high %v3679_v32, %v3683_v36  ;;  %v3547_v55 = vld [vmem:[#allocation16 + $0x78] sm:$0xff]  ;;  %v8596_v62 = vcombine.low %v3679_v32, %v3683_v36 }
 0x53a   :  { %v10152_v15 = vadd.f32 %v6885_v50, %v6845_v17  ;;  %7211 = vmatprep.mubr.bf16.mxu1 %v10079_v38  ;;  %v6847_v56 = vadd.f32 %v6846_v59, %v4061_v58  ;;  %v6887_v53 = vpop.f32.mrf.mxu1  ;;  %7140 = vmatprep.subr.bf16.mxu0 %v8501_v60  ;;  %v8485_v38 = vcombine.high %v3567_v8, %v3571_v10  ;;  %v3671_v58 = vld [vmem:[#allocation16 + $0x458] sm:$0xff] }
 0x53b   :  { %v6848_v11 = vpop.f32.mrf.mxu0  ;;  %7181 = vmatprep.subr.bf16.mxu1 %v8629_v0  ;;  %v3675_v60 = vld [vmem:[#allocation16 + $0x478] sm:$0xff]  ;;  %v8461_v63 = vcombine.high %v3543_v18, %v3547_v55  ;;  %v8452_v10 = vcombine.low %v3535_v4, %v3539_v48 }
 0x53c   :  { %v10155_v46 = vadd.f32 %v6887_v53, %v6847_v56  ;;  %v6889_v37 = vpop.f32.mrf.mxu1  ;;  %7141 = vmatpush1.bf16.msra.mxu0 %v8500_v35  ;;  %v8589_v0 = vcombine.high %v3671_v58, %v3675_v60  ;;  %v3663_v17 = vld [vmem:[#allocation16 + $0x418] sm:$0xff]  ;;  %v8460_v35 = vcombine.low %v3543_v18, %v3547_v55  ;;  %v8588_v59 = vcombine.low %v3671_v58, %v3675_v60 }
 0x53d   :  { %7182 = vmatpush1.bf16.msra.mxu1 %v8628_v34  ;;  %v6849_v19 = vpop.f32.mrf.mxu0  ;;  %7142 = vmatprep.subr.bf16.mxu0 %v8493_v13  ;;  %v3667_v50 = vld [vmem:[#allocation16 + $0x438] sm:$0xff]  ;;  %v8453_v34 = vcombine.high %v3535_v4, %v3539_v48 }
 0x53e   :  { %v6890_v22 = vpop.f32.mrf.mxu1  ;;  %7183 = vmatprep.subr.bf16.mxu1 %v8621_v7  ;;  %v8581_v13 = vcombine.high %v3663_v17, %v3667_v50  ;;  %v3655_v56 = vld [vmem:[#allocation16 + $0x3d8] sm:$0xff]  ;;  %v8580_v11 = vcombine.low %v3663_v17, %v3667_v50 }
 0x53f   :  { %v3659_v53 = vld [vmem:[#allocation16 + $0x3f8] sm:$0xff] }
 0x540   :  { %7143 = vmatpush1.bf16.msra.mxu0 %v8492_v9  ;;  %v3783_v7 = vld [vmem:[#allocation16 + $0x7d8] sm:$0xff]  ;;  %v8573_v12 = vcombine.high %v3655_v56, %v3659_v53 }
 0x541   :  { %7184 = vmatpush1.bf16.msra.mxu1 %v8620_v20  ;;  %7144 = vmatprep.subr.bf16.mxu0 %v8485_v38  ;;  %v3787_v8 = vld [vmem:[#allocation16 + $0x7f8] sm:$0xff]  ;;  %v8572_v38 = vcombine.low %v3655_v56, %v3659_v53 }
 0x542   :  { %7185 = vmatprep.subr.bf16.mxu1 %v8613_v23  ;;  %v8701_v49 = vcombine.high %v3783_v7, %v3787_v8  ;;  %v3647_v37 = vld [vmem:[#allocation16 + $0x398] sm:$0xff]  ;;  %v8700_v22 = vcombine.low %v3783_v7, %v3787_v8 }
 0x543   :  { %v3651_v9 = vld [vmem:[#allocation16 + $0x3b8] sm:$0xff] }
 0x544   :  { %7145 = vmatpush1.bf16.msra.mxu0 %v8484_v28  ;;  %v3775_v19 = vld [vmem:[#allocation16 + $0x798] sm:$0xff]  ;;  %v8565_v23 = vcombine.high %v3647_v37, %v3651_v9 }
 0x545   :  { %7186 = vmatpush1.bf16.msra.mxu1 %v8612_v30  ;;  %7146 = vmatprep.subr.bf16.mxu0 %v8477_v31  ;;  %v3779_v20 = vld [vmem:[#allocation16 + $0x7b8] sm:$0xff]  ;;  %v8564_v30 = vcombine.low %v3647_v37, %v3651_v9 }
 0x546   :  { %7187 = vmatprep.subr.bf16.mxu1 %v8605_v2  ;;  %v8693_v24 = vcombine.high %v3775_v19, %v3779_v20  ;;  %v3767_v27 = vld [vmem:[#allocation16 + $0x758] sm:$0xff]  ;;  %v8692_v31 = vcombine.low %v3775_v19, %v3779_v20  ;;  %v8557_v2 = vcombine.high %v3639_v25, %v3643_v6 }
 0x547   :  { %v3771_v28 = vld [vmem:[#allocation16 + $0x778] sm:$0xff] }
 0x548   :  { %7147 = vmatpush1.bf16.msra.mxu0 %v8476_v41  ;;  %v8685_v3 = vcombine.high %v3767_v27, %v3771_v28  ;;  %v3631_v14 = vld [vmem:[#allocation16 + $0x318] sm:$0xff] }
 0x549   :  { %7188 = vmatpush1.bf16.msra.mxu1 %v8604_v16  ;;  %7148 = vmatprep.subr.bf16.mxu0 %v8469_v29  ;;  %v3635_v32 = vld [vmem:[#allocation16 + $0x338] sm:$0xff]  ;;  %v8556_v16 = vcombine.low %v3639_v25, %v3643_v6  ;;  %v8684_v29 = vcombine.low %v3767_v27, %v3771_v28 }
 0x54a   :  { %7189 = vmatprep.subr.bf16.mxu1 %v8597_v47  ;;  %v3759_v36 = vld [vmem:[#allocation16 + $0x718] sm:$0xff]  ;;  %v8549_v47 = vcombine.high %v3631_v14, %v3635_v32 }
 0x54b   :  { %v3763_v41 = vld [vmem:[#allocation16 + $0x738] sm:$0xff] }
 0x54c   :  { %7149 = vmatpush1.bf16.msra.mxu0 %v8468_v61  ;;  %v8677_v18 = vcombine.high %v3759_v36, %v3763_v41  ;;  %v3623_v55 = vld [vmem:[#allocation16 + $0x2d8] sm:$0xff] }
 0x54d   :  { %7190 = vmatpush1.bf16.msra.mxu1 %v8596_v62  ;;  %7150 = vmatprep.subr.bf16.mxu0 %v8461_v63  ;;  %v3627_v58 = vld [vmem:[#allocation16 + $0x2f8] sm:$0xff]  ;;  %v8548_v62 = vcombine.low %v3631_v14, %v3635_v32  ;;  %v8676_v63 = vcombine.low %v3759_v36, %v3763_v41 }
 0x54e   :  { %7191 = vmatprep.subr.bf16.mxu1 %v8589_v0  ;;  %v3751_v60 = vld [vmem:[#allocation16 + $0x6d8] sm:$0xff]  ;;  %v8541_v0 = vcombine.high %v3623_v55, %v3627_v58 }
 0x54f   :  { %v3755_v61 = vld [vmem:[#allocation16 + $0x6f8] sm:$0xff] }
 0x550   :  { %7151 = vmatpush1.bf16.msra.mxu0 %v8460_v35  ;;  %v8669_v4 = vcombine.high %v3751_v60, %v3755_v61  ;;  %v3615_v48 = vld [vmem:[#allocation16 + $0x298] sm:$0xff] }
 0x551   :  { %7192 = vmatpush1.bf16.msra.mxu1 %v8588_v59  ;;  %7152 = vmatprep.subr.bf16.mxu0 %v8453_v34  ;;  %v3619_v17 = vld [vmem:[#allocation16 + $0x2b8] sm:$0xff]  ;;  %v8540_v59 = vcombine.low %v3623_v55, %v3627_v58  ;;  %v8668_v34 = vcombine.low %v3751_v60, %v3755_v61 }
 0x552   :  { %7193 = vmatprep.subr.bf16.mxu1 %v8581_v13  ;;  %v3743_v50 = vld [vmem:[#allocation16 + $0x698] sm:$0xff]  ;;  %v8533_v13 = vcombine.high %v3615_v48, %v3619_v17 }
 0x553   :  { %v3747_v35 = vld [vmem:[#allocation16 + $0x6b8] sm:$0xff] }
 0x554   :  { %7153 = vmatpush1.bf16.msra.mxu0 %v8452_v10  ;;  %v8661_v56 = vcombine.high %v3743_v50, %v3747_v35  ;;  %v3607_v53 = vld [vmem:[#allocation16 + $0x258] sm:$0xff] }
 0x555   :  { %7194 = vmatpush1.bf16.msra.mxu1 %v8580_v11  ;;  %7154 = vmatprep.subr.bf16.mxu0 %v8573_v12  ;;  %v3611_v7 = vld [vmem:[#allocation16 + $0x278] sm:$0xff]  ;;  %v8532_v11 = vcombine.low %v3615_v48, %v3619_v17  ;;  %v8660_v12 = vcombine.low %v3743_v50, %v3747_v35 }
 0x556   :  { %7195 = vmatprep.subr.bf16.mxu1 %v8701_v49  ;;  %v3735_v8 = vld [vmem:[#allocation16 + $0x658] sm:$0xff]  ;;  %v8525_v49 = vcombine.high %v3607_v53, %v3611_v7 }
 0x557   :  { %v3739_v10 = vld [vmem:[#allocation16 + $0x678] sm:$0xff] }
 0x558   :  { %7155 = vmatpush2.bf16.msra.mxu0 %v8572_v38  ;;  %v8653_v37 = vcombine.high %v3735_v8, %v3739_v10  ;;  %v3599_v9 = vld [vmem:[#allocation16 + $0x218] sm:$0xff] }
 0x559   :  { %7196 = vmatpush2.bf16.msra.mxu1 %v8700_v22  ;;  %7156 = vmatprep.subr.bf16.mxu0 %v8565_v23  ;;  %v3603_v19 = vld [vmem:[#allocation16 + $0x238] sm:$0xff]  ;;  %v8524_v22 = vcombine.low %v3607_v53, %v3611_v7  ;;  %v8652_v23 = vcombine.low %v3735_v8, %v3739_v10 }
 0x55a   :  { %7197 = vmatprep.subr.bf16.mxu1 %v8693_v24  ;;  %v3727_v20 = vld [vmem:[#allocation16 + $0x618] sm:$0xff]  ;;  %v8517_v24 = vcombine.high %v3599_v9, %v3603_v19 }
 0x55b   :  { %v3731_v38 = vld [vmem:[#allocation16 + $0x638] sm:$0xff] }
 0x55c   :  { %7157 = vmatpush2.bf16.msra.mxu0 %v8564_v30  ;;  %v8645_v25 = vcombine.high %v3727_v20, %v3731_v38  ;;  %v3847_v6 = vld [vmem:[#allocation16 + $0x9d8] sm:$0xff] }
 0x55d   :  { %7198 = vmatpush2.bf16.msra.mxu1 %v8692_v31  ;;  %7158 = vmatprep.subr.bf16.mxu0 %v8557_v2  ;;  %v3851_v27 = vld [vmem:[#allocation16 + $0x9f8] sm:$0xff]  ;;  %v8516_v31 = vcombine.low %v3599_v9, %v3603_v19  ;;  %v8644_v2 = vcombine.low %v3727_v20, %v3731_v38 }
 0x55e   :  { %7199 = vmatprep.subr.bf16.mxu1 %v8685_v3  ;;  %v3975_v28 = vld [vmem:[#allocation16 + $0xdd8] sm:$0xff]  ;;  %v8765_v3 = vcombine.high %v3847_v6, %v3851_v27  ;;  %v8764_v41 = vcombine.low %v3847_v6, %v3851_v27 }
 0x55f   :  { %v3979_v30 = vld [vmem:[#allocation16 + $0xdf8] sm:$0xff] }
 0x560   :  { %7159 = vmatpush2.bf16.msra.mxu0 %v8556_v16  ;;  %v8893_v14 = vcombine.high %v3975_v28, %v3979_v30  ;;  %v3839_v32 = vld [vmem:[#allocation16 + $0x998] sm:$0xff] }
 0x561   :  { %7200 = vmatpush2.bf16.msra.mxu1 %v8684_v29  ;;  %7160 = vmatprep.subr.bf16.mxu0 %v8549_v47  ;;  %v3843_v36 = vld [vmem:[#allocation16 + $0x9b8] sm:$0xff]  ;;  %v8892_v47 = vcombine.low %v3975_v28, %v3979_v30 }
 0x562   :  { %7201 = vmatprep.subr.bf16.mxu1 %v8677_v18  ;;  %v3967_v16 = vld [vmem:[#allocation16 + $0xd98] sm:$0xff]  ;;  %v8757_v18 = vcombine.high %v3839_v32, %v3843_v36  ;;  %v8756_v48 = vcombine.low %v3839_v32, %v3843_v36 }
 0x563   :  { %v3971_v29 = vld [vmem:[#allocation16 + $0xdb8] sm:$0xff] }
 0x564   :  { %7161 = vmatpush2.bf16.msra.mxu0 %v8548_v62  ;;  %v3831_v55 = vld [vmem:[#allocation16 + $0x958] sm:$0xff]  ;;  %v8885_v61 = vcombine.high %v3967_v16, %v3971_v29  ;;  %v8884_v50 = vcombine.low %v3967_v16, %v3971_v29 }
 0x565   :  { %7202 = vmatpush2.bf16.msra.mxu1 %v8676_v63  ;;  %7162 = vmatprep.subr.bf16.mxu0 %v8541_v0  ;;  %v3835_v58 = vld [vmem:[#allocation16 + $0x978] sm:$0xff] }
 0x566   :  { %7203 = vmatprep.subr.bf16.mxu1 %v8669_v4  ;;  %v3959_v62 = vld [vmem:[#allocation16 + $0xd58] sm:$0xff]  ;;  %v8749_v35 = vcombine.high %v3831_v55, %v3835_v58  ;;  %v8748_v7 = vcombine.low %v3831_v55, %v3835_v58 }
 0x567   :  { %v3963_v63 = vld [vmem:[#allocation16 + $0xd78] sm:$0xff] }
 0x568   :  { %7163 = vmatpush2.bf16.msra.mxu0 %v8540_v59  ;;  %v3955_v53 = vld [vmem:[#allocation16 + $0xd38] sm:$0xff]  ;;  %v8876_v10 = vcombine.low %v3959_v62, %v3963_v63 }
 0x569   :  { %7204 = vmatpush2.bf16.msra.mxu1 %v8668_v34  ;;  %7164 = vmatprep.subr.bf16.mxu0 %v8533_v13  ;;  %v3823_v34 = vld [vmem:[#allocation16 + $0x918] sm:$0xff] }
 0x56a   :  { %7205 = vmatprep.subr.bf16.mxu1 %v8661_v56  ;;  %v3827_v13 = vld [vmem:[#allocation16 + $0x938] sm:$0xff] }
 0x56b   :  { %v3951_v56 = vld [vmem:[#allocation16 + $0xd18] sm:$0xff]  ;;  %v8740_v20 = vcombine.low %v3823_v34, %v3827_v13 }
 0x56c   :  { %7165 = vmatpush2.bf16.msra.mxu0 %v8532_v11  ;;  %v8741_v11 = vcombine.high %v3823_v34, %v3827_v13  ;;  %v3943_v9 = vld [vmem:[#allocation16 + $0xcd8] sm:$0xff]  ;;  %v8868_v38 = vcombine.low %v3951_v56, %v3955_v53 }
 0x56d   :  { %7206 = vmatpush2.bf16.msra.mxu1 %v8660_v12  ;;  %7166 = vmatprep.subr.bf16.mxu0 %v8525_v49  ;;  %v3815_v49 = vld [vmem:[#allocation16 + $0x8d8] sm:$0xff] }
 0x56e   :  { %7207 = vmatprep.subr.bf16.mxu1 %v8653_v37  ;;  %v3819_v37 = vld [vmem:[#allocation16 + $0x8f8] sm:$0xff] }
 0x56f   :  { %v3947_v19 = vld [vmem:[#allocation16 + $0xcf8] sm:$0xff]  ;;  %v8732_v28 = vcombine.low %v3815_v49, %v3819_v37 }
 0x570   :  { %7167 = vmatpush2.bf16.msra.mxu0 %v8524_v22  ;;  %v8733_v22 = vcombine.high %v3815_v49, %v3819_v37  ;;  %v3935_v6 = vld [vmem:[#allocation16 + $0xc98] sm:$0xff]  ;;  %v8860_v30 = vcombine.low %v3943_v9, %v3947_v19 }
 0x571   :  { %7208 = vmatpush2.bf16.msra.mxu1 %v8652_v23  ;;  %7168 = vmatprep.subr.bf16.mxu0 %v8517_v24  ;;  %v8861_v23 = vcombine.high %v3943_v9, %v3947_v19  ;;  %v3807_v24 = vld [vmem:[#allocation16 + $0x898] sm:$0xff] }
 0x572   :  { %7209 = vmatprep.subr.bf16.mxu1 %v8645_v25  ;;  %v3811_v25 = vld [vmem:[#allocation16 + $0x8b8] sm:$0xff] }
 0x573   :  { %v3939_v27 = vld [vmem:[#allocation16 + $0xcb8] sm:$0xff] }
 0x574   :  { %7169 = vmatpush2.bf16.msra.mxu0 %v8516_v31  ;;  %v8725_v31 = vcombine.high %v3807_v24, %v3811_v25  ;;  %v3927_v32 = vld [vmem:[#allocation16 + $0xc58] sm:$0xff]  ;;  %v8852_v16 = vcombine.low %v3935_v6, %v3939_v27 }
 0x575   :  { %7210 = vmatpush2.bf16.msra.mxu1 %v8644_v2  ;;  %7220 = vmatprep.subr.bf16.mxu0 %v8765_v3  ;;  %v8853_v2 = vcombine.high %v3935_v6, %v3939_v27  ;;  %v3799_v3 = vld [vmem:[#allocation16 + $0x858] sm:$0xff] }
 0x576   :  { %7261 = vmatprep.subr.bf16.mxu1 %v8893_v14  ;;  %v3803_v14 = vld [vmem:[#allocation16 + $0x878] sm:$0xff] }
 0x577   :  { %v6926_v60 = vpop.f32.mrf.mxu0  ;;  %7171 = vmatmul.mubr.bf16.vlgmr.msra.gmra.mxu0 %v10081_v39  ;;  %v3931_v36 = vld [vmem:[#allocation16 + $0xc78] sm:$0xff]  ;;  %v8717_v29 = vcombine.high %v3799_v3, %v3803_v14 }
 0x578   :  { %v6927_v0 = vadd.f32 %v6926_v60, %v10152_v15  ;;  %v6967_v4 = vpop.f32.mrf.mxu1  ;;  %7212 = vmatmul.mubr.bf16.vlgmr.msra.gmra.mxu1 %v10083_v40  ;;  %7221 = vmatpush1.bf16.msra.mxu0 %v8764_v41  ;;  %v8877_v15 = vcombine.high %v3959_v62, %v3963_v63  ;;  %v8724_v41 = vcombine.low %v3807_v24, %v3811_v25  ;;  %v3795_v55 = vld [vmem:[#allocation16 + $0x838] sm:$0xff] }
 0x579   :  { %7252 = vmatprep.mubr.bf16.mxu0 %v10103_v54  ;;  %7262 = vmatpush1.bf16.msra.mxu1 %v8892_v47  ;;  %v10161_v17 = vpop.f32.mrf.mxu0  ;;  %v8845_v47 = vcombine.high %v3927_v32, %v3931_v36  ;;  %v3919_v58 = vld [vmem:[#allocation16 + $0xc18] sm:$0xff]  ;;  %v8844_v62 = vcombine.low %v3927_v32, %v3931_v36 }
 0x57a   :  { %v10163_v59 = vadd.f32 %v6967_v4, %v6927_v0  ;;  %7293 = vmatprep.mubr.bf16.mxu1 %v10107_v52  ;;  %v10166_v39 = vpop.f32.mrf.mxu1  ;;  %7222 = vmatprep.subr.bf16.mxu0 %v8757_v18  ;;  %v8869_v52 = vcombine.high %v3951_v56, %v3955_v53  ;;  %v3791_v18 = vld [vmem:[#allocation16 + $0x818] sm:$0xff] }
 0x57b   :  { %v6930_v40 = vpop.f32.mrf.mxu0  ;;  %7263 = vmatprep.subr.bf16.mxu1 %v8885_v61  ;;  %v3923_v60 = vld [vmem:[#allocation16 + $0xc38] sm:$0xff]  ;;  %v8716_v61 = vcombine.low %v3799_v3, %v3803_v14  ;;  %v8709_v63 = vcombine.high %v3791_v18, %v3795_v55 }
 0x57c   :  { %v6971_v54 = vpop.f32.mrf.mxu1  ;;  %7223 = vmatpush1.bf16.msra.mxu0 %v8756_v48  ;;  %v8837_v0 = vcombine.high %v3919_v58, %v3923_v60  ;;  %v3911_v4 = vld [vmem:[#allocation16 + $0xbd8] sm:$0xff]  ;;  %v8836_v34 = vcombine.low %v3919_v58, %v3923_v60 }
 0x57d   :  { %7264 = vmatpush1.bf16.msra.mxu1 %v8884_v50  ;;  %v6931_v8 = vpop.f32.mrf.mxu0  ;;  %7224 = vmatprep.subr.bf16.mxu0 %v8749_v35  ;;  %v3915_v48 = vld [vmem:[#allocation16 + $0xbf8] sm:$0xff] }
 0x57e   :  { %v6972_v12 = vpop.f32.mrf.mxu1  ;;  %7265 = vmatprep.subr.bf16.mxu1 %v8877_v15  ;;  %v4039_v50 = vld [vmem:[#allocation16 + $0xfd8] sm:$0xff]  ;;  %v8708_v15 = vcombine.low %v3791_v18, %v3795_v55  ;;  %v8829_v13 = vcombine.high %v3911_v4, %v3915_v48  ;;  %v8828_v8 = vcombine.low %v3911_v4, %v3915_v48 }
 0x57f   :  { %v4043_v35 = vld [vmem:[#allocation16 + $0xff8] sm:$0xff] }
 0x580   :  { %7225 = vmatpush1.bf16.msra.mxu0 %v8748_v7  ;;  %v8957_v40 = vcombine.high %v4039_v50, %v4043_v35  ;;  %v3903_v56 = vld [vmem:[#allocation16 + $0xb98] sm:$0xff] }
 0x581   :  { %7266 = vmatpush1.bf16.msra.mxu1 %v8876_v10  ;;  %7226 = vmatprep.subr.bf16.mxu0 %v8741_v11  ;;  %v3907_v53 = vld [vmem:[#allocation16 + $0xbb8] sm:$0xff]  ;;  %v8956_v10 = vcombine.low %v4039_v50, %v4043_v35 }
 0x582   :  { %7267 = vmatprep.subr.bf16.mxu1 %v8869_v52  ;;  %v4031_v54 = vld [vmem:[#allocation16 + $0xf98] sm:$0xff]  ;;  %v8821_v11 = vcombine.high %v3903_v56, %v3907_v53  ;;  %v8820_v19 = vcombine.low %v3903_v56, %v3907_v53 }
 0x583   :  { %v4035_v7 = vld [vmem:[#allocation16 + $0xfb8] sm:$0xff] }
 0x584   :  { %7227 = vmatpush1.bf16.msra.mxu0 %v8740_v20  ;;  %v8949_v12 = vcombine.high %v4031_v54, %v4035_v7  ;;  %v3895_v52 = vld [vmem:[#allocation16 + $0xb58] sm:$0xff]  ;;  %v8948_v20 = vcombine.low %v4031_v54, %v4035_v7  ;;  %v6929_v7 = vadd.f32 %v10161_v17, %v10155_v46  ;;  %v7303_v46 = vmax.f32 %v10143_v5, 0.0 }
 0x585   :  { %7268 = vmatpush1.bf16.msra.mxu1 %v8868_v38  ;;  %7228 = vmatprep.subr.bf16.mxu0 %v8733_v22  ;;  %v3899_v49 = vld [vmem:[#allocation16 + $0xb78] sm:$0xff] }
 0x586   :  { %7269 = vmatprep.subr.bf16.mxu1 %v8861_v23  ;;  %v4023_v37 = vld [vmem:[#allocation16 + $0xf58] sm:$0xff]  ;;  %v8813_v38 = vcombine.high %v3895_v52, %v3899_v49  ;;  %v8812_v27 = vcombine.low %v3895_v52, %v3899_v49  ;;  %v6970_v52 = vadd.f32 %v10166_v39, %v6929_v7  ;;  %v9432_v7 = vld [vmem:[#allocation19 + $0x1f8] sm:$0xff]  }
 0x587   :  { %v4027_v9 = vld [vmem:[#allocation16 + $0xf78] sm:$0xff] }
 0x588   :  { %7229 = vmatpush1.bf16.msra.mxu0 %v8732_v28  ;;  %v8941_v22 = vcombine.high %v4023_v37, %v4027_v9  ;;  %v3887_v23 = vld [vmem:[#allocation16 + $0xb18] sm:$0xff]  ;;  %v8940_v28 = vcombine.low %v4023_v37, %v4027_v9  ;;  %v9384_v9 = vld [vmem:[#allocation19 + $0x78] sm:$0xff]   ;;  %v7305_v17 = vmax.f32 %v6970_v52, 0.0 }
 0x589   :  { %7270 = vmatpush1.bf16.msra.mxu1 %v8860_v30  ;;  %7230 = vmatprep.subr.bf16.mxu0 %v8725_v31  ;;  %v3891_v24 = vld [vmem:[#allocation16 + $0xb38] sm:$0xff] }
 0x58a   :  { %7271 = vmatprep.subr.bf16.mxu1 %v8853_v2  ;;  %v4015_v25 = vld [vmem:[#allocation16 + $0xf18] sm:$0xff]  ;;  %v8805_v30 = vcombine.high %v3887_v23, %v3891_v24  ;;  %v8804_v36 = vcombine.low %v3887_v23, %v3891_v24  ;;  %v7311_v23 = vpack.c.bf16 %v7303_v46, %v7303_v46  ;;  %v9422_v46 = vld [vmem:[#allocation19 + $0x160] sm:$0xff]  }
 0x58b   :  { %v4019_v6 = vld [vmem:[#allocation16 + $0xf38] sm:$0xff] }
 0x58c   :  { %7231 = vmatpush1.bf16.msra.mxu0 %v8724_v41  ;;  %v8933_v31 = vcombine.high %v4015_v25, %v4019_v6  ;;  %v3879_v2 = vld [vmem:[#allocation16 + $0xad8] sm:$0xff]  ;;  %v8932_v41 = vcombine.low %v4015_v25, %v4019_v6  ;;  %v7313_v25 = vpack.c.bf16 %v7305_v17, %v7305_v17  ;;  %v9437_v17 = vld [vmem:[#allocation19 + $0x1a8] sm:$0xff]  }
 0x58d   :  { %7272 = vmatpush1.bf16.msra.mxu1 %v8852_v16  ;;  %7232 = vmatprep.subr.bf16.mxu0 %v8717_v29  ;;  %v3883_v3 = vld [vmem:[#allocation16 + $0xaf8] sm:$0xff] }
 0x58e   :  { %7273 = vmatprep.subr.bf16.mxu1 %v8845_v47  ;;  %v4007_v14 = vld [vmem:[#allocation16 + $0xed8] sm:$0xff]  ;;  %v8797_v16 = vcombine.high %v3879_v2, %v3883_v3  ;;  %v8796_v60 = vcombine.low %v3879_v2, %v3883_v3  ;;  %v9393_v2 = vld [vmem:[#allocation19 + $0xe8] sm:$0xff]  }
 0x58f   :  { %v4011_v32 = vld [vmem:[#allocation16 + $0xef8] sm:$0xff] }
 0x590   :  { %7233 = vmatpush1.bf16.msra.mxu0 %v8716_v61  ;;  %v8925_v29 = vcombine.high %v4007_v14, %v4011_v32  ;;  %v3871_v47 = vld [vmem:[#allocation16 + $0xa98] sm:$0xff]  ;;  %v8924_v61 = vcombine.low %v4007_v14, %v4011_v32  ;;  %v9394_v14 = vld [vmem:[#allocation19 + $0x28] sm:$0xff]  }
 0x591   :  { %7274 = vmatpush1.bf16.msra.mxu1 %v8844_v62  ;;  %7234 = vmatprep.subr.bf16.mxu0 %v8709_v63  ;;  %v3875_v18 = vld [vmem:[#allocation16 + $0xab8] sm:$0xff]  ;;  %v9395_v32 = vld [vmem:[#allocation19 + $0xa8] sm:$0xff]  }
 0x592   :  { %7275 = vmatprep.subr.bf16.mxu1 %v8837_v0  ;;  %v3999_v55 = vld [vmem:[#allocation16 + $0xe98] sm:$0xff]  ;;  %v8789_v62 = vcombine.high %v3871_v47, %v3875_v18  ;;  %v8788_v35 = vcombine.low %v3871_v47, %v3875_v18  ;;  %v9399_v47 = vld [vmem:[#allocation19 + $0xa0] sm:$0xff]   ;;  %v9400_v18 = vld [vmem:[#allocation19 + $0x58] sm:$0xff]  }
 0x593   :  { %v4003_v58 = vld [vmem:[#allocation16 + $0xeb8] sm:$0xff] }
 0x594   :  { %7235 = vmatpush1.bf16.msra.mxu0 %v8708_v15  ;;  %v8917_v63 = vcombine.high %v3999_v55, %v4003_v58  ;;  %v3863_v0 = vld [vmem:[#allocation16 + $0xa58] sm:$0xff]  ;;  %v8916_v15 = vcombine.low %v3999_v55, %v4003_v58  ;;  %v9401_v55 = vld [vmem:[#allocation19 + $0xd8] sm:$0xff]  }
 0x595   :  { %7276 = vmatpush1.bf16.msra.mxu1 %v8836_v34  ;;  %7236 = vmatprep.subr.bf16.mxu0 %v8829_v13  ;;  %v3867_v4 = vld [vmem:[#allocation16 + $0xa78] sm:$0xff]  ;;  %v9402_v58 = vld [vmem:[#allocation19 + $0x18] sm:$0xff]  }
 0x596   :  { %7277 = vmatprep.subr.bf16.mxu1 %v8957_v40  ;;  %v3991_v48 = vld [vmem:[#allocation16 + $0xe58] sm:$0xff]  ;;  %v8781_v34 = vcombine.high %v3863_v0, %v3867_v4 }
 0x597   :  { %v3995_v50 = vld [vmem:[#allocation16 + $0xe78] sm:$0xff] }
 0x598   :  { %7237 = vmatpush2.bf16.msra.mxu0 %v8828_v8  ;;  %v8909_v13 = vcombine.high %v3991_v48, %v3995_v50  ;;  %v3855_v40 = vld [vmem:[#allocation16 + $0xa18] sm:$0xff]  ;;  %v8780_v8 = vcombine.low %v3863_v0, %v3867_v4  ;;  %v9408_v4 = vld [vmem:[#allocation19 + $0x48] sm:$0xff]  }
 0x599   :  { %7278 = vmatpush2.bf16.msra.mxu1 %v8956_v10  ;;  %7238 = vmatprep.subr.bf16.mxu0 %v8821_v11  ;;  %v3859_v56 = vld [vmem:[#allocation16 + $0xa38] sm:$0xff]  ;;  %v8908_v10 = vcombine.low %v3991_v48, %v3995_v50  ;;  %v9409_v48 = vld [vmem:[#allocation19 + $0xc8] sm:$0xff]  }
 0x59a   :  { %7279 = vmatprep.subr.bf16.mxu1 %v8949_v12  ;;  %v3983_v53 = vld [vmem:[#allocation16 + $0xe18] sm:$0xff]  ;;  %v8773_v11 = vcombine.high %v3855_v40, %v3859_v56  ;;  %v8772_v49 = vcombine.low %v3855_v40, %v3859_v56  ;;  %v9410_v50 = vld [vmem:[#allocation19 + $0x8] sm:$0xff]   ;;  %v7302_v40 = vmax.f32 %v10139_v1, 0.0  ;;  %v9415_v56 = vld [vmem:[#allocation19 + $0x80] sm:$0xff]  }
 0x59b   :  { %v3987_v54 = vld [vmem:[#allocation16 + $0xe38] sm:$0xff] }
 0x59c   :  { %7239 = vmatpush2.bf16.msra.mxu0 %v8820_v19  ;;  %v8901_v12 = vcombine.high %v3983_v53, %v3987_v54  ;;  %v8900_v37 = vcombine.low %v3983_v53, %v3987_v54  ;;  %v9385_v19 = vld [vmem:[#allocation19 + $0xf8] sm:$0xff]   ;;  %v9389_v24 = vld [vmem:[#allocation19 + $0xf0] sm:$0xff]   ;;  %v7304_v54 = vmax.f32 %v10163_v59, 0.0 }
 0x59d   :  { %7280 = vmatpush2.bf16.msra.mxu1 %v8948_v20  ;;  %7240 = vmatprep.subr.bf16.mxu0 %v8813_v38  ;;  %v9386_v20 = vld [vmem:[#allocation19 + $0x38] sm:$0xff]   ;;  %v9390_v5 = vld [vmem:[#allocation19 + $0x30] sm:$0xff]  }
 0x59e   :  { %7281 = vmatprep.subr.bf16.mxu1 %v8941_v22  ;;  %v9387_v38 = vld [vmem:[#allocation19 + $0xb8] sm:$0xff]   ;;  %v9388_v22 = vld [vmem:[#allocation19 + $0x70] sm:$0xff]   ;;  %v7312_v52 = vpack.c.bf16 %v7304_v54, %v7304_v54 }
 0x59f   :  { %v9407_v0 = vld [vmem:[#allocation19 + $0x90] sm:$0xff]   ;;  %v9416_v53 = vld [vmem:[#allocation19 + $0x178] sm:$0xff]  }
 0x5a0   :  { %7241 = vmatpush2.bf16.msra.mxu0 %v8812_v27  ;;  %v9419_v1 = vld [vmem:[#allocation19 + $0x130] sm:$0xff]  }
 0x5a1   :  { %7282 = vmatpush2.bf16.msra.mxu1 %v8940_v28  ;;  %7242 = vmatprep.subr.bf16.mxu0 %v8805_v30  ;;  %v9391_v28 = vld [vmem:[#allocation19 + $0xb0] sm:$0xff]   ;;  %v9392_v30 = vld [vmem:[#allocation19 + $0x68] sm:$0xff]  }
 0x5a2   :  { %7283 = vmatprep.subr.bf16.mxu1 %v8933_v31  ;;  %v9435_v59 = vld [vmem:[#allocation19 + $0x1b0] sm:$0xff]  }
 0x5a4   :  { %7243 = vmatpush2.bf16.msra.mxu0 %v8804_v36  ;;  %v9396_v36 = vld [vmem:[#allocation19 + $0x60] sm:$0xff]  }
 0x5a5   :  { %7284 = vmatpush2.bf16.msra.mxu1 %v8932_v41  ;;  %7244 = vmatprep.subr.bf16.mxu0 %v8797_v16  ;;  %v9397_v16 = vld [vmem:[#allocation19 + $0xe0] sm:$0xff]  }
 0x5a6   :  { %7285 = vmatprep.subr.bf16.mxu1 %v8925_v29  ;;  %v9398_v29 = vld [vmem:[#allocation19 + $0x20] sm:$0xff]  }
 0x5a8   :  { %7245 = vmatpush2.bf16.msra.mxu0 %v8796_v60  ;;  %v9403_v60 = vld [vmem:[#allocation19 + $0x98] sm:$0xff]  }
 0x5a9   :  { %7286 = vmatpush2.bf16.msra.mxu1 %v8924_v61  ;;  %7246 = vmatprep.subr.bf16.mxu0 %v8789_v62  ;;  %v9404_v61 = vld [vmem:[#allocation19 + $0x50] sm:$0xff]  }
 0x5aa   :  { %7287 = vmatprep.subr.bf16.mxu1 %v8917_v63  ;;  %v9405_v62 = vld [vmem:[#allocation19 + $0xd0] sm:$0xff]  }
 0x5ab   :  { %v9406_v63 = vld [vmem:[#allocation19 + $0x10] sm:$0xff]  }
 0x5ac   :  { %7247 = vmatpush2.bf16.msra.mxu0 %v8788_v35  ;;  %v9411_v35 = vld [vmem:[#allocation19 + $0x88] sm:$0xff]  }
 0x5ad   :  { %7288 = vmatpush2.bf16.msra.mxu1 %v8916_v15  ;;  %7248 = vmatprep.subr.bf16.mxu0 %v8781_v34  ;;  %v9412_v15 = vld [vmem:[#allocation19 + $0x40] sm:$0xff]  }
 0x5ae   :  { %7289 = vmatprep.subr.bf16.mxu1 %v8909_v13  ;;  %v9413_v34 = vld [vmem:[#allocation19 + $0xc0] sm:$0xff]  }
 0x5af   :  { %v9414_v13 = vld [vmem:[#allocation19] sm:$0xff]  }
 0x5b0   :  { %7249 = vmatpush2.bf16.msra.mxu0 %v8780_v8  ;;  %v9417_v8 = vld [vmem:[#allocation19 + $0x138] sm:$0xff]  }
 0x5b1   :  { %7290 = vmatpush2.bf16.msra.mxu1 %v8908_v10  ;;  %7250 = vmatprep.subr.bf16.mxu0 %v8773_v11  ;;  %v7310_v10 = vpack.c.bf16 %v7302_v40, %v7302_v40  ;;  %v9418_v11 = vld [vmem:[#allocation19 + $0x170] sm:$0xff]  }
 0x5b2   :  { %7291 = vmatprep.subr.bf16.mxu1 %v8901_v12  ;;  %v9433_v12 = vld [vmem:[#allocation19 + $0x1b8] sm:$0xff]  }
 0x5b4   :  { %7251 = vmatpush2.bf16.msra.mxu0 %v8772_v49  ;;  %v9434_v49 = vld [vmem:[#allocation19 + $0x1f0] sm:$0xff]  }
 0x5b5   :  { %7292 = vmatpush2.bf16.msra.mxu1 %v8900_v37  ;;  %9111 = vmatprep.subr.bf16.mxu0 %v9384_v9  ;;  %v9420_v37 = vld [vmem:[#allocation19 + $0x168] sm:$0xff]  }
 0x5b6   :  { %9133 = vmatprep.subr.bf16.mxu1 %v9385_v19  ;;  %v9436_v9 = vld [vmem:[#allocation19 + $0x1e8] sm:$0xff]  }
 0x5b7   :  { %v10172_v39 = vpop.f32.mrf.mxu0  ;;  %7253 = vmatmul.mubr.bf16.vlgmr.msra.gmra.mxu0 %v10105_v51  ;;  %v9421_v19 = vld [vmem:[#allocation19 + $0x128] sm:$0xff]  }
 0x5b8   :  { %v10175_v6 = vpop.f32.mrf.mxu1  ;;  %7294 = vmatmul.mubr.bf16.vlgmr.msra.gmra.mxu1 %v10109_v57  ;;  %9112 = vmatpush3.bf16.msra.mxu0 %v9386_v20  ;;  %v9438_v20 = vld [vmem:[#allocation19 + $0x1e0] sm:$0xff]  }
 0x5b9   :  { %7869 = vmatprep.mubr.bf16.mxu0 %v7311_v23  ;;  %9134 = vmatpush3.bf16.msra.mxu1 %v9387_v38  ;;  %v10178_v27 = vpop.f32.mrf.mxu0  ;;  %v9423_v38 = vld [vmem:[#allocation19 + $0x120] sm:$0xff]  }
 0x5ba   :  { %7909 = vmatprep.mubr.bf16.mxu1 %v7313_v25  ;;  %v10180_v31 = vpop.f32.mrf.mxu1  ;;  %9113 = vmatprep.subr.bf16.mxu0 %v9388_v22  ;;  %v9424_v22 = vld [vmem:[#allocation19 + $0x158] sm:$0xff]   ;;  %v9439_v23 = vld [vmem:[#allocation19 + $0x1a0] sm:$0xff]  }
 0x5bb   :  { %v7012_v51 = vpop.f32.mrf.mxu0  ;;  %9135 = vmatprep.subr.bf16.mxu1 %v9389_v24  ;;  %v9440_v24 = vld [vmem:[#allocation19 + $0x1d8] sm:$0xff]  }
 0x5bc   :  { %v7053_v3 = vpop.f32.mrf.mxu1  ;;  %9114 = vmatpush3.bf16.msra.mxu0 %v9390_v5  ;;  %v9425_v25 = vld [vmem:[#allocation19 + $0x118] sm:$0xff]   ;;  %v9426_v5 = vld [vmem:[#allocation19 + $0x150] sm:$0xff]   ;;  %v9429_v51 = vld [vmem:[#allocation19 + $0x108] sm:$0xff]  }
 0x5bd   :  { %9136 = vmatpush3.bf16.msra.mxu1 %v9391_v28  ;;  %v7013_v57 = vpop.f32.mrf.mxu0  ;;  %9115 = vmatprep.subr.bf16.mxu0 %v9392_v30  ;;  %v9441_v28 = vld [vmem:[#allocation19 + $0x198] sm:$0xff]   ;;  %v9427_v30 = vld [vmem:[#allocation19 + $0x110] sm:$0xff]   ;;  %v9430_v3 = vld [vmem:[#allocation19 + $0x140] sm:$0xff]  }
 0x5be   :  { %v7054_v41 = vpop.f32.mrf.mxu1  ;;  %9137 = vmatprep.subr.bf16.mxu1 %v9393_v2  ;;  %v9428_v2 = vld [vmem:[#allocation19 + $0x148] sm:$0xff]  }
 0x5c0   :  { %9116 = vmatpush3.bf16.msra.mxu0 %v9394_v14  ;;  %v9464_v14 = vld [vmem:[#allocation17] sm:$0xff] }
 0x5c1   :  { %9138 = vmatpush3.bf16.msra.mxu1 %v9395_v32  ;;  %9117 = vmatprep.subr.bf16.mxu0 %v9396_v36  ;;  %v4065_v57 = vrot.slane %v9464_v14, %v10019_v42  ;;  %v4069_v32 = vrot.slane %v9464_v14, %v10025_v44  ;;  %v9431_v36 = vld [vmem:[#allocation19 + $0x100] sm:$0xff]  }
 0x5c2   :  { %9139 = vmatprep.subr.bf16.mxu1 %v9397_v16 }
 0x5c3   :  { %v7009_v41 = vadd.f32 %v10172_v39, %v4065_v57  ;;  %v7011_v16 = vadd.f32 %v10178_v27, %v4069_v32  ;;  %v9444_v39 = vld [vmem:[#allocation19 + $0x1c8] sm:$0xff]   ;;  %v8958_v57 = vld [vmem:[#allocation20] ss:$0 sm:$0xff] }
 0x5c4   :  { %9118 = vmatpush3.bf16.msra.mxu0 %v9398_v29 }
 0x5c5   :  { %9140 = vmatpush3.bf16.msra.mxu1 %v9399_v47  ;;  %9119 = vmatprep.subr.bf16.mxu0 %v9400_v18  ;;  %v7050_v29 = vadd.f32 %v10175_v6, %v7009_v41  ;;  %v9442_v18 = vld [vmem:[#allocation19 + $0x1d0] sm:$0xff]  }
 0x5c6   :  { %9141 = vmatprep.subr.bf16.mxu1 %v9401_v55  ;;  %v7052_v55 = vadd.f32 %v10180_v31, %v7011_v16  ;;  %v9446_v31 = vld [vmem:[#allocation19 + $0x1c0] sm:$0xff]  }
 0x5c8   :  { %9120 = vmatpush3.bf16.msra.mxu0 %v9402_v58 }
 0x5c9   :  { %9142 = vmatpush3.bf16.msra.mxu1 %v9403_v60  ;;  %9121 = vmatprep.subr.bf16.mxu0 %v9404_v61  ;;  %v9443_v61 = vld [vmem:[#allocation19 + $0x190] sm:$0xff]  }
 0x5ca   :  { %9143 = vmatprep.subr.bf16.mxu1 %v9405_v62 }
 0x5cc   :  { %9122 = vmatpush3.bf16.msra.mxu0 %v9406_v63 }
 0x5cd   :  { %9144 = vmatpush3.bf16.msra.mxu1 %v9407_v0  ;;  %9123 = vmatprep.subr.bf16.mxu0 %v9408_v4 }
 0x5ce   :  { %9145 = vmatprep.subr.bf16.mxu1 %v9409_v48  ;;  %v9445_v48 = vld [vmem:[#allocation19 + $0x188] sm:$0xff]  }
 0x5d0   :  { %9124 = vmatpush3.bf16.msra.mxu0 %v9410_v50 }
 0x5d1   :  { %9146 = vmatpush3.bf16.msra.mxu1 %v9411_v35  ;;  %9125 = vmatprep.subr.bf16.mxu0 %v9412_v15 }
 0x5d2   :  { %9147 = vmatprep.subr.bf16.mxu1 %v9413_v34 }
 0x5d4   :  { %9126 = vmatpush3.bf16.msra.mxu0 %v9414_v13  ;;  %v9447_v13 = vld [vmem:[#allocation19 + $0x180] sm:$0xff]  }
 0x5d5   :  { %9148 = vmatpush3.bf16.msra.mxu1 %v9415_v56  ;;  %9155 = vmatprep.subr.bf16.mxu0 %v9416_v53 }
 0x5d6   :  { %9177 = vmatprep.subr.bf16.mxu1 %v9432_v7 }
 0x5d7   :  { %7870 = vmatmul.mubr.bf16.vlgmr.msra.gmra.mxu0 %v7310_v10 }
 0x5d8   :  { %7910 = vmatmul.mubr.bf16.vlgmr.msra.gmra.mxu1 %v7312_v52  ;;  %9156 = vmatpush3.bf16.msra.mxu0 %v9417_v8  ;;  %v4073_v52 = vrot.slane %v9464_v14, %v10022_v43 }
 0x5d9   :  { %9157 = vmatprep.subr.bf16.mxu0 %v9418_v11  ;;  %9178 = vmatpush3.bf16.msra.mxu1 %v9433_v12 }
 0x5da   :  { %9179 = vmatprep.subr.bf16.mxu1 %v9434_v49  ;;  %v4077_v49 = vrot.slane %v9464_v14, %v10028_v45 }
 0x5dc   :  { %9158 = vmatpush3.bf16.msra.mxu0 %v9419_v1 }
 0x5dd   :  { %9159 = vmatprep.subr.bf16.mxu0 %v9420_v37  ;;  %9180 = vmatpush3.bf16.msra.mxu1 %v9435_v59 }
 0x5de   :  { %9181 = vmatprep.subr.bf16.mxu1 %v9436_v9 }
 0x5e0   :  { %9160 = vmatpush3.bf16.msra.mxu0 %v9421_v19 }
 0x5e1   :  { %9161 = vmatprep.subr.bf16.mxu0 %v9422_v46  ;;  %9182 = vmatpush3.bf16.msra.mxu1 %v9437_v17 }
 0x5e2   :  { %9183 = vmatprep.subr.bf16.mxu1 %v9438_v20 }
 0x5e4   :  { %9162 = vmatpush3.bf16.msra.mxu0 %v9423_v38 }
 0x5e5   :  { %9163 = vmatprep.subr.bf16.mxu0 %v9424_v22  ;;  %9184 = vmatpush3.bf16.msra.mxu1 %v9439_v23 }
 0x5e6   :  { %9185 = vmatprep.subr.bf16.mxu1 %v9440_v24 }
 0x5e8   :  { %9164 = vmatpush3.bf16.msra.mxu0 %v9425_v25 }
 0x5e9   :  { %9165 = vmatprep.subr.bf16.mxu0 %v9426_v5  ;;  %9186 = vmatpush3.bf16.msra.mxu1 %v9441_v28 }
 0x5ea   :  { %9187 = vmatprep.subr.bf16.mxu1 %v9442_v18 }
 0x5ec   :  { %9166 = vmatpush3.bf16.msra.mxu0 %v9427_v30 }
 0x5ed   :  { %9167 = vmatprep.subr.bf16.mxu0 %v9428_v2  ;;  %9188 = vmatpush3.bf16.msra.mxu1 %v9443_v61 }
 0x5ee   :  { %9189 = vmatprep.subr.bf16.mxu1 %v9444_v39 }
 0x5f0   :  { %9168 = vmatpush3.bf16.msra.mxu0 %v9429_v51 }
 0x5f1   :  { %9169 = vmatprep.subr.bf16.mxu0 %v9430_v3  ;;  %9190 = vmatpush3.bf16.msra.mxu1 %v9445_v48 }
 0x5f2   :  { %9191 = vmatprep.subr.bf16.mxu1 %v9446_v31  ;;  %v2515_v31 = vsel %vm2514_vm3, %v10065_v33, -inf }
 0x5f4   :  { %9170 = vmatpush3.bf16.msra.mxu0 %v9431_v36 }
 0x5f5   :  { %9192 = vmatpush3.bf16.msra.mxu1 %v9447_v13 }
 0x5f7   :  { %v7090_v47 = vpop.f32.mrf.mxu0 }
 0x5f8   :  { %v7091_v58 = vadd.f32 %v7090_v47, %v7050_v29  ;;  %v7131_v60 = vpop.f32.mrf.mxu1 }
 0x5f9   :  { %v7092_v42 = vpop.f32.mrf.mxu0 }
 0x5fa   :  { %v7132_v44 = vadd.f32 %v7131_v60, %v7091_v58  ;;  %v7093_v62 = vadd.f32 %v7092_v42, %v7052_v55  ;;  %v7133_v63 = vpop.f32.mrf.mxu1 }
 0x5fb   :  { %v7094_v0 = vpop.f32.mrf.mxu0 }
 0x5fc   :  { %v7134_v4 = vadd.f32 %v7133_v63, %v7093_v62  ;;  %v7135_v27 = vpop.f32.mrf.mxu1  ;;  %v7306_v50 = vmax.f32 %v7132_v44, 0.0 }
 0x5fd   :  { %v7095_v6 = vpop.f32.mrf.mxu0 }
 0x5fe   :  { %v7307_v35 = vmax.f32 %v7134_v4, 0.0  ;;  %v7136_v15 = vpop.f32.mrf.mxu1  ;;  %v7314_v40 = vpack.c.bf16 %v7306_v50, %v7306_v50 }
 0x5ff   :  { %v2527_v15 = vld [vmem:[%s10213_s1] sm:$0x3f]  ;;  %s9760_s1 = smov 127  }
 0x600   :  { %v7315_v34 = vpack.c.bf16 %v7307_v35, %v7307_v35 }
 0x602   :  { %7949 = vmatprep.mubr.bf16.mxu0 %v7315_v34  ;;  %v2528_v34 = vmul.f32 %v2527_v15, %v10065_v33 }
 0x603   :  { %7950 = vmatmul.mubr.bf16.vlgmr.msra.gmra.mxu0 %v7314_v40 }
 0x604   :  { %v2529_v13 = vsel %vm2514_vm3, %v2528_v34, 0.0 }
 0x637   :  { %v7172_v56 = vpop.f32.mrf.mxu0 }
 0x638   :  { %v7213_v53 = vpop.f32.mrf.mxu1  ;;  %v7173_v1 = vadd.f32 %v7172_v56, %v4073_v52 }
 0x639   :  { %v7174_v54 = vpop.f32.mrf.mxu0 }
 0x63a   :  { %v7215_v7 = vpop.f32.mrf.mxu1  ;;  %v7175_v37 = vadd.f32 %v7174_v54, %v4077_v49  ;;  %v7214_v59 = vadd.f32 %v7213_v53, %v7173_v1 }
 0x63b   :  { %v7176_v8 = vpop.f32.mrf.mxu0 }
 0x63c   :  { %v7217_v10 = vpop.f32.mrf.mxu1  ;;  %v7216_v19 = vadd.f32 %v7215_v7, %v7175_v37 }
 0x63d   :  { %v7177_v11 = vpop.f32.mrf.mxu0 }
 0x63e   :  { %v7218_v12 = vpop.f32.mrf.mxu1 }
 0x677   :  { %v7254_v9 = vpop.f32.mrf.mxu0 }
 0x678   :  { %v7255_v46 = vadd.f32 %v7254_v9, %v7214_v59  ;;  %v7295_v17 = vpop.f32.mrf.mxu1 }
 0x679   :  { %v7256_v20 = vpop.f32.mrf.mxu0 }
 0x67a   :  { %v7296_v38 = vadd.f32 %v7295_v17, %v7255_v46  ;;  %v7257_v22 = vadd.f32 %v7256_v20, %v7216_v19  ;;  %v7297_v23 = vpop.f32.mrf.mxu1  ;;  %v8018_v19 = vmul.f32 2.0, %v9934_v26 }
 0x67b   :  { %v7258_v24 = vpop.f32.mrf.mxu0 }
 0x67c   :  { %v7298_v25 = vadd.f32 %v7297_v23, %v7257_v22  ;;  %v7299_v5 = vpop.f32.mrf.mxu1  ;;  %v7308_v28 = vmax.f32 %v7296_v38, 0.0 }
 0x67d   :  { %v7259_v30 = vpop.f32.mrf.mxu0  ;;  %v8019_v5 = vadd.f32 %v9930_v21, %v8018_v19 }
 0x67e   :  { %v7309_v2 = vmax.f32 %v7298_v25, 0.0  ;;  %v7300_v43 = vpop.f32.mrf.mxu1  ;;  %v7316_v45 = vpack.c.bf16 %v7308_v28, %v7308_v28 }
 0x680   :  { %v7317_v51 = vpack.c.bf16 %v7309_v2, %v7309_v2 }
 0x682   :  { %7989 = vmatprep.mubr.bf16.mxu1 %v7317_v51 }
 0x683   :  { %7990 = vmatmul.mubr.bf16.vlgmr.msra.gmra.mxu1 %v7316_v45 }
 0x697   :  { %v9127_v3 = vpop.f32.mrf.mxu0 }
 0x698   :  { %v9149_v14 = vpop.f32.mrf.mxu1 }
 0x699   :  { %v9128_v32 = vpop.f32.mrf.mxu0 }
 0x69a   :  { %v9129_v36 = vadd.f32 %v9128_v32, %v9127_v3  ;;  %v9150_v41 = vpop.f32.mrf.mxu1 }
 0x69b   :  { %v9151_v16 = vadd.f32 %v9150_v41, %v9149_v14  ;;  %v9130_v29 = vpop.f32.mrf.mxu0 }
 0x69c   :  { %v7872_v47 = vadd.f32 %v9129_v36, %v8958_v57  ;;  %v9152_v18 = vpop.f32.mrf.mxu1 }
 0x69d   :  { %v9131_v55 = vpop.f32.mrf.mxu0 }
 0x69e   :  { %v7912_v58 = vadd.f32 %v9151_v16, %v7872_v47  ;;  %v9153_v60 = vpop.f32.mrf.mxu1 }
 0x6c3   :  { %v9171_v61 = vpop.f32.mrf.mxu0 }
 0x6c5   :  { %v9172_v42 = vpop.f32.mrf.mxu0 }
 0x6c6   :  { %v9173_v44 = vadd.f32 %v9172_v42, %v9171_v61 }
 0x6c7   :  { %v9174_v62 = vpop.f32.mrf.mxu0 }
 0x6c8   :  { %v7952_v63 = vadd.f32 %v9173_v44, %v7912_v58 }
 0x6c9   :  { %v9175_v0 = vpop.f32.mrf.mxu0 }
 0x743   :  { %v9193_v39 = vpop.f32.mrf.mxu1 }
 0x745   :  { %v9194_v4 = vpop.f32.mrf.mxu1 }
 0x746   :  { %v9195_v27 = vadd.f32 %v9194_v4, %v9193_v39 }
 0x747   :  { %v9196_v48 = vpop.f32.mrf.mxu1 }
 0x748   :  { %v7992_v50 = vadd.f32 %v9195_v27, %v7952_v63 }
 0x749   :  { %v9197_v6 = vpop.f32.mrf.mxu1 }
 0x74a   :  { %v7998_v35 = vsel %vm7997_vm2, %v7992_v50, -inf  ;;  %v8011_v49 = vmul.f32 %v7992_v50, %v9934_v26  ;;  %v8010_v23 = vmul.f32 %v9930_v21, %v7992_v50 }
 0x74b   :  { %7999 = vmax.xlane.f32.xlu0 %v7998_v35 }
 0x74f   :  { %2516 = vmax.xlane.f32.xlu0 %v2515_v31 }
 0x753   :  { %2530 = vadd.xlane.f32.xlu0 %v2529_v13 }
 0x7d4   :  { %v8000_v40 = vpop.xlane.xlu0 %7999 }
 0x7d5   :  { %v8001_v56 = vsub.f32 %v7992_v50, %v8000_v40 }
 0x7d7   :  { %v8002_v7 = vmul.f32 1.442695, %v8001_v56 }
 0x7d8   :  { %v2517_v53 = vpop.xlane.xlu0 %2516 }
 0x7d9   :  { %v2518_v54 = vsub.f32 %v10065_v33, %v2517_v53 }
 0x7db   :  { %v2519_v8 = vmul.f32 1.442695, %v2518_v54 }
 0x7dc   :  { %v2531_v17 = vpop.xlane.xlu0 %2530 }
 0x7dd   :  { %9456 = vpow2.f32 %v2519_v8 }
 0x7de   :  { %9458 = vpow2.f32 %v8002_v7 }
 0x7ea   :  { %v9457_v10 = vpop.eup %9456 }
 0x7eb   :  { %v2521_v11 = vsel %vm2514_vm3, %v9457_v10, 0.0  ;;  %v9459_v12 = vpop.eup %9458 }
 0x7ec   :  { %2522 = vadd.xlane.f32.xlu1 %v2521_v11  ;;  %v8004_v52 = vsel %vm7997_vm2, %v9459_v12, 0.0 }
 0x7f0   :  { %8005 = vadd.xlane.f32.xlu1 %v8004_v52 }
 0x801   :  { %8013 = vrot.lane.b32.xlu1 %v8011_v49, %s9760_s1 }
 0x875   :  { %v2523_v1 = vpop.xlane.xlu1 %2522 }
 0x876   :  { %9460 = vlog2.f32 %v2523_v1 }
 0x879   :  { %v8006_v37 = vpop.xlane.xlu1 %8005 }
 0x87a   :  { %9462 = vlog2.f32 %v8006_v37 }
 0x87d   :  { %v8014_v20 = vpop.permute.xlu1 %8013 }
 0x87e   :  { %v8016_v28 = vadd.f32 %v8014_v20, %v8010_v23 }
 0x883   :  { %v9461_v33 = vpop.eup %9460 }
 0x884   :  { %v2525_v59 = vmul.f32 0.6931472, %v9461_v33 }
 0x886   :  { %v2526_v9 = vadd.f32 %v2525_v59, %v2517_v53 }
 0x887   :  { %v9463_v46 = vpop.eup %9462 }
 0x888   :  { %v2532_v38 = vsub.f32 %v2526_v9, %v2531_v17  ;;  %v8008_v22 = vmul.f32 0.6931472, %v9463_v46 }
 0x88a   :  { %v2533_v24 = vmul.f32 %v9930_v21, %v2532_v38  ;;  %v8009_v25 = vadd.f32 %v8008_v22, %v8000_v40 }
 0x88c   :  { %v2534_v30 = vsel %vm708_vm1, %v2533_v24, 0.0  ;;  %v8017_v2 = vsub.f32 %v8009_v25, %v8016_v28 }
 0x88d   :  { %v2535_v43 = vrot.slane %v2534_v30, 4 }
 0x88e   :  { %v8020_v51 = vmul.f32 %v8019_v5, %v8017_v2 }
 0x88f   :  { %v2536_v26 = vadd.f32 %v2535_v43, %v2534_v30 }
 0x890   :  { %v8022_v45 = vsel %vm8021_vm4, %v8020_v51, 0.0 }
 0x891   :  { %v8023_v3 = vrot.slane %v8022_v45, 4  ;;  %v2537_v14 = vrot.slane %v2536_v26, 2 }
 0x893   :  { %v8024_v57 = vadd.f32 %v8023_v3, %v8022_v45  ;;  %v2538_v32 = vadd.f32 %v2537_v14, %v2536_v26 }
 0x895   :  { %v8025_v36 = vrot.slane %v8024_v57, 2  ;;  %v2539_v16 = vrot.slane %v2538_v32, 1 }
 0x897   :  { %v8026_v41 = vadd.f32 %v8025_v36, %v8024_v57  ;;  %v2540_v47 = vadd.f32 %v2539_v16, %v2538_v32 }
 0x899   :  { %v8027_v29 = vrot.slane %v8026_v41, 1  ;;  %v2541_v55 = vmul.f32 0.25, %v2540_v47 }
 0x89b   :  { %v8028_v18 = vadd.f32 %v8027_v29, %v8026_v41 }
 0x89d   :  { %v8030_v21 = vmul.f32 0.125, %v8028_v18 }
 0x89f   :  { %v8031_v58 = vmul.f32 0.1, %v8030_v21 }
 0x8a1   :  { %v8032_v60 = vadd.f32 %v8031_v58, %v2541_v55 }
 0x8a3   :  { %8034 = vst.msk [vmem:[#allocation22] sm:$0x1] %vm8033_vm5, %v8032_v60 }
 0x8a4   :  { %9716 = shalt.err (!%p9713_p8)
}
 0x8a5   :  { %8044 = dma.vmem_to_hbm [thread:$0]  %s8042_s11, 16, %s10228_s16, [#allocation4]  }
 0x8a6   :  { %9739 = dma.done.wait [#allocation4], 16  }
 0x8a7   :  { %9740 = vsyncadd [#allocation4], 4294967280 }
 0x8a8   :  { %8048 = vsyncpa [#allocation3], 1 }
 0x8a9   :  { %8049 = vsyncpa [#allocation6], 1 }
 0x8aa   :  { %8050 = vsyncpa [#allocation9], 1 }
 0x8ab   :  { %8051 = vsyncpa [#allocation12], 1 }
 0x8ac   :  { %8052 = vsyncpa [#allocation15], 1 }
 0x8ad   :  { %8053 = vsyncpa [#allocation18], 1 }
 0x8ae   :  { %8054 = vsyncpa [#allocation21], 1 }
 0x8af   :  { %8055 = vsyncpa [#allocation4], 1 }

</bundles_post_ra>
